<compile_context>
chip_gen: v5e
topology: v5e:2x2
jax: 0.10.0
libtpu: 0.0.40
codegen_flags: <defaults>
</compile_context>

<pallas_src>
import functools

import jax
import jax.numpy as jnp
from jax.experimental import pallas as pl
from jax.experimental.pallas import tpu as pltpu


# --------------------------------------------------------------------------
# Single fused Pallas kernel: 4x GraphConv + edge head + density
# --------------------------------------------------------------------------

def _sharc_fused_kernel(*refs, num_conv):
    refs = list(refs)

    # ---- unpack inputs -----------------------------------------------------
    feat_ref, clus_ref, adj_ref, rawm_ref, rdst_ref, tsrc_ref, sred_ref = refs[:7]
    idx = 7
    l0 = refs[idx:idx + 9]; idx += 9                      # layer 0 (split weights)
    rest_layers = []
    for _ in range(num_conv - 1):
        rest_layers.append(refs[idx:idx + 7]); idx += 7   # layers 1..num_conv-1
    (wsrc_ref, bsrc_ref, wdst_ref, bdst_ref, a1_ref, w1_ref, b1_ref,
     a2_ref, w2_ref, b2_ref) = refs[idx:idx + 10]; idx += 10
    # ---- unpack outputs ----------------------------------------------------
    h_out_ref, conn_ref, prob_ref, den_ref = refs[idx:idx + 4]

    f32 = jnp.float32
    adj = adj_ref[...]
    edge_mask = adj > 0.0

    def mm(a, b):
        return jnp.dot(a, b, preferred_element_type=f32)

    def gat_aggregate(h, asrc, adst, gbias):
        # e[d, s] = leaky_relu(a_dst . h[d] + a_src . h[s]); masked softmax over s.
        er = jnp.sum(h * adst, axis=1, keepdims=True)                        # (N, 1)
        el = jax.lax.dot_general(asrc, h, (((1,), (1,)), ((), ())),
                                 preferred_element_type=f32)                 # (1, N)
        e = er + el                                                          # (N, N)
        e = jnp.where(e >= 0.0, e, 0.2 * e)                                  # leaky_relu(0.2)
        e = jnp.where(edge_mask, e, f32(-1e30))
        m = jnp.max(e, axis=1, keepdims=True)
        p = jnp.where(edge_mask, jnp.exp(e - m), 0.0)
        denom = jnp.sum(p, axis=1, keepdims=True)
        alpha = p * pl.reciprocal(jnp.maximum(denom, 1e-20), approx=True)
        return mm(alpha, h) + gbias                                          # (N, D)

    # ---- GraphConv layer 0 (feature concat folded into a row-split of weights).
    feat = feat_ref[...]
    clus = clus_ref[...]
    wgf, wgc, asrc0, adst0, gb0, wxf, wxc, wagg0, b0 = (r[...] for r in l0)
    h0 = mm(feat, wgf) + mm(clus, wgc)                    # == concat(feat,clus) @ wgat
    agg0 = gat_aggregate(h0, asrc0, adst0, gb0)
    x = jnp.maximum(mm(feat, wxf) + mm(clus, wxc) + mm(agg0, wagg0) + b0, 0.0)

    # ---- GraphConv layers 1..num_conv-1.
    for lrefs in rest_layers:
        wgat, asrc, adst, gbias, wx, wagg, b = (r[...] for r in lrefs)
        h = mm(x, wgat)
        agg = gat_aggregate(h, asrc, adst, gbias)
        x = jnp.maximum(mm(x, wx) + mm(agg, wagg) + b, 0.0)

    h_out_ref[...] = x                                                       # conv_features

    # ---- Edge head: node-level src/dst MLPs, expanded to edges with one-hot
    # matmuls (rdst/tsrc) so no gathers or relayout reshapes are needed.
    s_node = mm(x, wsrc_ref[...]) + bsrc_ref[...]                            # (N, H)
    d_node = mm(x, wdst_ref[...]) + bdst_ref[...]                            # (N, H)
    z = mm(rdst_ref[...], d_node) + mm(tsrc_ref[...], s_node)                # (E, H)
    a1 = a1_ref[...]
    z = jnp.where(z >= 0.0, z, a1 * z)                                       # PReLU
    z = mm(z, w1_ref[...]) + b1_ref[...]
    a2 = a2_ref[...]
    z = jnp.where(z >= 0.0, z, a2 * z)                                       # PReLU
    logits = mm(z, w2_ref[...]) + b2_ref[...]                                # (E, 2)
    conn_ref[...] = logits

    # softmax over the 2 classes (dim=1).
    m = jnp.max(logits, axis=1, keepdims=True)
    ex = jnp.exp(logits - m)
    prob = ex * pl.reciprocal(jnp.sum(ex, axis=1, keepdims=True), approx=True)
    prob_ref[...] = prob

    # pred_den message: raw_affine * (p1 - p0); note p1 - p0 == tanh((l1-l0)/2)
    # exactly for a 2-class softmax. rawm already carries the edge mask.
    ldiff = logits[:, 1:2] - logits[:, 0:1]                                  # (E, 1)
    msg = rawm_ref[...] * jnp.tanh(0.5 * ldiff)                              # (E, 1)
    # per-dst mean over in-edges: one-hot segment-sum matmul + degree normalize.
    den_num = mm(sred_ref[...], msg)                                         # (N, 1)
    deg = jnp.sum(adj, axis=1, keepdims=True)
    den_ref[...] = den_num * pl.reciprocal(jnp.maximum(deg, 1.0), approx=True)


# --------------------------------------------------------------------------
# Wrapper
# --------------------------------------------------------------------------

def sharc_forward(params, features, cluster_features, adj, raw_affine):
    """Equivalent of main_model.forward on a single DGL graph (dense form)."""
    N, F = features.shape
    E = N * N
    H = params['edge']['wsrc'].shape[0]
    num_conv = len(params['conv'])

    # One-hot edge-construction / segment-sum constants for the dst-major edge
    # ordering e = dst*N + src (constant-folded under jit; ~N*E*4 bytes each).
    eye = jnp.eye(N, dtype=jnp.float32)
    rdst = jnp.repeat(eye, N, axis=0)       # (E, N): rdst[d*N+s, d] = 1  (dst select)
    tsrc = jnp.tile(eye, (N, 1))            # (E, N): tsrc[d*N+s, s] = 1  (src select)
    sred = jnp.repeat(eye, N, axis=1)       # (N, E): sred[d, d*N+s] = 1  (segment sum)

    # Edge-existence mask folded into raw_affine (per-edge column, dst-major).
    rawm = (raw_affine * adj).reshape(E, 1)

    c0 = params['conv'][0]
    inputs = [features, cluster_features, adj, rawm, rdst, tsrc, sred,
              c0['wgat'][:F], c0['wgat'][F:], c0['attn_src'], c0['attn_dst'],
              c0['gat_bias'], c0['wx'][:F], c0['wx'][F:], c0['wagg'], c0['b']]
    for layer in params['conv'][1:]:
        inputs += [layer['wgat'], layer['attn_src'], layer['attn_dst'],
                   layer['gat_bias'], layer['wx'], layer['wagg'], layer['b']]
    ep = params['edge']
    inputs += [ep['wsrc'], ep['bsrc'], ep['wdst'], ep['bdst'],
               ep['prelu1'], ep['w1'], ep['b1'], ep['prelu2'], ep['w2'], ep['b2']]

    vmem = pl.BlockSpec(memory_space=pltpu.MemorySpace.VMEM)
    out_shape = (
        jax.ShapeDtypeStruct((N, H), jnp.float32),   # conv_features
        jax.ShapeDtypeStruct((E, 2), jnp.float32),   # pred_conn
        jax.ShapeDtypeStruct((E, 2), jnp.float32),   # prob_conn
        jax.ShapeDtypeStruct((N, 1), jnp.float32),   # pred_den
    )
    h, pred_conn, prob_conn, pred_den = pl.pallas_call(
        functools.partial(_sharc_fused_kernel, num_conv=num_conv),
        out_shape=out_shape,
        in_specs=[vmem] * len(inputs),
        out_specs=[vmem] * len(out_shape),
    )(*inputs)
    return h, pred_conn, prob_conn, pred_den[:, 0]


# --------------------------------------------------------------------------
# Deterministic parameter init (shapes follow SHARC.__init__)
# --------------------------------------------------------------------------

def init_params(key, feature_dim=16, nhid=32, num_conv=4):
    nhid_half = nhid // 2
    in_dims = [2 * feature_dim, nhid, nhid, nhid_half][:num_conv]
    out_dims = [nhid, nhid, nhid_half, nhid_half][:num_conv]

    keys = iter(jax.random.split(key, 64))

    def dense(shape):
        k = next(keys)
        scale = 1.0 / jnp.sqrt(jnp.float32(shape[0]))
        return jax.random.uniform(k, shape, jnp.float32, -1.0, 1.0) * scale

    conv = []
    for din, dout in zip(in_dims, out_dims):
        conv.append(dict(
            wgat=dense((din, din)),                   # GATConv fc (transposed)
            attn_src=dense((1, din)),                 # GATConv attn_l
            attn_dst=dense((1, din)),                 # GATConv attn_r
            gat_bias=jnp.zeros((1, din), jnp.float32),
            wx=dense((din, dout)),                    # Linear(2*din, dout) split
            wagg=dense((din, dout)),
            b=jnp.zeros((1, dout), jnp.float32),
        ))

    H = nhid_half
    edge = dict(
        wsrc=dense((H, H)), bsrc=jnp.zeros((1, H), jnp.float32),   # src_mlp
        wdst=dense((H, H)), bdst=jnp.zeros((1, H), jnp.float32),   # dst_mlp
        prelu1=jnp.full((1, H), 0.25, jnp.float32),                # nn.PReLU(H)
        w1=dense((H, H)), b1=jnp.zeros((1, H), jnp.float32),       # Linear(H, H)
        prelu2=jnp.full((1, H), 0.25, jnp.float32),                # nn.PReLU(H)
        w2=dense((H, 2)), b2=jnp.zeros((1, 2), jnp.float32),       # Linear(H, 2)
    )
    return dict(conv=conv, edge=edge)


# --------------------------------------------------------------------------

if __name__ == "__main__":
    key = jax.random.PRNGKey(0)
    k_feat, k_clus, k_adj, k_aff, k_par = jax.random.split(key, 5)

    N, F, NHID = 16, 16, 32                          # nodes, feature_dim, nhid

    features = jax.random.normal(k_feat, (N, F), jnp.float32)
    cluster_features = jax.random.normal(k_clus, (N, F), jnp.float32)

    adj = (jax.random.uniform(k_adj, (N, N)) < 0.3).astype(jnp.float32)
    adj = jnp.maximum(adj, jnp.eye(N, dtype=jnp.float32))   # self loops (deg > 0)
    raw_affine = jax.random.normal(k_aff, (N, N), jnp.float32)

    params = init_params(k_par, feature_dim=F, nhid=NHID, num_conv=4)

    fwd = jax.jit(sharc_forward)
    conv_feats, pred_conn, prob_conn, pred_den = fwd(
        params, features, cluster_features, adj, raw_affine)
    jax.block_until_ready((conv_feats, pred_conn, prob_conn, pred_den))

    assert conv_feats.shape == (N, NHID // 2)
    assert pred_conn.shape == (N * N, 2)
    assert prob_conn.shape == (N * N, 2)
    assert pred_den.shape == (N,)
    print("KERNEL_OK")
</pallas_src>

<mosaic_0001>
module attributes {stable_mosaic.version = 11 : i64} {
  func.func @_sharc_fused_kernel(%arg0: memref<16x16xf32, #tpu.memory_space<vmem>>, %arg1: memref<16x16xf32, #tpu.memory_space<vmem>>, %arg2: memref<16x16xf32, #tpu.memory_space<vmem>>, %arg3: memref<256x1xf32, #tpu.memory_space<vmem>>, %arg4: memref<256x16xf32, #tpu.memory_space<vmem>>, %arg5: memref<256x16xf32, #tpu.memory_space<vmem>>, %arg6: memref<16x256xf32, #tpu.memory_space<vmem>>, %arg7: memref<16x32xf32, #tpu.memory_space<vmem>>, %arg8: memref<16x32xf32, #tpu.memory_space<vmem>>, %arg9: memref<1x32xf32, #tpu.memory_space<vmem>>, %arg10: memref<1x32xf32, #tpu.memory_space<vmem>>, %arg11: memref<1x32xf32, #tpu.memory_space<vmem>>, %arg12: memref<16x32xf32, #tpu.memory_space<vmem>>, %arg13: memref<16x32xf32, #tpu.memory_space<vmem>>, %arg14: memref<32x32xf32, #tpu.memory_space<vmem>>, %arg15: memref<1x32xf32, #tpu.memory_space<vmem>>, %arg16: memref<32x32xf32, #tpu.memory_space<vmem>>, %arg17: memref<1x32xf32, #tpu.memory_space<vmem>>, %arg18: memref<1x32xf32, #tpu.memory_space<vmem>>, %arg19: memref<1x32xf32, #tpu.memory_space<vmem>>, %arg20: memref<32x32xf32, #tpu.memory_space<vmem>>, %arg21: memref<32x32xf32, #tpu.memory_space<vmem>>, %arg22: memref<1x32xf32, #tpu.memory_space<vmem>>, %arg23: memref<32x32xf32, #tpu.memory_space<vmem>>, %arg24: memref<1x32xf32, #tpu.memory_space<vmem>>, %arg25: memref<1x32xf32, #tpu.memory_space<vmem>>, %arg26: memref<1x32xf32, #tpu.memory_space<vmem>>, %arg27: memref<32x16xf32, #tpu.memory_space<vmem>>, %arg28: memref<32x16xf32, #tpu.memory_space<vmem>>, %arg29: memref<1x16xf32, #tpu.memory_space<vmem>>, %arg30: memref<16x16xf32, #tpu.memory_space<vmem>>, %arg31: memref<1x16xf32, #tpu.memory_space<vmem>>, %arg32: memref<1x16xf32, #tpu.memory_space<vmem>>, %arg33: memref<1x16xf32, #tpu.memory_space<vmem>>, %arg34: memref<16x16xf32, #tpu.memory_space<vmem>>, %arg35: memref<16x16xf32, #tpu.memory_space<vmem>>, %arg36: memref<1x16xf32, #tpu.memory_space<vmem>>, %arg37: memref<16x16xf32, #tpu.memory_space<vmem>>, %arg38: memref<1x16xf32, #tpu.memory_space<vmem>>, %arg39: memref<16x16xf32, #tpu.memory_space<vmem>>, %arg40: memref<1x16xf32, #tpu.memory_space<vmem>>, %arg41: memref<1x16xf32, #tpu.memory_space<vmem>>, %arg42: memref<16x16xf32, #tpu.memory_space<vmem>>, %arg43: memref<1x16xf32, #tpu.memory_space<vmem>>, %arg44: memref<1x16xf32, #tpu.memory_space<vmem>>, %arg45: memref<16x2xf32, #tpu.memory_space<vmem>>, %arg46: memref<1x2xf32, #tpu.memory_space<vmem>>, %arg47: memref<16x16xf32, #tpu.memory_space<vmem>>, %arg48: memref<256x2xf32, #tpu.memory_space<vmem>>, %arg49: memref<256x2xf32, #tpu.memory_space<vmem>>, %arg50: memref<16x1xf32, #tpu.memory_space<vmem>>) attributes {dimension_semantics = [], scalar_prefetch = 0 : i64, scratch_operands = 0 : i64, tpu.core_type = #tpu.core_type<tc>} {
    %c0 = arith.constant 0 : index
    %c0_0 = arith.constant 0 : index
    %0 = vector.load %arg2[%c0, %c0_0] : memref<16x16xf32, #tpu.memory_space<vmem>>, vector<16x16xf32>
    %cst = arith.constant 0.000000e+00 : f32
    %1 = vector.broadcast %cst : f32 to vector<16x16xf32>
    %2 = arith.cmpf ogt, %0, %1 : vector<16x16xf32>
    %c0_1 = arith.constant 0 : index
    %c0_2 = arith.constant 0 : index
    %3 = vector.load %arg0[%c0_1, %c0_2] : memref<16x16xf32, #tpu.memory_space<vmem>>, vector<16x16xf32>
    %c0_3 = arith.constant 0 : index
    %c0_4 = arith.constant 0 : index
    %4 = vector.load %arg1[%c0_3, %c0_4] : memref<16x16xf32, #tpu.memory_space<vmem>>, vector<16x16xf32>
    %c0_5 = arith.constant 0 : index
    %c0_6 = arith.constant 0 : index
    %5 = vector.load %arg7[%c0_5, %c0_6] : memref<16x32xf32, #tpu.memory_space<vmem>>, vector<16x32xf32>
    %c0_7 = arith.constant 0 : index
    %c0_8 = arith.constant 0 : index
    %6 = vector.load %arg8[%c0_7, %c0_8] : memref<16x32xf32, #tpu.memory_space<vmem>>, vector<16x32xf32>
    %c0_9 = arith.constant 0 : index
    %c0_10 = arith.constant 0 : index
    %7 = vector.load %arg9[%c0_9, %c0_10] : memref<1x32xf32, #tpu.memory_space<vmem>>, vector<1x32xf32>
    %c0_11 = arith.constant 0 : index
    %c0_12 = arith.constant 0 : index
    %8 = vector.load %arg10[%c0_11, %c0_12] : memref<1x32xf32, #tpu.memory_space<vmem>>, vector<1x32xf32>
    %c0_13 = arith.constant 0 : index
    %c0_14 = arith.constant 0 : index
    %9 = vector.load %arg11[%c0_13, %c0_14] : memref<1x32xf32, #tpu.memory_space<vmem>>, vector<1x32xf32>
    %c0_15 = arith.constant 0 : index
    %c0_16 = arith.constant 0 : index
    %10 = vector.load %arg12[%c0_15, %c0_16] : memref<16x32xf32, #tpu.memory_space<vmem>>, vector<16x32xf32>
    %c0_17 = arith.constant 0 : index
    %c0_18 = arith.constant 0 : index
    %11 = vector.load %arg13[%c0_17, %c0_18] : memref<16x32xf32, #tpu.memory_space<vmem>>, vector<16x32xf32>
    %c0_19 = arith.constant 0 : index
    %c0_20 = arith.constant 0 : index
    %12 = vector.load %arg14[%c0_19, %c0_20] : memref<32x32xf32, #tpu.memory_space<vmem>>, vector<32x32xf32>
    %c0_21 = arith.constant 0 : index
    %c0_22 = arith.constant 0 : index
    %13 = vector.load %arg15[%c0_21, %c0_22] : memref<1x32xf32, #tpu.memory_space<vmem>>, vector<1x32xf32>
    %cst_23 = arith.constant dense<0.000000e+00> : vector<16x32xf32>
    %14 = tpu.matmul %3, %5, %cst_23 {dimension_numbers = #tpu.dot_dimension_numbers<[1], [0], [0], [1], [0, 0, 1, 1], [], []>} : vector<16x16xf32>, vector<16x32xf32>, vector<16x32xf32> -> vector<16x32xf32>
    %cst_24 = arith.constant dense<0.000000e+00> : vector<16x32xf32>
    %15 = tpu.matmul %4, %6, %cst_24 {dimension_numbers = #tpu.dot_dimension_numbers<[1], [0], [0], [1], [0, 0, 1, 1], [], []>} : vector<16x16xf32>, vector<16x32xf32>, vector<16x32xf32> -> vector<16x32xf32>
    %16 = arith.addf %14, %15 : vector<16x32xf32>
    %17 = vector.broadcast %8 : vector<1x32xf32> to vector<16x32xf32>
    %18 = arith.mulf %16, %17 : vector<16x32xf32>
    %cst_25 = arith.constant dense<0.000000e+00> : vector<16xf32>
    %19 = vector.multi_reduction <add>, %18, %cst_25 [1] : vector<16x32xf32> to vector<16xf32>
    %20 = vector.shape_cast %19 : vector<16xf32> to vector<16x1xf32>
    %cst_26 = arith.constant dense<0.000000e+00> : vector<1x16xf32>
    %21 = tpu.matmul %7, %16, %cst_26 {dimension_numbers = #tpu.dot_dimension_numbers<[1], [1], [0], [0], [0, 0, 1, 0], [], []>} : vector<1x32xf32>, vector<16x32xf32>, vector<1x16xf32> -> vector<1x16xf32>
    %22 = vector.broadcast %20 : vector<16x1xf32> to vector<16x16xf32>
    %23 = vector.broadcast %21 : vector<1x16xf32> to vector<16x16xf32>
    %24 = arith.addf %22, %23 : vector<16x16xf32>
    %cst_27 = arith.constant 0.000000e+00 : f32
    %25 = vector.broadcast %cst_27 : f32 to vector<16x16xf32>
    %26 = arith.cmpf oge, %24, %25 : vector<16x16xf32>
    %cst_28 = arith.constant 2.000000e-01 : f32
    %27 = vector.broadcast %cst_28 : f32 to vector<16x16xf32>
    %28 = arith.mulf %27, %24 : vector<16x16xf32>
    %29 = arith.select %26, %24, %28 : vector<16x16xi1>, vector<16x16xf32>
    %cst_29 = arith.constant -1.000000e+30 : f32
    %30 = vector.broadcast %cst_29 : f32 to vector<16x16xf32>
    %31 = arith.select %2, %29, %30 : vector<16x16xi1>, vector<16x16xf32>
    %cst_30 = arith.constant dense<0xFF800000> : vector<16xf32>
    %32 = vector.multi_reduction <maximumf>, %31, %cst_30 [1] : vector<16x16xf32> to vector<16xf32>
    %33 = vector.shape_cast %32 : vector<16xf32> to vector<16x1xf32>
    %34 = vector.broadcast %33 : vector<16x1xf32> to vector<16x16xf32>
    %35 = arith.subf %31, %34 : vector<16x16xf32>
    %36 = math.exp %35 : vector<16x16xf32>
    %cst_31 = arith.constant 0.000000e+00 : f32
    %37 = vector.broadcast %cst_31 : f32 to vector<16x16xf32>
    %38 = arith.select %2, %36, %37 : vector<16x16xi1>, vector<16x16xf32>
    %cst_32 = arith.constant dense<0.000000e+00> : vector<16xf32>
    %39 = vector.multi_reduction <add>, %38, %cst_32 [1] : vector<16x16xf32> to vector<16xf32>
    %40 = vector.shape_cast %39 : vector<16xf32> to vector<16x1xf32>
    %cst_33 = arith.constant 9.99999968E-21 : f32
    %41 = vector.broadcast %cst_33 : f32 to vector<16x1xf32>
    %42 = arith.maximumf %40, %41 : vector<16x1xf32>
    %43 = tpu.reciprocal %42 {approx = true} : vector<16x1xf32> -> vector<16x1xf32>
    %44 = vector.broadcast %43 : vector<16x1xf32> to vector<16x16xf32>
    %45 = arith.mulf %38, %44 : vector<16x16xf32>
    %cst_34 = arith.constant dense<0.000000e+00> : vector<16x32xf32>
    %46 = tpu.matmul %45, %16, %cst_34 {dimension_numbers = #tpu.dot_dimension_numbers<[1], [0], [0], [1], [0, 0, 1, 1], [], []>} : vector<16x16xf32>, vector<16x32xf32>, vector<16x32xf32> -> vector<16x32xf32>
    %47 = vector.broadcast %9 : vector<1x32xf32> to vector<16x32xf32>
    %48 = arith.addf %46, %47 : vector<16x32xf32>
    %cst_35 = arith.constant dense<0.000000e+00> : vector<16x32xf32>
    %49 = tpu.matmul %3, %10, %cst_35 {dimension_numbers = #tpu.dot_dimension_numbers<[1], [0], [0], [1], [0, 0, 1, 1], [], []>} : vector<16x16xf32>, vector<16x32xf32>, vector<16x32xf32> -> vector<16x32xf32>
    %cst_36 = arith.constant dense<0.000000e+00> : vector<16x32xf32>
    %50 = tpu.matmul %4, %11, %cst_36 {dimension_numbers = #tpu.dot_dimension_numbers<[1], [0], [0], [1], [0, 0, 1, 1], [], []>} : vector<16x16xf32>, vector<16x32xf32>, vector<16x32xf32> -> vector<16x32xf32>
    %51 = arith.addf %49, %50 : vector<16x32xf32>
    %cst_37 = arith.constant dense<0.000000e+00> : vector<16x32xf32>
    %52 = tpu.matmul %48, %12, %cst_37 {dimension_numbers = #tpu.dot_dimension_numbers<[1], [0], [0], [1], [0, 0, 1, 1], [], []>} : vector<16x32xf32>, vector<32x32xf32>, vector<16x32xf32> -> vector<16x32xf32>
    %53 = arith.addf %51, %52 : vector<16x32xf32>
    %54 = vector.broadcast %13 : vector<1x32xf32> to vector<16x32xf32>
    %55 = arith.addf %53, %54 : vector<16x32xf32>
    %cst_38 = arith.constant 0.000000e+00 : f32
    %56 = vector.broadcast %cst_38 : f32 to vector<16x32xf32>
    %57 = arith.maximumf %55, %56 : vector<16x32xf32>
    %c0_39 = arith.constant 0 : index
    %c0_40 = arith.constant 0 : index
    %58 = vector.load %arg16[%c0_39, %c0_40] : memref<32x32xf32, #tpu.memory_space<vmem>>, vector<32x32xf32>
    %c0_41 = arith.constant 0 : index
    %c0_42 = arith.constant 0 : index
    %59 = vector.load %arg17[%c0_41, %c0_42] : memref<1x32xf32, #tpu.memory_space<vmem>>, vector<1x32xf32>
    %c0_43 = arith.constant 0 : index
    %c0_44 = arith.constant 0 : index
    %60 = vector.load %arg18[%c0_43, %c0_44] : memref<1x32xf32, #tpu.memory_space<vmem>>, vector<1x32xf32>
    %c0_45 = arith.constant 0 : index
    %c0_46 = arith.constant 0 : index
    %61 = vector.load %arg19[%c0_45, %c0_46] : memref<1x32xf32, #tpu.memory_space<vmem>>, vector<1x32xf32>
    %c0_47 = arith.constant 0 : index
    %c0_48 = arith.constant 0 : index
    %62 = vector.load %arg20[%c0_47, %c0_48] : memref<32x32xf32, #tpu.memory_space<vmem>>, vector<32x32xf32>
    %c0_49 = arith.constant 0 : index
    %c0_50 = arith.constant 0 : index
    %63 = vector.load %arg21[%c0_49, %c0_50] : memref<32x32xf32, #tpu.memory_space<vmem>>, vector<32x32xf32>
    %c0_51 = arith.constant 0 : index
    %c0_52 = arith.constant 0 : index
    %64 = vector.load %arg22[%c0_51, %c0_52] : memref<1x32xf32, #tpu.memory_space<vmem>>, vector<1x32xf32>
    %cst_53 = arith.constant dense<0.000000e+00> : vector<16x32xf32>
    %65 = tpu.matmul %57, %58, %cst_53 {dimension_numbers = #tpu.dot_dimension_numbers<[1], [0], [0], [1], [0, 0, 1, 1], [], []>} : vector<16x32xf32>, vector<32x32xf32>, vector<16x32xf32> -> vector<16x32xf32>
    %66 = vector.broadcast %60 : vector<1x32xf32> to vector<16x32xf32>
    %67 = arith.mulf %65, %66 : vector<16x32xf32>
    %cst_54 = arith.constant dense<0.000000e+00> : vector<16xf32>
    %68 = vector.multi_reduction <add>, %67, %cst_54 [1] : vector<16x32xf32> to vector<16xf32>
    %69 = vector.shape_cast %68 : vector<16xf32> to vector<16x1xf32>
    %cst_55 = arith.constant dense<0.000000e+00> : vector<1x16xf32>
    %70 = tpu.matmul %59, %65, %cst_55 {dimension_numbers = #tpu.dot_dimension_numbers<[1], [1], [0], [0], [0, 0, 1, 0], [], []>} : vector<1x32xf32>, vector<16x32xf32>, vector<1x16xf32> -> vector<1x16xf32>
    %71 = vector.broadcast %69 : vector<16x1xf32> to vector<16x16xf32>
    %72 = vector.broadcast %70 : vector<1x16xf32> to vector<16x16xf32>
    %73 = arith.addf %71, %72 : vector<16x16xf32>
    %cst_56 = arith.constant 0.000000e+00 : f32
    %74 = vector.broadcast %cst_56 : f32 to vector<16x16xf32>
    %75 = arith.cmpf oge, %73, %74 : vector<16x16xf32>
    %cst_57 = arith.constant 2.000000e-01 : f32
    %76 = vector.broadcast %cst_57 : f32 to vector<16x16xf32>
    %77 = arith.mulf %76, %73 : vector<16x16xf32>
    %78 = arith.select %75, %73, %77 : vector<16x16xi1>, vector<16x16xf32>
    %cst_58 = arith.constant -1.000000e+30 : f32
    %79 = vector.broadcast %cst_58 : f32 to vector<16x16xf32>
    %80 = arith.select %2, %78, %79 : vector<16x16xi1>, vector<16x16xf32>
    %cst_59 = arith.constant dense<0xFF800000> : vector<16xf32>
    %81 = vector.multi_reduction <maximumf>, %80, %cst_59 [1] : vector<16x16xf32> to vector<16xf32>
    %82 = vector.shape_cast %81 : vector<16xf32> to vector<16x1xf32>
    %83 = vector.broadcast %82 : vector<16x1xf32> to vector<16x16xf32>
    %84 = arith.subf %80, %83 : vector<16x16xf32>
    %85 = math.exp %84 : vector<16x16xf32>
    %cst_60 = arith.constant 0.000000e+00 : f32
    %86 = vector.broadcast %cst_60 : f32 to vector<16x16xf32>
    %87 = arith.select %2, %85, %86 : vector<16x16xi1>, vector<16x16xf32>
    %cst_61 = arith.constant dense<0.000000e+00> : vector<16xf32>
    %88 = vector.multi_reduction <add>, %87, %cst_61 [1] : vector<16x16xf32> to vector<16xf32>
    %89 = vector.shape_cast %88 : vector<16xf32> to vector<16x1xf32>
    %cst_62 = arith.constant 9.99999968E-21 : f32
    %90 = vector.broadcast %cst_62 : f32 to vector<16x1xf32>
    %91 = arith.maximumf %89, %90 : vector<16x1xf32>
    %92 = tpu.reciprocal %91 {approx = true} : vector<16x1xf32> -> vector<16x1xf32>
    %93 = vector.broadcast %92 : vector<16x1xf32> to vector<16x16xf32>
    %94 = arith.mulf %87, %93 : vector<16x16xf32>
    %cst_63 = arith.constant dense<0.000000e+00> : vector<16x32xf32>
    %95 = tpu.matmul %94, %65, %cst_63 {dimension_numbers = #tpu.dot_dimension_numbers<[1], [0], [0], [1], [0, 0, 1, 1], [], []>} : vector<16x16xf32>, vector<16x32xf32>, vector<16x32xf32> -> vector<16x32xf32>
    %96 = vector.broadcast %61 : vector<1x32xf32> to vector<16x32xf32>
    %97 = arith.addf %95, %96 : vector<16x32xf32>
    %cst_64 = arith.constant dense<0.000000e+00> : vector<16x32xf32>
    %98 = tpu.matmul %57, %62, %cst_64 {dimension_numbers = #tpu.dot_dimension_numbers<[1], [0], [0], [1], [0, 0, 1, 1], [], []>} : vector<16x32xf32>, vector<32x32xf32>, vector<16x32xf32> -> vector<16x32xf32>
    %cst_65 = arith.constant dense<0.000000e+00> : vector<16x32xf32>
    %99 = tpu.matmul %97, %63, %cst_65 {dimension_numbers = #tpu.dot_dimension_numbers<[1], [0], [0], [1], [0, 0, 1, 1], [], []>} : vector<16x32xf32>, vector<32x32xf32>, vector<16x32xf32> -> vector<16x32xf32>
    %100 = arith.addf %98, %99 : vector<16x32xf32>
    %101 = vector.broadcast %64 : vector<1x32xf32> to vector<16x32xf32>
    %102 = arith.addf %100, %101 : vector<16x32xf32>
    %cst_66 = arith.constant 0.000000e+00 : f32
    %103 = vector.broadcast %cst_66 : f32 to vector<16x32xf32>
    %104 = arith.maximumf %102, %103 : vector<16x32xf32>
    %c0_67 = arith.constant 0 : index
    %c0_68 = arith.constant 0 : index
    %105 = vector.load %arg23[%c0_67, %c0_68] : memref<32x32xf32, #tpu.memory_space<vmem>>, vector<32x32xf32>
    %c0_69 = arith.constant 0 : index
    %c0_70 = arith.constant 0 : index
    %106 = vector.load %arg24[%c0_69, %c0_70] : memref<1x32xf32, #tpu.memory_space<vmem>>, vector<1x32xf32>
    %c0_71 = arith.constant 0 : index
    %c0_72 = arith.constant 0 : index
    %107 = vector.load %arg25[%c0_71, %c0_72] : memref<1x32xf32, #tpu.memory_space<vmem>>, vector<1x32xf32>
    %c0_73 = arith.constant 0 : index
    %c0_74 = arith.constant 0 : index
    %108 = vector.load %arg26[%c0_73, %c0_74] : memref<1x32xf32, #tpu.memory_space<vmem>>, vector<1x32xf32>
    %c0_75 = arith.constant 0 : index
    %c0_76 = arith.constant 0 : index
    %109 = vector.load %arg27[%c0_75, %c0_76] : memref<32x16xf32, #tpu.memory_space<vmem>>, vector<32x16xf32>
    %c0_77 = arith.constant 0 : index
    %c0_78 = arith.constant 0 : index
    %110 = vector.load %arg28[%c0_77, %c0_78] : memref<32x16xf32, #tpu.memory_space<vmem>>, vector<32x16xf32>
    %c0_79 = arith.constant 0 : index
    %c0_80 = arith.constant 0 : index
    %111 = vector.load %arg29[%c0_79, %c0_80] : memref<1x16xf32, #tpu.memory_space<vmem>>, vector<1x16xf32>
    %cst_81 = arith.constant dense<0.000000e+00> : vector<16x32xf32>
    %112 = tpu.matmul %104, %105, %cst_81 {dimension_numbers = #tpu.dot_dimension_numbers<[1], [0], [0], [1], [0, 0, 1, 1], [], []>} : vector<16x32xf32>, vector<32x32xf32>, vector<16x32xf32> -> vector<16x32xf32>
    %113 = vector.broadcast %107 : vector<1x32xf32> to vector<16x32xf32>
    %114 = arith.mulf %112, %113 : vector<16x32xf32>
    %cst_82 = arith.constant dense<0.000000e+00> : vector<16xf32>
    %115 = vector.multi_reduction <add>, %114, %cst_82 [1] : vector<16x32xf32> to vector<16xf32>
    %116 = vector.shape_cast %115 : vector<16xf32> to vector<16x1xf32>
    %cst_83 = arith.constant dense<0.000000e+00> : vector<1x16xf32>
    %117 = tpu.matmul %106, %112, %cst_83 {dimension_numbers = #tpu.dot_dimension_numbers<[1], [1], [0], [0], [0, 0, 1, 0], [], []>} : vector<1x32xf32>, vector<16x32xf32>, vector<1x16xf32> -> vector<1x16xf32>
    %118 = vector.broadcast %116 : vector<16x1xf32> to vector<16x16xf32>
    %119 = vector.broadcast %117 : vector<1x16xf32> to vector<16x16xf32>
    %120 = arith.addf %118, %119 : vector<16x16xf32>
    %cst_84 = arith.constant 0.000000e+00 : f32
    %121 = vector.broadcast %cst_84 : f32 to vector<16x16xf32>
    %122 = arith.cmpf oge, %120, %121 : vector<16x16xf32>
    %cst_85 = arith.constant 2.000000e-01 : f32
    %123 = vector.broadcast %cst_85 : f32 to vector<16x16xf32>
    %124 = arith.mulf %123, %120 : vector<16x16xf32>
    %125 = arith.select %122, %120, %124 : vector<16x16xi1>, vector<16x16xf32>
    %cst_86 = arith.constant -1.000000e+30 : f32
    %126 = vector.broadcast %cst_86 : f32 to vector<16x16xf32>
    %127 = arith.select %2, %125, %126 : vector<16x16xi1>, vector<16x16xf32>
    %cst_87 = arith.constant dense<0xFF800000> : vector<16xf32>
    %128 = vector.multi_reduction <maximumf>, %127, %cst_87 [1] : vector<16x16xf32> to vector<16xf32>
    %129 = vector.shape_cast %128 : vector<16xf32> to vector<16x1xf32>
    %130 = vector.broadcast %129 : vector<16x1xf32> to vector<16x16xf32>
    %131 = arith.subf %127, %130 : vector<16x16xf32>
    %132 = math.exp %131 : vector<16x16xf32>
    %cst_88 = arith.constant 0.000000e+00 : f32
    %133 = vector.broadcast %cst_88 : f32 to vector<16x16xf32>
    %134 = arith.select %2, %132, %133 : vector<16x16xi1>, vector<16x16xf32>
    %cst_89 = arith.constant dense<0.000000e+00> : vector<16xf32>
    %135 = vector.multi_reduction <add>, %134, %cst_89 [1] : vector<16x16xf32> to vector<16xf32>
    %136 = vector.shape_cast %135 : vector<16xf32> to vector<16x1xf32>
    %cst_90 = arith.constant 9.99999968E-21 : f32
    %137 = vector.broadcast %cst_90 : f32 to vector<16x1xf32>
    %138 = arith.maximumf %136, %137 : vector<16x1xf32>
    %139 = tpu.reciprocal %138 {approx = true} : vector<16x1xf32> -> vector<16x1xf32>
    %140 = vector.broadcast %139 : vector<16x1xf32> to vector<16x16xf32>
    %141 = arith.mulf %134, %140 : vector<16x16xf32>
    %cst_91 = arith.constant dense<0.000000e+00> : vector<16x32xf32>
    %142 = tpu.matmul %141, %112, %cst_91 {dimension_numbers = #tpu.dot_dimension_numbers<[1], [0], [0], [1], [0, 0, 1, 1], [], []>} : vector<16x16xf32>, vector<16x32xf32>, vector<16x32xf32> -> vector<16x32xf32>
    %143 = vector.broadcast %108 : vector<1x32xf32> to vector<16x32xf32>
    %144 = arith.addf %142, %143 : vector<16x32xf32>
    %cst_92 = arith.constant dense<0.000000e+00> : vector<16x16xf32>
    %145 = tpu.matmul %104, %109, %cst_92 {dimension_numbers = #tpu.dot_dimension_numbers<[1], [0], [0], [1], [0, 0, 1, 1], [], []>} : vector<16x32xf32>, vector<32x16xf32>, vector<16x16xf32> -> vector<16x16xf32>
    %cst_93 = arith.constant dense<0.000000e+00> : vector<16x16xf32>
    %146 = tpu.matmul %144, %110, %cst_93 {dimension_numbers = #tpu.dot_dimension_numbers<[1], [0], [0], [1], [0, 0, 1, 1], [], []>} : vector<16x32xf32>, vector<32x16xf32>, vector<16x16xf32> -> vector<16x16xf32>
    %147 = arith.addf %145, %146 : vector<16x16xf32>
    %148 = vector.broadcast %111 : vector<1x16xf32> to vector<16x16xf32>
    %149 = arith.addf %147, %148 : vector<16x16xf32>
    %cst_94 = arith.constant 0.000000e+00 : f32
    %150 = vector.broadcast %cst_94 : f32 to vector<16x16xf32>
    %151 = arith.maximumf %149, %150 : vector<16x16xf32>
    %c0_95 = arith.constant 0 : index
    %c0_96 = arith.constant 0 : index
    %152 = vector.load %arg30[%c0_95, %c0_96] : memref<16x16xf32, #tpu.memory_space<vmem>>, vector<16x16xf32>
    %c0_97 = arith.constant 0 : index
    %c0_98 = arith.constant 0 : index
    %153 = vector.load %arg31[%c0_97, %c0_98] : memref<1x16xf32, #tpu.memory_space<vmem>>, vector<1x16xf32>
    %c0_99 = arith.constant 0 : index
    %c0_100 = arith.constant 0 : index
    %154 = vector.load %arg32[%c0_99, %c0_100] : memref<1x16xf32, #tpu.memory_space<vmem>>, vector<1x16xf32>
    %c0_101 = arith.constant 0 : index
    %c0_102 = arith.constant 0 : index
    %155 = vector.load %arg33[%c0_101, %c0_102] : memref<1x16xf32, #tpu.memory_space<vmem>>, vector<1x16xf32>
    %c0_103 = arith.constant 0 : index
    %c0_104 = arith.constant 0 : index
    %156 = vector.load %arg34[%c0_103, %c0_104] : memref<16x16xf32, #tpu.memory_space<vmem>>, vector<16x16xf32>
    %c0_105 = arith.constant 0 : index
    %c0_106 = arith.constant 0 : index
    %157 = vector.load %arg35[%c0_105, %c0_106] : memref<16x16xf32, #tpu.memory_space<vmem>>, vector<16x16xf32>
    %c0_107 = arith.constant 0 : index
    %c0_108 = arith.constant 0 : index
    %158 = vector.load %arg36[%c0_107, %c0_108] : memref<1x16xf32, #tpu.memory_space<vmem>>, vector<1x16xf32>
    %cst_109 = arith.constant dense<0.000000e+00> : vector<16x16xf32>
    %159 = tpu.matmul %151, %152, %cst_109 {dimension_numbers = #tpu.dot_dimension_numbers<[1], [0], [0], [1], [0, 0, 1, 1], [], []>} : vector<16x16xf32>, vector<16x16xf32>, vector<16x16xf32> -> vector<16x16xf32>
    %160 = vector.broadcast %154 : vector<1x16xf32> to vector<16x16xf32>
    %161 = arith.mulf %159, %160 : vector<16x16xf32>
    %cst_110 = arith.constant dense<0.000000e+00> : vector<16xf32>
    %162 = vector.multi_reduction <add>, %161, %cst_110 [1] : vector<16x16xf32> to vector<16xf32>
    %163 = vector.shape_cast %162 : vector<16xf32> to vector<16x1xf32>
    %cst_111 = arith.constant dense<0.000000e+00> : vector<1x16xf32>
    %164 = tpu.matmul %153, %159, %cst_111 {dimension_numbers = #tpu.dot_dimension_numbers<[1], [1], [0], [0], [0, 0, 1, 0], [], []>} : vector<1x16xf32>, vector<16x16xf32>, vector<1x16xf32> -> vector<1x16xf32>
    %165 = vector.broadcast %163 : vector<16x1xf32> to vector<16x16xf32>
    %166 = vector.broadcast %164 : vector<1x16xf32> to vector<16x16xf32>
    %167 = arith.addf %165, %166 : vector<16x16xf32>
    %cst_112 = arith.constant 0.000000e+00 : f32
    %168 = vector.broadcast %cst_112 : f32 to vector<16x16xf32>
    %169 = arith.cmpf oge, %167, %168 : vector<16x16xf32>
    %cst_113 = arith.constant 2.000000e-01 : f32
    %170 = vector.broadcast %cst_113 : f32 to vector<16x16xf32>
    %171 = arith.mulf %170, %167 : vector<16x16xf32>
    %172 = arith.select %169, %167, %171 : vector<16x16xi1>, vector<16x16xf32>
    %cst_114 = arith.constant -1.000000e+30 : f32
    %173 = vector.broadcast %cst_114 : f32 to vector<16x16xf32>
    %174 = arith.select %2, %172, %173 : vector<16x16xi1>, vector<16x16xf32>
    %cst_115 = arith.constant dense<0xFF800000> : vector<16xf32>
    %175 = vector.multi_reduction <maximumf>, %174, %cst_115 [1] : vector<16x16xf32> to vector<16xf32>
    %176 = vector.shape_cast %175 : vector<16xf32> to vector<16x1xf32>
    %177 = vector.broadcast %176 : vector<16x1xf32> to vector<16x16xf32>
    %178 = arith.subf %174, %177 : vector<16x16xf32>
    %179 = math.exp %178 : vector<16x16xf32>
    %cst_116 = arith.constant 0.000000e+00 : f32
    %180 = vector.broadcast %cst_116 : f32 to vector<16x16xf32>
    %181 = arith.select %2, %179, %180 : vector<16x16xi1>, vector<16x16xf32>
    %cst_117 = arith.constant dense<0.000000e+00> : vector<16xf32>
    %182 = vector.multi_reduction <add>, %181, %cst_117 [1] : vector<16x16xf32> to vector<16xf32>
    %183 = vector.shape_cast %182 : vector<16xf32> to vector<16x1xf32>
    %cst_118 = arith.constant 9.99999968E-21 : f32
    %184 = vector.broadcast %cst_118 : f32 to vector<16x1xf32>
    %185 = arith.maximumf %183, %184 : vector<16x1xf32>
    %186 = tpu.reciprocal %185 {approx = true} : vector<16x1xf32> -> vector<16x1xf32>
    %187 = vector.broadcast %186 : vector<16x1xf32> to vector<16x16xf32>
    %188 = arith.mulf %181, %187 : vector<16x16xf32>
    %cst_119 = arith.constant dense<0.000000e+00> : vector<16x16xf32>
    %189 = tpu.matmul %188, %159, %cst_119 {dimension_numbers = #tpu.dot_dimension_numbers<[1], [0], [0], [1], [0, 0, 1, 1], [], []>} : vector<16x16xf32>, vector<16x16xf32>, vector<16x16xf32> -> vector<16x16xf32>
    %190 = vector.broadcast %155 : vector<1x16xf32> to vector<16x16xf32>
    %191 = arith.addf %189, %190 : vector<16x16xf32>
    %cst_120 = arith.constant dense<0.000000e+00> : vector<16x16xf32>
    %192 = tpu.matmul %151, %156, %cst_120 {dimension_numbers = #tpu.dot_dimension_numbers<[1], [0], [0], [1], [0, 0, 1, 1], [], []>} : vector<16x16xf32>, vector<16x16xf32>, vector<16x16xf32> -> vector<16x16xf32>
    %cst_121 = arith.constant dense<0.000000e+00> : vector<16x16xf32>
    %193 = tpu.matmul %191, %157, %cst_121 {dimension_numbers = #tpu.dot_dimension_numbers<[1], [0], [0], [1], [0, 0, 1, 1], [], []>} : vector<16x16xf32>, vector<16x16xf32>, vector<16x16xf32> -> vector<16x16xf32>
    %194 = arith.addf %192, %193 : vector<16x16xf32>
    %195 = vector.broadcast %158 : vector<1x16xf32> to vector<16x16xf32>
    %196 = arith.addf %194, %195 : vector<16x16xf32>
    %cst_122 = arith.constant 0.000000e+00 : f32
    %197 = vector.broadcast %cst_122 : f32 to vector<16x16xf32>
    %198 = arith.maximumf %196, %197 : vector<16x16xf32>
    %c0_123 = arith.constant 0 : index
    %c0_124 = arith.constant 0 : index
    %199 = vector.load %arg47[%c0_123, %c0_124] : memref<16x16xf32, #tpu.memory_space<vmem>>, vector<16x16xf32>
    tpu.vector_store %arg47[%c0_123, %c0_124], %198 {strides = array<i32>} : memref<16x16xf32, #tpu.memory_space<vmem>>, vector<16x16xf32>,
    %c0_125 = arith.constant 0 : index
    %c0_126 = arith.constant 0 : index
    %200 = vector.load %arg37[%c0_125, %c0_126] : memref<16x16xf32, #tpu.memory_space<vmem>>, vector<16x16xf32>
    %cst_127 = arith.constant dense<0.000000e+00> : vector<16x16xf32>
    %201 = tpu.matmul %198, %200, %cst_127 {dimension_numbers = #tpu.dot_dimension_numbers<[1], [0], [0], [1], [0, 0, 1, 1], [], []>} : vector<16x16xf32>, vector<16x16xf32>, vector<16x16xf32> -> vector<16x16xf32>
    %c0_128 = arith.constant 0 : index
    %c0_129 = arith.constant 0 : index
    %202 = vector.load %arg38[%c0_128, %c0_129] : memref<1x16xf32, #tpu.memory_space<vmem>>, vector<1x16xf32>
    %203 = vector.broadcast %202 : vector<1x16xf32> to vector<16x16xf32>
    %204 = arith.addf %201, %203 : vector<16x16xf32>
    %c0_130 = arith.constant 0 : index
    %c0_131 = arith.constant 0 : index
    %205 = vector.load %arg39[%c0_130, %c0_131] : memref<16x16xf32, #tpu.memory_space<vmem>>, vector<16x16xf32>
    %cst_132 = arith.constant dense<0.000000e+00> : vector<16x16xf32>
    %206 = tpu.matmul %198, %205, %cst_132 {dimension_numbers = #tpu.dot_dimension_numbers<[1], [0], [0], [1], [0, 0, 1, 1], [], []>} : vector<16x16xf32>, vector<16x16xf32>, vector<16x16xf32> -> vector<16x16xf32>
    %c0_133 = arith.constant 0 : index
    %c0_134 = arith.constant 0 : index
    %207 = vector.load %arg40[%c0_133, %c0_134] : memref<1x16xf32, #tpu.memory_space<vmem>>, vector<1x16xf32>
    %208 = vector.broadcast %207 : vector<1x16xf32> to vector<16x16xf32>
    %209 = arith.addf %206, %208 : vector<16x16xf32>
    %c0_135 = arith.constant 0 : index
    %c0_136 = arith.constant 0 : index
    %210 = vector.load %arg4[%c0_135, %c0_136] : memref<256x16xf32, #tpu.memory_space<vmem>>, vector<256x16xf32>
    %cst_137 = arith.constant dense<0.000000e+00> : vector<256x16xf32>
    %211 = tpu.matmul %210, %209, %cst_137 {dimension_numbers = #tpu.dot_dimension_numbers<[1], [0], [0], [1], [0, 0, 1, 1], [], []>} : vector<256x16xf32>, vector<16x16xf32>, vector<256x16xf32> -> vector<256x16xf32>
    %c0_138 = arith.constant 0 : index
    %c0_139 = arith.constant 0 : index
    %212 = vector.load %arg5[%c0_138, %c0_139] : memref<256x16xf32, #tpu.memory_space<vmem>>, vector<256x16xf32>
    %cst_140 = arith.constant dense<0.000000e+00> : vector<256x16xf32>
    %213 = tpu.matmul %212, %204, %cst_140 {dimension_numbers = #tpu.dot_dimension_numbers<[1], [0], [0], [1], [0, 0, 1, 1], [], []>} : vector<256x16xf32>, vector<16x16xf32>, vector<256x16xf32> -> vector<256x16xf32>
    %214 = arith.addf %211, %213 : vector<256x16xf32>
    %c0_141 = arith.constant 0 : index
    %c0_142 = arith.constant 0 : index
    %215 = vector.load %arg41[%c0_141, %c0_142] : memref<1x16xf32, #tpu.memory_space<vmem>>, vector<1x16xf32>
    %cst_143 = arith.constant 0.000000e+00 : f32
    %216 = vector.broadcast %cst_143 : f32 to vector<256x16xf32>
    %217 = arith.cmpf oge, %214, %216 : vector<256x16xf32>
    %218 = vector.broadcast %215 : vector<1x16xf32> to vector<256x16xf32>
    %219 = arith.mulf %218, %214 : vector<256x16xf32>
    %220 = arith.select %217, %214, %219 : vector<256x16xi1>, vector<256x16xf32>
    %c0_144 = arith.constant 0 : index
    %c0_145 = arith.constant 0 : index
    %221 = vector.load %arg42[%c0_144, %c0_145] : memref<16x16xf32, #tpu.memory_space<vmem>>, vector<16x16xf32>
    %cst_146 = arith.constant dense<0.000000e+00> : vector<256x16xf32>
    %222 = tpu.matmul %220, %221, %cst_146 {dimension_numbers = #tpu.dot_dimension_numbers<[1], [0], [0], [1], [0, 0, 1, 1], [], []>} : vector<256x16xf32>, vector<16x16xf32>, vector<256x16xf32> -> vector<256x16xf32>
    %c0_147 = arith.constant 0 : index
    %c0_148 = arith.constant 0 : index
    %223 = vector.load %arg43[%c0_147, %c0_148] : memref<1x16xf32, #tpu.memory_space<vmem>>, vector<1x16xf32>
    %224 = vector.broadcast %223 : vector<1x16xf32> to vector<256x16xf32>
    %225 = arith.addf %222, %224 : vector<256x16xf32>
    %c0_149 = arith.constant 0 : index
    %c0_150 = arith.constant 0 : index
    %226 = vector.load %arg44[%c0_149, %c0_150] : memref<1x16xf32, #tpu.memory_space<vmem>>, vector<1x16xf32>
    %cst_151 = arith.constant 0.000000e+00 : f32
    %227 = vector.broadcast %cst_151 : f32 to vector<256x16xf32>
    %228 = arith.cmpf oge, %225, %227 : vector<256x16xf32>
    %229 = vector.broadcast %226 : vector<1x16xf32> to vector<256x16xf32>
    %230 = arith.mulf %229, %225 : vector<256x16xf32>
    %231 = arith.select %228, %225, %230 : vector<256x16xi1>, vector<256x16xf32>
    %c0_152 = arith.constant 0 : index
    %c0_153 = arith.constant 0 : index
    %232 = vector.load %arg45[%c0_152, %c0_153] : memref<16x2xf32, #tpu.memory_space<vmem>>, vector<16x2xf32>
    %cst_154 = arith.constant dense<0.000000e+00> : vector<256x2xf32>
    %233 = tpu.matmul %231, %232, %cst_154 {dimension_numbers = #tpu.dot_dimension_numbers<[1], [0], [0], [1], [0, 0, 1, 1], [], []>} : vector<256x16xf32>, vector<16x2xf32>, vector<256x2xf32> -> vector<256x2xf32>
    %c0_155 = arith.constant 0 : index
    %c0_156 = arith.constant 0 : index
    %234 = vector.load %arg46[%c0_155, %c0_156] : memref<1x2xf32, #tpu.memory_space<vmem>>, vector<1x2xf32>
    %235 = vector.broadcast %234 : vector<1x2xf32> to vector<256x2xf32>
    %236 = arith.addf %233, %235 : vector<256x2xf32>
    %c0_157 = arith.constant 0 : index
    %c0_158 = arith.constant 0 : index
    %237 = vector.load %arg48[%c0_157, %c0_158] : memref<256x2xf32, #tpu.memory_space<vmem>>, vector<256x2xf32>
    tpu.vector_store %arg48[%c0_157, %c0_158], %236 {strides = array<i32>} : memref<256x2xf32, #tpu.memory_space<vmem>>, vector<256x2xf32>,
    %cst_159 = arith.constant dense<0xFF800000> : vector<256xf32>
    %238 = vector.multi_reduction <maximumf>, %236, %cst_159 [1] : vector<256x2xf32> to vector<256xf32>
    %239 = vector.shape_cast %238 : vector<256xf32> to vector<256x1xf32>
    %240 = vector.broadcast %239 : vector<256x1xf32> to vector<256x2xf32>
    %241 = arith.subf %236, %240 : vector<256x2xf32>
    %242 = math.exp %241 : vector<256x2xf32>
    %cst_160 = arith.constant dense<0.000000e+00> : vector<256xf32>
    %243 = vector.multi_reduction <add>, %242, %cst_160 [1] : vector<256x2xf32> to vector<256xf32>
    %244 = vector.shape_cast %243 : vector<256xf32> to vector<256x1xf32>
    %245 = tpu.reciprocal %244 {approx = true} : vector<256x1xf32> -> vector<256x1xf32>
    %246 = vector.broadcast %245 : vector<256x1xf32> to vector<256x2xf32>
    %247 = arith.mulf %242, %246 : vector<256x2xf32>
    %c0_161 = arith.constant 0 : index
    %c0_162 = arith.constant 0 : index
    %248 = vector.load %arg49[%c0_161, %c0_162] : memref<256x2xf32, #tpu.memory_space<vmem>>, vector<256x2xf32>
    tpu.vector_store %arg49[%c0_161, %c0_162], %247 {strides = array<i32>} : memref<256x2xf32, #tpu.memory_space<vmem>>, vector<256x2xf32>,
    %249 = vector.extract_strided_slice %236 {offsets = [0, 1], sizes = [256, 1], strides = [1, 1]} : vector<256x2xf32> to vector<256x1xf32>
    %250 = vector.extract_strided_slice %236 {offsets = [0, 0], sizes = [256, 1], strides = [1, 1]} : vector<256x2xf32> to vector<256x1xf32>
    %251 = arith.subf %249, %250 : vector<256x1xf32>
    %c0_163 = arith.constant 0 : index
    %c0_164 = arith.constant 0 : index
    %252 = vector.load %arg3[%c0_163, %c0_164] : memref<256x1xf32, #tpu.memory_space<vmem>>, vector<256x1xf32>
    %cst_165 = arith.constant 5.000000e-01 : f32
    %253 = vector.broadcast %cst_165 : f32 to vector<256x1xf32>
    %254 = arith.mulf %253, %251 : vector<256x1xf32>
    %255 = math.tanh %254 : vector<256x1xf32>
    %256 = arith.mulf %252, %255 : vector<256x1xf32>
    %c0_166 = arith.constant 0 : index
    %c0_167 = arith.constant 0 : index
    %257 = vector.load %arg6[%c0_166, %c0_167] : memref<16x256xf32, #tpu.memory_space<vmem>>, vector<16x256xf32>
    %cst_168 = arith.constant dense<0.000000e+00> : vector<16x1xf32>
    %258 = tpu.matmul %257, %256, %cst_168 {dimension_numbers = #tpu.dot_dimension_numbers<[1], [0], [0], [1], [0, 0, 1, 1], [], []>} : vector<16x256xf32>, vector<256x1xf32>, vector<16x1xf32> -> vector<16x1xf32>
    %cst_169 = arith.constant dense<0.000000e+00> : vector<16xf32>
    %259 = vector.multi_reduction <add>, %0, %cst_169 [1] : vector<16x16xf32> to vector<16xf32>
    %260 = vector.shape_cast %259 : vector<16xf32> to vector<16x1xf32>
    %cst_170 = arith.constant 1.000000e+00 : f32
    %261 = vector.broadcast %cst_170 : f32 to vector<16x1xf32>
    %262 = arith.maximumf %260, %261 : vector<16x1xf32>
    %263 = tpu.reciprocal %262 {approx = true} : vector<16x1xf32> -> vector<16x1xf32>
    %264 = arith.mulf %258, %263 : vector<16x1xf32>
    %c0_171 = arith.constant 0 : index
    %c0_172 = arith.constant 0 : index
    %265 = vector.load %arg50[%c0_171, %c0_172] : memref<16x1xf32, #tpu.memory_space<vmem>>, vector<16x1xf32>
    tpu.vector_store %arg50[%c0_171, %c0_172], %264 {strides = array<i32>} : memref<16x1xf32, #tpu.memory_space<vmem>>, vector<16x1xf32>,
    return
  }
}

</mosaic_0001>

<bundles_post_ra>
// kernel: mul.1
= control target key start
LH: loop header
LB: loop body
LE: loop exit
PB: predicated region body
PF: predicated region fallthrough
CT: control target
= control target key end

     0   :  { %s56_s0 = inlined_call_operand.vmem [shape: f32[16,16], index: 0, kind: input, shape index: {}]   ;;  %s57_s1 = inlined_call_operand.vmem [shape: f32[16,16], index: 1, kind: input, shape index: {}]   ;;  %s58_s2 = inlined_call_operand.vmem [shape: f32[16,16], index: 2, kind: output, shape index: {}]  }
   0x1   :  { %v3_v0 = vld [vmem:[%s56_s0] sm:$0xff]  ;;  %v20_v2 = vld [vmem:[%s56_s0 + $0x8] sm:$0xff] }
   0x2   :  { %v4_v1 = vld [vmem:[%s57_s1] sm:$0xff]  ;;  %v21_v4 = vld [vmem:[%s57_s1 + $0x8] sm:$0xff] }
   0x3   :  { %v7_v3 = vmul.f32 %v4_v1, %v3_v0  ;;  %v16_v5 = vmul.f32 %v21_v4, %v20_v2 }
   0x5   :  { %9 = vst [vmem:[%s58_s2] sm:$0xff] %v7_v3 }
   0x6   :  { %22 = vst [vmem:[%s58_s2 + $0x8] sm:$0xff] %v16_v5 }

// kernel: sharc_forward.1
= control target key start
LH: loop header
LB: loop body
LE: loop exit
PB: predicated region body
PF: predicated region fallthrough
CT: control target
= control target key end

     0   :  { %s3783_s6 = smov 1   ;;  %s3784_s10 = smov 2   ;;  %s5472_s0 = inlined_call_operand.smem [shape: u32[51], index: -1, kind: input, shape index: {}] }
   0x1   :  { %s3846_s5 = sld [smem:[%s5472_s0]]   ;;  %s3785_s14 = smov 3  }
   0x2   :  { %s3851_s9 = sld [smem:[%s5472_s0 + %s3783_s6]]   ;;  %s3786_s18 = smov 4  }
   0x3   :  { %s3856_s13 = sld [smem:[%s5472_s0 + %s3784_s10]]   ;;  %s3787_s22 = smov 5  }
   0x4   :  { %s3861_s17 = sld [smem:[%s5472_s0 + %s3785_s14]]   ;;  %s3788_s26 = smov 6  }
   0x5   :  { %s3866_s21 = sld [smem:[%s5472_s0 + %s3786_s18]]   ;;  %s3789_s30 = smov 7  }
   0x6   :  { %s3871_s25 = sld [smem:[%s5472_s0 + %s3787_s22]]   ;;  %s3790_s4 = smov 8  }
   0x7   :  { %s3876_s29 = sld [smem:[%s5472_s0 + %s3788_s26]]   ;;  %s3791_s10 = smov 9  }
   0x8   :  { %s3881_s3 = sld [smem:[%s5472_s0 + %s3789_s30]]   ;;  %s3792_s15 = smov 10  }
   0x9   :  { %s3886_s8 = sld [smem:[%s5472_s0 + %s3790_s4]]   ;;  %s3793_s20 = smov 11  }
   0xa   :  { %5501 = sst [smem:[#allocation5_spill]] %s3861_s17  ;;  %s3794_s26 = smov 12  }
   0xb   :  { %5502 = sst [smem:[#allocation6_spill]] %s3866_s21  ;;  %s3795_s1 = smov 13  }
   0xc   :  { %5503 = sst [smem:[#allocation7_spill]] %s3871_s25  ;;  %s3796_s7 = smov 14  }
   0xd   :  { %5504 = sst [smem:[#allocation8_spill]] %s3876_s29  ;;  %s3798_s22 = smov 16  }
   0xe   :  { %s3891_s14 = sld [smem:[%s5472_s0 + %s3791_s10]]   ;;  %s3799_s28 = smov 17  }
   0xf   :  { %s3896_s19 = sld [smem:[%s5472_s0 + %s3792_s15]]   ;;  %s3797_s15 = smov 15  }
  0x10   :  { %s3901_s24 = sld [smem:[%s5472_s0 + %s3793_s20]]  }
  0x11   :  { %s3906_s30 = sld [smem:[%s5472_s0 + %s3794_s26]]  }
  0x12   :  { %s3911_s6 = sld [smem:[%s5472_s0 + %s3795_s1]]  }
  0x13   :  { %s3916_s12 = sld [smem:[%s5472_s0 + %s3796_s7]]   ;;  %s3800_s7 = smov 18  }
  0x14   :  { %s3921_s20 = sld [smem:[%s5472_s0 + %s3797_s15]]   ;;  %s3801_s15 = smov 19  }
  0x15   :  { %s3926_s27 = sld [smem:[%s5472_s0 + %s3798_s22]]   ;;  %s3802_s22 = smov 20  }
  0x16   :  { %s3931_s4 = sld [smem:[%s5472_s0 + %s3799_s28]]   ;;  %s3803_s28 = smov 21  }
  0x17   :  { %s3936_s29 = sld [smem:[%s5472_s0 + %s3800_s7]]   ;;  %s3804_s7 = smov 22  }
  0x18   :  { %s3941_s17 = sld [smem:[%s5472_s0 + %s3801_s15]]   ;;  %s3805_s15 = smov 23  }
  0x19   :  { %s3946_s21 = sld [smem:[%s5472_s0 + %s3802_s22]]   ;;  %s3806_s22 = smov 24  }
  0x1a   :  { %s3951_s25 = sld [smem:[%s5472_s0 + %s3803_s28]]   ;;  %s3807_s28 = smov 25  }
  0x1c   :  { %5505 = sst [smem:[#allocation9_spill]] %s3931_s4 }
  0x1d   :  { %5506 = sst [smem:[#allocation10_spill]] %s3936_s29 }
  0x1e   :  { %5507 = sst [smem:[#allocation11_spill]] %s3941_s17 }
  0x1f   :  { %s3956_s4 = sld [smem:[%s5472_s0 + %s3804_s7]]   ;;  %s3808_s7 = smov 26  }
  0x20   :  { %5508 = sst [smem:[#allocation12_spill]] %s3951_s25 }
  0x21   :  { %s3961_s17 = sld [smem:[%s5472_s0 + %s3805_s15]]   ;;  %s3809_s15 = smov 27  }
  0x22   :  { %s3966_s29 = sld [smem:[%s5472_s0 + %s3806_s22]]   ;;  %s3810_s22 = smov 28  }
  0x23   :  { %s3971_s25 = sld [smem:[%s5472_s0 + %s3807_s28]]   ;;  %s3811_s28 = smov 29  }
  0x25   :  { %5509 = sst [smem:[#allocation13_spill]] %s3956_s4 }
  0x26   :  { %s3976_s4 = sld [smem:[%s5472_s0 + %s3808_s7]]   ;;  %s3812_s7 = smov 30  }
  0x27   :  { %5510 = sst [smem:[#allocation14_spill]] %s3961_s17 }
  0x28   :  { %5511 = sst [smem:[#allocation15_spill]] %s3966_s29 }
  0x29   :  { %5512 = sst [smem:[#allocation16_spill]] %s3971_s25 }
  0x2a   :  { %s3981_s17 = sld [smem:[%s5472_s0 + %s3809_s15]]   ;;  %s3813_s15 = smov 31  }
  0x2b   :  { %s3986_s29 = sld [smem:[%s5472_s0 + %s3810_s22]]   ;;  %s3814_s22 = smov 32  }
  0x2c   :  { %5513 = sst [smem:[#allocation17_spill]] %s3976_s4 }
  0x2d   :  { %s3991_s25 = sld [smem:[%s5472_s0 + %s3811_s28]]   ;;  %s3815_s28 = smov 33  }
  0x2e   :  { %s3996_s4 = sld [smem:[%s5472_s0 + %s3812_s7]]   ;;  %s3816_s7 = smov 34  }
  0x30   :  { %5514 = sst [smem:[#allocation18_spill]] %s3981_s17 }
  0x31   :  { %5515 = sst [smem:[#allocation19_spill]] %s3986_s29 }
  0x32   :  { %s4001_s17 = sld [smem:[%s5472_s0 + %s3813_s15]]   ;;  %s3817_s15 = smov 35  }
  0x33   :  { %5516 = sst [smem:[#allocation20_spill]] %s3991_s25 }
  0x34   :  { %5517 = sst [smem:[#allocation21_spill]] %s3996_s4 }
  0x35   :  { %s4006_s29 = sld [smem:[%s5472_s0 + %s3814_s22]]   ;;  %s3818_s22 = smov 36  }
  0x36   :  { %s4011_s25 = sld [smem:[%s5472_s0 + %s3815_s28]]   ;;  %s3819_s28 = smov 37  }
  0x37   :  { %s4016_s4 = sld [smem:[%s5472_s0 + %s3816_s7]]   ;;  %s3820_s7 = smov 38  }
  0x38   :  { %5518 = sst [smem:[#allocation22_spill]] %s4001_s17 }
  0x39   :  { %s4021_s17 = sld [smem:[%s5472_s0 + %s3817_s15]]   ;;  %s3821_s15 = smov 39  }
  0x3b   :  { %5519 = sst [smem:[#allocation23_spill]] %s4006_s29 }
  0x3c   :  { %5520 = sst [smem:[#allocation24_spill]] %s4011_s25 }
  0x3d   :  { %5521 = sst [smem:[#allocation25_spill]] %s4016_s4 }
  0x3e   :  { %s4026_s29 = sld [smem:[%s5472_s0 + %s3818_s22]]   ;;  %s3822_s22 = smov 40  }
  0x3f   :  { %5522 = sst [smem:[#allocation26_spill]] %s4021_s17 }
  0x40   :  { %s4031_s25 = sld [smem:[%s5472_s0 + %s3819_s28]]   ;;  %s3823_s28 = smov 41  }
  0x41   :  { %s4036_s4 = sld [smem:[%s5472_s0 + %s3820_s7]]   ;;  %s3824_s7 = smov 42  }
  0x42   :  { %s4041_s17 = sld [smem:[%s5472_s0 + %s3821_s15]]   ;;  %s3825_s15 = smov 43  }
  0x44   :  { %5523 = sst [smem:[#allocation27_spill]] %s4026_s29 }
  0x45   :  { %s4046_s29 = sld [smem:[%s5472_s0 + %s3822_s22]]   ;;  %s3826_s22 = smov 44  }
  0x46   :  { %5524 = sst [smem:[#allocation28_spill]] %s4031_s25 }
  0x47   :  { %5525 = sst [smem:[#allocation29_spill]] %s4036_s4 }
  0x48   :  { %5526 = sst [smem:[#allocation30_spill]] %s4041_s17 }
  0x49   :  { %s4051_s25 = sld [smem:[%s5472_s0 + %s3823_s28]]   ;;  %s3827_s28 = smov 45  }
  0x4a   :  { %s4056_s4 = sld [smem:[%s5472_s0 + %s3824_s7]]   ;;  %s3828_s7 = smov 46  }
  0x4b   :  { %5527 = sst [smem:[#allocation31_spill]] %s4046_s29 }
  0x4c   :  { %s4061_s17 = sld [smem:[%s5472_s0 + %s3825_s15]]   ;;  %s3829_s15 = smov 47  }
  0x4d   :  { %s4066_s29 = sld [smem:[%s5472_s0 + %s3826_s22]]   ;;  %s3830_s22 = smov 48  }
  0x4f   :  { %5528 = sst [smem:[#allocation32_spill]] %s4051_s25 }
  0x50   :  { %5529 = sst [smem:[#allocation33_spill]] %s4056_s4 }
  0x51   :  { %s4071_s25 = sld [smem:[%s5472_s0 + %s3827_s28]]   ;;  %s3831_s28 = smov 49  }
  0x52   :  { %5530 = sst [smem:[#allocation34_spill]] %s4061_s17 }
  0x53   :  { %5531 = sst [smem:[#allocation35_spill]] %s4066_s29 }
  0x54   :  { %s4076_s4 = sld [smem:[%s5472_s0 + %s3828_s7]]   ;;  %s3832_s7 = smov 50  }
  0x55   :  { %s4081_s17 = sld [smem:[%s5472_s0 + %s3829_s15]]  }
  0x56   :  { %s4086_s29 = sld [smem:[%s5472_s0 + %s3830_s22]]  }
  0x57   :  { %5532 = sst [smem:[#allocation36_spill]] %s4071_s25 }
  0x58   :  { %s4091_s25 = sld [smem:[%s5472_s0 + %s3831_s28]]  }
  0x5a   :  { %5533 = sst [smem:[#allocation37_spill]] %s4076_s4 }
  0x5b   :  { %s4096_s4 = sld [smem:[%s5472_s0 + %s3832_s7]]  }
  0x5c   :  { %v213_v0 = vld [vmem:[%s3886_s8 + $0x8] sm:$0xff]  ;;  %v212_v1 = vld [vmem:[%s3886_s8] sm:$0xff]  ;;  %vm226_vm0 = vcmask 130048  }
  0x5d   :  { %3448 = vmatpush.msra.mxu1 %v213_v0  ;;  %v4101_v2 = vld [vmem:[%s3851_s9 + $0x8] sm:$0xff]  ;;  %247 = vmatpush.msra.mxu0 %v213_v0  ;;  %v4104_v3 = vld [vmem:[%s3851_s9] sm:$0xff] }
  0x5e   :  { %v211_v4 = vld [vmem:[%s3881_s3 + $0x8] sm:$0xff]  ;;  %v210_v5 = vld [vmem:[%s3881_s3] sm:$0xff] }
  0x5f   :  { %3449 = vmatpush.msra.mxu1 %v212_v1  ;;  %248 = vmatpush.msra.mxu0 %v212_v1 }
  0x60   :  { %3269 = vmatmul.msk.f32.vlgmr.msra.gmra.mxu1 %vm226_vm0, %v4101_v2  ;;  %3268 = vmatmul.msk.f32.vlgmr.msra.gmra.mxu0 %vm226_vm0, %v4104_v3 }
  0x61   :  { %276 = vmatpush.msrb.mxu1 %v211_v4 }
  0x63   :  { %277 = vmatpush.msrb.mxu1 %v210_v5 }
  0x64   :  { %107 = vsyncpa [#allocation3], 0  ;;  %v4113_v6 = vld [vmem:[%s3846_s5] sm:$0xff]  ;;  %v4118_v7 = vld [vmem:[%s3846_s5 + $0x8] sm:$0xff]  ;;  %vm290_vm1 = vcmask 261120   ;;  %s5534_s0 = sld [smem:[#allocation10_spill]] }
  0x65   :  { %v3505_v10 = vld [vmem:[%s3896_s19] ss:$0 sm:$0xff]  ;;  %v4136_v31 = vld [vmem:[%s3856_s13 + $0x8] sm:$0xff]  ;;  %v224_v50 = vld [vmem:[%s3916_s12 + $0x18] sm:$0xff]  ;;  %s5535_s5 = sld [smem:[#allocation9_spill]] }
  0x66   :  { %v214_v19 = vld [vmem:[%s3891_s14] sm:$0x1]  ;;  %vm205_vm5 = vcmp.gt.f32.partialorder %v4136_v31, 0.0  ;;  %v220_v48 = vld [vmem:[%s3911_s6 + $0x8] sm:$0xff]  ;;  %459 = vmatpush.msra.mxu1 %v224_v50  ;;  %v223_v52 = vld [vmem:[%s3916_s12 + $0x10] sm:$0xff]  ;;  %s5536_s9 = sld [smem:[#allocation12_spill]] }
  0x67   :  { %v4130_v24 = vld [vmem:[%s3856_s13] sm:$0xff]  ;;  %v218_v51 = vld [vmem:[%s3906_s30 + $0x8] sm:$0xff]  ;;  %v482_v5 = vld [vmem:[%s3926_s27 + $0x18] sm:$0xff]  ;;  %s5538_s3 = sld [smem:[#allocation14_spill]] }
  0x68   :  { %3270 = vmatmul.msk.f32.vlgmr.msrb.gmra.mxu1 %vm226_vm0, %v4113_v6  ;;  %vm204_vm2 = vcmp.gt.f32.partialorder %v4130_v24, 0.0  ;;  %v219_v49 = vld [vmem:[%s3911_s6] sm:$0xff]  ;;  %432 = vmatpush.msrb.mxu0 %v218_v51  ;;  %v222_v62 = vld [vmem:[%s3916_s12 + $0x8] sm:$0xff]  ;;  %s5539_s8 = sld [smem:[#allocation18_spill]] }
  0x69   :  { %460 = vmatpush.msra.mxu1 %v223_v52  ;;  %v217_v61 = vld [vmem:[%s3906_s30] sm:$0xff]  ;;  %s5540_s14 = sld [smem:[#allocation13_spill]] }
  0x6a   :  { %433 = vmatpush.msrb.mxu0 %v217_v61  ;;  %v221_v63 = vld [vmem:[%s3916_s12] sm:$0xff]  ;;  %s5541_s19 = sld [smem:[#allocation16_spill]] }
  0x6b   :  { %461 = vmatpush.msra.mxu1 %v222_v62  ;;  %3279 = vmatmul.msk.f32.vlgmr.msrb.gmra.mxu0 %vm226_vm0, %v4113_v6  ;;  %v3506_v0 = vld [vmem:[%s3901_s24] ss:$0 sm:$0xff]  ;;  %v481_v6 = vld [vmem:[%s3926_s27 + $0x10] sm:$0xff]  ;;  %s5542_s24 = sld [smem:[#allocation15_spill]] }
  0x6c   :  { %s5543_s30 = sld [smem:[#allocation19_spill]] }
  0x6d   :  { %462 = vmatpush.msra.mxu1 %v221_v63  ;;  %s5544_s6 = sld [smem:[#allocation17_spill]] }
  0x6e   :  { %s5545_s12 = sld [smem:[#allocation21_spill]] }
  0x6f   :  { %s5548_s15 = sld [smem:[#allocation23_spill]] }
  0x70   :  { %3271 = vmatmul.msk.f32.gmra.mxu1 %vm226_vm0, %v4118_v7  ;;  %s5549_s16 = sld [smem:[#allocation22_spill]] }
  0x71   :  { %s5550_s18 = sld [smem:[#allocation26_spill]] }
  0x72   :  { %s5551_s22 = sld [smem:[#allocation24_spill]] }
  0x73   :  { %3280 = vmatmul.msk.f32.gmra.mxu0 %vm226_vm0, %v4118_v7  ;;  %v479_v7 = vld [vmem:[%s3926_s27] sm:$0xff]  ;;  %s5552_s23 = sld [smem:[#allocation28_spill]] }
  0x74   :  { %s5553_s26 = sld [smem:[#allocation30_spill]] }
  0x75   :  { %s5554_s28 = sld [smem:[#allocation27_spill]] }
  0x76   :  { %s5555_s1 = sld [smem:[#allocation29_spill]] }
  0x77   :  { %s5556_s2 = sld [smem:[#allocation7_spill]] }
  0x78   :  { %s5557_s7 = sld [smem:[#allocation31_spill]] }
  0x79   :  { %s5558_s10 = sld [smem:[#allocation6_spill]] }
  0x7a   :  { %s5559_s11 = sld [smem:[#allocation33_spill]] }
  0xdd   :  { %v253_v8 = vpop.f32.mrf.mxu1  ;;  %v250_v9 = vpop.f32.mrf.mxu0 }
  0xe5   :  { %v279_v11 = vpop.f32.mrf.mxu1 }
  0xe6   :  { %v280_v12 = vadd.f32 %v279_v11, %v250_v9  ;;  %v489_v9 = vld [vmem:[%s3946_s21 + $0x18] sm:$0xff]  ;;  %v487_v11 = vld [vmem:[%s3946_s21 + $0x8] sm:$0xff] }
  0xe8   :  { %v288_v13 = vmul.f32 %v3505_v10, %v280_v12 }
  0xea   :  { %v291_v14 = vsel %vm290_vm1, %v288_v13, 0.0 }
  0xeb   :  { %292 = vadd.xlane.f32.xlu0 %v291_v14  ;;  %v435_v14 = vpop.f32.mrf.mxu0 }
  0xed   :  { %v282_v15 = vpop.f32.mrf.mxu1 }
  0xee   :  { %v283_v16 = vadd.f32 %v282_v15, %v253_v8  ;;  %v480_v8 = vld [vmem:[%s3926_s27 + $0x8] sm:$0xff]  ;;  %s5547_s27 = sld [smem:[#allocation20_spill]] }
  0xf0   :  { %3272 = vmatpush.xpose.msk.msra.mxu2 %vm290_vm1, %v283_v16  ;;  %386 = vmatpush.msra.mxu3 %v283_v16  ;;  %v289_v17 = vmul.f32 %v3505_v10, %v283_v16  ;;  %v488_v10 = vld [vmem:[%s3946_s21 + $0x10] sm:$0xff]  ;;  %v3507_v16 = vld [vmem:[%s3921_s20] ss:$0 sm:$0xff]  ;;  %s5546_s20 = sld [smem:[#allocation25_spill]] }
  0xf2   :  { %387 = vmatpush.msra.mxu3 %v280_v12  ;;  %v294_v18 = vsel %vm290_vm1, %v289_v17, 0.0 }
  0xf3   :  { %295 = vadd.xlane.f32.xlu0 %v294_v18 }
  0xf4   :  { %3273 = vmatpush.xpose.msk.msra.mxu2 %vm290_vm1, %v280_v12  ;;  %513 = vmatpush.msrb.mxu3 %v482_v5  ;;  %v486_v12 = vld [vmem:[%s3946_s21] sm:$0xff]  ;;  %s5537_s21 = sld [smem:[#allocation11_spill]] }
  0xf6   :  { %514 = vmatpush.msrb.mxu3 %v481_v6 }
  0xf7   :  { %3274 = vmatmul.msk.f32.vlgmr.msra.gmra.mxu2 %vm290_vm1, %v214_v19 }
  0xf8   :  { %409 = vmatpush.msrb.mxu2 %v220_v48  ;;  %515 = vmatpush.msrb.mxu3 %v480_v8 }
  0xfa   :  { %410 = vmatpush.msrb.mxu2 %v219_v49  ;;  %516 = vmatpush.msrb.mxu3 %v479_v7 }
  0xff   :  { %3277 = vmatmul.msk.f32.vlgmr.msrb.gmra.mxu2 %vm226_vm0, %v4104_v3 }
 0x107   :  { %3278 = vmatmul.msk.f32.gmra.mxu2 %vm226_vm0, %v4101_v2 }
 0x15e   :  { %v293_v20 = vpop.xlane.xlu0 %292 }
 0x166   :  { %v296_v23 = vpop.xlane.xlu0 %295 }
 0x17a   :  { %v323_v21 = vpop.f32.mrf.mxu2 }
 0x17b   :  { %v326_v22 = vperm.slane %v323_v21, 0 }
 0x17d   :  { %v327_v25 = vadd.f32 %v326_v22, %v293_v20  ;;  %v328_v26 = vadd.f32 %v326_v22, %v296_v23  ;;  %v438_v20 = vpop.f32.mrf.mxu0 }
 0x17f   :  { %vm329_vm3 = vcmp.ge.f32.partialorder %v327_v25, 0.0  ;;  %v331_v27 = vmul.f32 0.2, %v327_v25  ;;  %v332_v29 = vmul.f32 0.2, %v328_v26  ;;  %vm330_vm4 = vcmp.ge.f32.partialorder %v328_v26, 0.0 }
 0x181   :  { %v333_v28 = vsel %vm329_vm3, %v327_v25, %v331_v27  ;;  %v334_v33 = vsel %vm330_vm4, %v328_v26, %v332_v29  ;;  %v3508_v29 = vld [vmem:[%s5534_s0] ss:$0 sm:$0xff]  ;;  %s5560_s0 = sld [smem:[#allocation32_spill]] }
 0x182   :  { %v335_v30 = vsel %vm204_vm2, %v333_v28, -1e+30  ;;  %v336_v34 = vsel %vm205_vm5, %v334_v33, -1e+30  ;;  %v412_v13 = vpop.f32.mrf.mxu2 }
 0x183   :  { %v337_v32 = vsel %vm226_vm0, %v335_v30, -inf  ;;  %v340_v35 = vsel %vm226_vm0, %v336_v34, -inf  ;;  %v436_v15 = vadd.f32 %v435_v14, %v412_v13 }
 0x184   :  { %338 = vmax.xlane.f32.xlu1 %v337_v32 }
 0x18a   :  { %v415_v19 = vpop.f32.mrf.mxu2 }
 0x18b   :  { %v439_v23 = vadd.f32 %v438_v20, %v415_v19  ;;  %v693_v19 = vld [vmem:[%s5538_s3 + $0x8] sm:$0xff]  ;;  %v692_v20 = vld [vmem:[%s5538_s3] sm:$0xff] }
 0x18c   :  { %341 = vmax.xlane.f32.xlu1 %v340_v35 }
 0x1f7   :  { %v339_v36 = vpop.xlane.xlu1 %338 }
 0x1f8   :  { %v343_v37 = vsub.f32 %v335_v30, %v339_v36 }
 0x1fa   :  { %v345_v38 = vmul.f32 1.442695, %v343_v37  ;;  %v483_v37 = vld [vmem:[%s5535_s5] sm:$0x1]  ;;  %s5561_s5 = sld [smem:[#allocation36_spill]] }
 0x1fc   :  { %3523 = vpow2.f32 %v345_v38 }
 0x1ff   :  { %v342_v39 = vpop.xlane.xlu1 %341 }
 0x200   :  { %v344_v40 = vsub.f32 %v336_v34, %v342_v39 }
 0x202   :  { %v3524_v41 = vpop.eup %3523  ;;  %v347_v42 = vmul.f32 1.442695, %v344_v40 }
 0x203   :  { %v349_v43 = vsel %vm204_vm2, %v3524_v41, 0.0 }
 0x204   :  { %3525 = vpow2.f32 %v347_v42  ;;  %v351_v44 = vsel %vm226_vm0, %v349_v43, 0.0 }
 0x205   :  { %352 = vadd.xlane.f32.xlu2 %v351_v44 }
 0x20a   :  { %v3526_v45 = vpop.eup %3525 }
 0x20b   :  { %v350_v46 = vsel %vm205_vm5, %v3526_v45, 0.0 }
 0x20c   :  { %v354_v47 = vsel %vm226_vm0, %v350_v46, 0.0 }
 0x20d   :  { %355 = vadd.xlane.f32.xlu2 %v354_v47 }
 0x278   :  { %v353_v53 = vpop.xlane.xlu2 %352 }
 0x279   :  { %v357_v54 = vmax.f32 %v353_v53, 1e-20 }
 0x27b   :  { %3527 = vrcp.f32 %v357_v54 }
 0x280   :  { %v356_v55 = vpop.xlane.xlu2 %355 }
 0x281   :  { %v3528_v56 = vpop.eup %3527  ;;  %v358_v57 = vmax.f32 %v356_v55, 1e-20 }
 0x282   :  { %v361_v58 = vmul.f32 %v3528_v56, %v349_v43 }
 0x283   :  { %3529 = vrcp.f32 %v358_v57 }
 0x284   :  { %3275 = vmatmul.msk.f32.vlgmr.msra.gmra.mxu3 %vm226_vm0, %v361_v58 }
 0x285   :  { %674 = vmatpush.msra.mxu3 %v489_v9 }
 0x287   :  { %675 = vmatpush.msra.mxu3 %v488_v10  ;;  %v491_v10 = vld [vmem:[%s5536_s9 + $0x8] sm:$0xff] }
 0x289   :  { %v3530_v59 = vpop.eup %3529  ;;  %676 = vmatpush.msra.mxu3 %v487_v11  ;;  %v490_v11 = vld [vmem:[%s5536_s9] sm:$0xff] }
 0x28a   :  { %v362_v60 = vmul.f32 %v3530_v59, %v350_v46 }
 0x28b   :  { %677 = vmatpush.msra.mxu3 %v486_v12  ;;  %v3509_v12 = vld [vmem:[%s5537_s21] ss:$0 sm:$0xff]  ;;  %s5563_s21 = sld [smem:[#allocation35_spill]] }
 0x28c   :  { %3276 = vmatmul.msk.f32.gmra.mxu3 %vm226_vm0, %v362_v60 }
 0x307   :  { %v389_v1 = vpop.f32.mrf.mxu3 }
 0x308   :  { %v390_v2 = vadd.f32 %v3506_v0, %v389_v1  ;;  %v492_v1 = vld [vmem:[%s5536_s9 + $0x10] sm:$0xff] }
 0x30a   :  { %3281 = vmatmul.msk.f32.vlgmr.msra.gmra.mxu1 %vm290_vm1, %v390_v2 }
 0x30f   :  { %v392_v3 = vpop.f32.mrf.mxu3 }
 0x310   :  { %v393_v4 = vadd.f32 %v3506_v0, %v392_v3  ;;  %v493_v0 = vld [vmem:[%s5536_s9 + $0x18] sm:$0xff]  ;;  %s5562_s9 = sld [smem:[#allocation34_spill]] }
 0x311   :  { %651 = vmatpush.msrb.mxu1 %v493_v0 }
 0x312   :  { %3282 = vmatmul.msk.f32.gmra.mxu1 %vm290_vm1, %v393_v4 }
 0x313   :  { %652 = vmatpush.msrb.mxu1 %v492_v1 }
 0x315   :  { %653 = vmatpush.msrb.mxu1 %v491_v10 }
 0x317   :  { %654 = vmatpush.msrb.mxu1 %v490_v11 }
 0x387   :  { %v464_v17 = vpop.f32.mrf.mxu1 }
 0x388   :  { %v470_v18 = vadd.f32 %v464_v17, %v436_v15  ;;  %v695_v17 = vld [vmem:[%s5538_s3 + $0x18] sm:$0xff] }
 0x38a   :  { %v475_v21 = vadd.f32 %v3507_v16, %v470_v18  ;;  %v694_v18 = vld [vmem:[%s5538_s3 + $0x10] sm:$0xff]  ;;  %s5564_s3 = sld [smem:[#allocation37_spill]] }
 0x38c   :  { %v477_v22 = vmax.f32 %v475_v21, 0.0  ;;  %v702_v21 = vld [vmem:[%s5539_s8 + $0x18] sm:$0xff] }
 0x38e   :  { %3283 = vmatmul.msk.f32.vlgmr.msrb.gmra.mxu3 %vm290_vm1, %v477_v22 }
 0x38f   :  { %v467_v25 = vpop.f32.mrf.mxu1 }
 0x390   :  { %v471_v26 = vadd.f32 %v467_v25, %v439_v23  ;;  %v700_v23 = vld [vmem:[%s5539_s8 + $0x8] sm:$0xff]  ;;  %v699_v25 = vld [vmem:[%s5539_s8] sm:$0xff] }
 0x392   :  { %v476_v27 = vadd.f32 %v3507_v16, %v471_v26 }
 0x394   :  { %v478_v28 = vmax.f32 %v476_v27, 0.0  ;;  %v3510_v27 = vld [vmem:[%s5540_s14] ss:$0 sm:$0xff]  ;;  %s3834_s14 = smov 127  }
 0x396   :  { %3284 = vmatmul.msk.f32.gmra.mxu3 %vm290_vm1, %v478_v28 }
 0x39e   :  { %3292 = vmatmul.msk.f32.vlgmr.msra.gmra.mxu3 %vm290_vm1, %v477_v22  ;;  %v701_v22 = vld [vmem:[%s5539_s8 + $0x10] sm:$0xff]  ;;  %s3833_s8 = smov 1  }
 0x3a6   :  { %3293 = vmatmul.msk.f32.gmra.mxu3 %vm290_vm1, %v478_v28 }
 0x411   :  { %v518_v30 = vpop.f32.mrf.mxu3 }
 0x412   :  { %v527_v32 = vmul.f32 %v3508_v29, %v518_v30 }
 0x414   :  { %v529_v33 = vsel %vm290_vm1, %v527_v32, 0.0 }
 0x415   :  { %530 = vadd.xlane.f32.xlu0 %v529_v33 }
 0x419   :  { %v521_v34 = vpop.f32.mrf.mxu3 }
 0x41a   :  { %3285 = vmatpush.xpose.msk.msra.mxu2 %vm290_vm1, %v521_v34  ;;  %624 = vmatpush.msra.mxu0 %v521_v34  ;;  %v528_v35 = vmul.f32 %v3508_v29, %v521_v34 }
 0x41c   :  { %625 = vmatpush.msra.mxu0 %v518_v30  ;;  %v532_v36 = vsel %vm290_vm1, %v528_v35, 0.0 }
 0x41d   :  { %533 = vadd.xlane.f32.xlu1 %v532_v36 }
 0x41e   :  { %3286 = vmatpush.xpose.msk.msra.mxu2 %vm290_vm1, %v518_v30 }
 0x421   :  { %3287 = vmatmul.msk.f32.vlgmr.msra.gmra.mxu2 %vm290_vm1, %v483_v37  ;;  %v679_v26 = vpop.f32.mrf.mxu3 }
 0x422   :  { %726 = vmatpush.msrb.mxu2 %v695_v17 }
 0x424   :  { %727 = vmatpush.msrb.mxu2 %v694_v18  ;;  %v704_v18 = vld [vmem:[%s5543_s30 + $0x8] sm:$0xff] }
 0x426   :  { %728 = vmatpush.msrb.mxu2 %v693_v19  ;;  %v703_v19 = vld [vmem:[%s5543_s30] sm:$0xff] }
 0x428   :  { %729 = vmatpush.msrb.mxu2 %v692_v20  ;;  %v3512_v20 = vld [vmem:[%s5544_s6] ss:$0 sm:$0xff] }
 0x429   :  { %v682_v33 = vpop.f32.mrf.mxu3 }
 0x42a   :  { %887 = vmatpush.msra.mxu2 %v702_v21 }
 0x42c   :  { %888 = vmatpush.msra.mxu2 %v701_v22 }
 0x42e   :  { %889 = vmatpush.msra.mxu2 %v700_v23 }
 0x430   :  { %890 = vmatpush.msra.mxu2 %v699_v25 }
 0x488   :  { %v531_v40 = vpop.xlane.xlu0 %530 }
 0x490   :  { %v534_v41 = vpop.xlane.xlu1 %533 }
 0x4a4   :  { %v561_v38 = vpop.f32.mrf.mxu2 }
 0x4a5   :  { %v564_v39 = vperm.slane %v561_v38, 0  ;;  %v3511_v38 = vld [vmem:[%s5541_s19] ss:$0 sm:$0xff]  ;;  %s3835_s19 = smov [#allocation2]  }
 0x4a7   :  { %v565_v42 = vadd.f32 %v564_v39, %v531_v40  ;;  %v566_v43 = vadd.f32 %v564_v39, %v534_v41 }
 0x4a9   :  { %vm567_vm6 = vcmp.ge.f32.partialorder %v565_v42, 0.0  ;;  %v569_v44 = vmul.f32 0.2, %v565_v42  ;;  %vm568_vm7 = vcmp.ge.f32.partialorder %v566_v43, 0.0  ;;  %v570_v45 = vmul.f32 0.2, %v566_v43 }
 0x4ab   :  { %v571_v46 = vsel %vm567_vm6, %v565_v42, %v569_v44  ;;  %v572_v47 = vsel %vm568_vm7, %v566_v43, %v570_v45  ;;  %v696_v45 = vld [vmem:[%s5542_s24] sm:$0x1]  ;;  %s3192_s24 = sshll.u32 %s3835_s19, 4  ;;  %s3193_s24 = int_to_ptr.vmem [resolvable:$true] %s3192_s24 }
 0x4ac   :  { %v573_v48 = vsel %vm204_vm2, %v571_v46, -1e+30  ;;  %v574_v49 = vsel %vm205_vm5, %v572_v47, -1e+30 }
 0x4ad   :  { %v575_v50 = vsel %vm226_vm0, %v573_v48, -inf  ;;  %v578_v51 = vsel %vm226_vm0, %v574_v49, -inf }
 0x4ae   :  { %576 = vmax.xlane.f32.xlu2 %v575_v50  ;;  %579 = vmax.xlane.f32.xlu0 %v578_v51 }
 0x521   :  { %v577_v52 = vpop.xlane.xlu2 %576  ;;  %v580_v53 = vpop.xlane.xlu0 %579 }
 0x522   :  { %v581_v54 = vsub.f32 %v573_v48, %v577_v52  ;;  %v582_v55 = vsub.f32 %v574_v49, %v580_v53 }
 0x524   :  { %v583_v56 = vmul.f32 1.442695, %v581_v54  ;;  %v585_v57 = vmul.f32 1.442695, %v582_v55 }
 0x526   :  { %3531 = vpow2.f32 %v583_v56 }
 0x527   :  { %3533 = vpow2.f32 %v585_v57 }
 0x52c   :  { %v3532_v58 = vpop.eup %3531 }
 0x52d   :  { %v3534_v59 = vpop.eup %3533  ;;  %v587_v60 = vsel %vm204_vm2, %v3532_v58, 0.0 }
 0x52e   :  { %v589_v61 = vsel %vm226_vm0, %v587_v60, 0.0  ;;  %v588_v62 = vsel %vm205_vm5, %v3534_v59, 0.0 }
 0x52f   :  { %590 = vadd.xlane.f32.xlu1 %v589_v61  ;;  %v592_v63 = vsel %vm226_vm0, %v588_v62, 0.0 }
 0x530   :  { %593 = vadd.xlane.f32.xlu2 %v592_v63 }
 0x5a2   :  { %v591_v2 = vpop.xlane.xlu1 %590 }
 0x5a3   :  { %v595_v3 = vmax.f32 %v591_v2, 1e-20  ;;  %v594_v4 = vpop.xlane.xlu2 %593 }
 0x5a4   :  { %v596_v5 = vmax.f32 %v594_v4, 1e-20 }
 0x5a5   :  { %3535 = vrcp.f32 %v595_v3 }
 0x5a6   :  { %3537 = vrcp.f32 %v596_v5 }
 0x5ab   :  { %v3536_v6 = vpop.eup %3535 }
 0x5ac   :  { %v599_v8 = vmul.f32 %v3536_v6, %v587_v60  ;;  %v3538_v7 = vpop.eup %3537 }
 0x5ad   :  { %v600_v9 = vmul.f32 %v3538_v7, %v588_v62  ;;  %v706_v7 = vld [vmem:[%s5543_s30 + $0x18] sm:$0xff] }
 0x5ae   :  { %3288 = vmatmul.msk.f32.vlgmr.msra.gmra.mxu0 %vm226_vm0, %v599_v8  ;;  %864 = vmatpush.msrb.mxu3 %v706_v7 }
 0x5b6   :  { %3289 = vmatmul.msk.f32.gmra.mxu0 %vm226_vm0, %v600_v9  ;;  %v705_v9 = vld [vmem:[%s5543_s30 + $0x10] sm:$0xff]  ;;  %s3194_s30 = sshll.u32 %s4081_s17, 4  ;;  %s3195_s30 = int_to_ptr.hbm [resolvable:$true] %s3194_s30 }
 0x5b7   :  { %865 = vmatpush.msrb.mxu3 %v705_v9  ;;  %s3769_s6 = sshra.s32 %s3195_s30, 4  ;;  %s3770_s6 = int_to_ptr.hbm [resolvable:$true] %s3769_s6 }
 0x5b8   :  { %p3774_p1 = scmp.lt.s32.totalorder %s3770_s6, %s4081_s17 }
 0x5b9   :  { %866 = vmatpush.msrb.mxu3 %v704_v18  ;;  %v913_v18 = vld [vmem:[%s5550_s18 + $0x8] sm:$0xff] }
 0x5bb   :  { %867 = vmatpush.msrb.mxu3 %v703_v19  ;;  %v912_v19 = vld [vmem:[%s5550_s18] sm:$0xff] }
 0x62b   :  { %v627_v13 = vpop.f32.mrf.mxu0 }
 0x62c   :  { %v628_v14 = vadd.f32 %v3509_v12, %v627_v13 }
 0x62e   :  { %3290 = vmatmul.msk.f32.vlgmr.msrb.gmra.mxu1 %vm290_vm1, %v628_v14 }
 0x633   :  { %v630_v15 = vpop.f32.mrf.mxu0 }
 0x634   :  { %v631_v16 = vadd.f32 %v3509_v12, %v630_v15 }
 0x636   :  { %3291 = vmatmul.msk.f32.gmra.mxu1 %vm290_vm1, %v631_v16 }
 0x6ab   :  { %v656_v28 = vpop.f32.mrf.mxu1 }
 0x6ac   :  { %v680_v29 = vadd.f32 %v679_v26, %v656_v28  ;;  %v906_v26 = vld [vmem:[%s5545_s12 + $0x8] sm:$0xff] }
 0x6ad   :  { %v911_v28 = vld [vmem:[%s5546_s20 + $0x8] sm:$0xff] }
 0x6ae   :  { %v688_v30 = vadd.f32 %v3510_v27, %v680_v29  ;;  %v910_v29 = vld [vmem:[%s5546_s20] sm:$0xff]  ;;  %s3773_s20 = scalar_lea.hbm %s4081_s17, 16 }
 0x6b0   :  { %v690_v32 = vmax.f32 %v688_v30, 0.0 }
 0x6b2   :  { %3294 = vmatmul.msk.f32.vlgmr.msrb.gmra.mxu2 %vm290_vm1, %v690_v32 }
 0x6b3   :  { %v659_v34 = vpop.f32.mrf.mxu1  ;;  %1073 = vmatpush.msrb.mxu2 %v913_v18 }
 0x6b4   :  { %v683_v35 = vadd.f32 %v682_v33, %v659_v34 }
 0x6b5   :  { %1074 = vmatpush.msrb.mxu2 %v912_v19 }
 0x6b6   :  { %v689_v36 = vadd.f32 %v3510_v27, %v683_v35  ;;  %v905_v27 = vld [vmem:[%s5545_s12] sm:$0xff]  ;;  %s3771_s12 = scalar_lea.hbm %s3770_s6, 16 }
 0x6b7   :  { %p3772_p0 = scmp.ne.s32.totalorder %s3770_s6, %s3771_s12  ;;  %p3775_p2 = scmp.lt.s32.totalorder %s3773_s20, %s3771_s12 }
 0x6b8   :  { %v691_v37 = vmax.f32 %v689_v36, 0.0 }
 0x6b9   :  { %p3776_p3 = por %p3775_p2, %p3774_p1 }
 0x6ba   :  { %3295 = vmatmul.msk.f32.gmra.mxu2 %vm290_vm1, %v691_v37 }
 0x6bb   :  { %p3777_p4 = pnand %p3776_p3, %p3772_p0 }
 0x6c2   :  { %3303 = vmatmul.msk.f32.vlgmr.msra.gmra.mxu2 %vm290_vm1, %v690_v32  ;;  %v3513_v32 = vld [vmem:[%s5547_s27] ss:$0 sm:$0xff] }
 0x6ca   :  { %3304 = vmatmul.msk.f32.gmra.mxu2 %vm290_vm1, %v691_v37 }
 0x735   :  { %v731_v39 = vpop.f32.mrf.mxu2 }
 0x736   :  { %v740_v40 = vmul.f32 %v3511_v38, %v731_v39 }
 0x738   :  { %v742_v41 = vsel %vm290_vm1, %v740_v40, 0.0 }
 0x739   :  { %743 = vadd.xlane.f32.xlu0 %v742_v41 }
 0x73d   :  { %v734_v42 = vpop.f32.mrf.mxu2 }
 0x73e   :  { %3296 = vmatpush.xpose.msk.msrb.mxu0 %vm290_vm1, %v734_v42  ;;  %837 = vmatpush.msra.mxu1 %v734_v42  ;;  %v741_v43 = vmul.f32 %v3511_v38, %v734_v42  ;;  %v3514_v42 = vld [vmem:[%s5548_s15] ss:$0 sm:$0xff] }
 0x740   :  { %838 = vmatpush.msra.mxu1 %v731_v39  ;;  %v745_v44 = vsel %vm290_vm1, %v741_v43, 0.0 }
 0x741   :  { %746 = vadd.xlane.f32.xlu1 %v745_v44 }
 0x742   :  { %3297 = vmatpush.xpose.msk.msrb.mxu0 %vm290_vm1, %v731_v39 }
 0x745   :  { %3298 = vmatmul.msk.f32.vlgmr.msrb.gmra.mxu0 %vm290_vm1, %v696_v45  ;;  %v892_v30 = vpop.f32.mrf.mxu2 }
 0x746   :  { %935 = vmatpush.msra.mxu0 %v906_v26  ;;  %v1115_v26 = vld [vmem:[%s5552_s23 + $0x8] sm:$0xff] }
 0x748   :  { %936 = vmatpush.msra.mxu0 %v905_v27  ;;  %v1150_v27 = vld [vmem:[%s5553_s26 + $0x8] sm:$0xff] }
 0x74a   :  { %1096 = vmatpush.msrb.mxu0 %v911_v28  ;;  %v1114_v28 = vld [vmem:[%s5552_s23] sm:$0xff] }
 0x74c   :  { %1097 = vmatpush.msrb.mxu0 %v910_v29  ;;  %v1149_v29 = vld [vmem:[%s5553_s26] sm:$0xff] }
 0x74d   :  { %v895_v37 = vpop.f32.mrf.mxu2 }
 0x7ac   :  { %v744_v48 = vpop.xlane.xlu0 %743 }
 0x7b4   :  { %v747_v49 = vpop.xlane.xlu1 %746 }
 0x7c2   :  { %v774_v46 = vpop.f32.mrf.mxu0 }
 0x7c3   :  { %v777_v47 = vperm.slane %v774_v46, 0 }
 0x7c5   :  { %v778_v50 = vadd.f32 %v777_v47, %v744_v48  ;;  %v779_v51 = vadd.f32 %v777_v47, %v747_v49  ;;  %v907_v49 = vld [vmem:[%s5549_s16] sm:$0x1] }
 0x7c7   :  { %vm780_vm8 = vcmp.ge.f32.partialorder %v778_v50, 0.0  ;;  %v782_v52 = vmul.f32 0.2, %v778_v50  ;;  %vm781_vm9 = vcmp.ge.f32.partialorder %v779_v51, 0.0  ;;  %v783_v53 = vmul.f32 0.2, %v779_v51 }
 0x7c9   :  { %v784_v54 = vsel %vm780_vm8, %v778_v50, %v782_v52  ;;  %v785_v55 = vsel %vm781_vm9, %v779_v51, %v783_v53 }
 0x7ca   :  { %v786_v56 = vsel %vm204_vm2, %v784_v54, -1e+30  ;;  %v787_v57 = vsel %vm205_vm5, %v785_v55, -1e+30 }
 0x7cb   :  { %v788_v58 = vsel %vm226_vm0, %v786_v56, -inf  ;;  %v791_v59 = vsel %vm226_vm0, %v787_v57, -inf }
 0x7cc   :  { %789 = vmax.xlane.f32.xlu2 %v788_v58  ;;  %792 = vmax.xlane.f32.xlu0 %v791_v59 }
 0x83f   :  { %v790_v60 = vpop.xlane.xlu2 %789  ;;  %v793_v61 = vpop.xlane.xlu0 %792 }
 0x840   :  { %v794_v62 = vsub.f32 %v786_v56, %v790_v60  ;;  %v795_v63 = vsub.f32 %v787_v57, %v793_v61 }
 0x842   :  { %v796_v0 = vmul.f32 1.442695, %v794_v62  ;;  %v798_v1 = vmul.f32 1.442695, %v795_v63 }
 0x844   :  { %3539 = vpow2.f32 %v796_v0 }
 0x845   :  { %3541 = vpow2.f32 %v798_v1 }
 0x84a   :  { %v3540_v2 = vpop.eup %3539 }
 0x84b   :  { %v3542_v3 = vpop.eup %3541  ;;  %v800_v4 = vsel %vm204_vm2, %v3540_v2, 0.0 }
 0x84c   :  { %v802_v5 = vsel %vm226_vm0, %v800_v4, 0.0  ;;  %v801_v6 = vsel %vm205_vm5, %v3542_v3, 0.0 }
 0x84d   :  { %803 = vadd.xlane.f32.xlu1 %v802_v5  ;;  %v805_v8 = vsel %vm226_vm0, %v801_v6, 0.0 }
 0x84e   :  { %806 = vadd.xlane.f32.xlu2 %v805_v8 }
 0x8c0   :  { %v804_v10 = vpop.xlane.xlu1 %803 }
 0x8c1   :  { %v808_v11 = vmax.f32 %v804_v10, 1e-20  ;;  %v807_v12 = vpop.xlane.xlu2 %806 }
 0x8c2   :  { %v809_v13 = vmax.f32 %v807_v12, 1e-20 }
 0x8c3   :  { %3543 = vrcp.f32 %v808_v11 }
 0x8c4   :  { %3545 = vrcp.f32 %v809_v13 }
 0x8c9   :  { %v3544_v14 = vpop.eup %3543 }
 0x8ca   :  { %v812_v15 = vmul.f32 %v3544_v14, %v800_v4  ;;  %v3546_v16 = vpop.eup %3545 }
 0x8cb   :  { %v813_v17 = vmul.f32 %v3546_v16, %v801_v6 }
 0x8cc   :  { %3299 = vmatmul.msk.f32.vlgmr.msra.gmra.mxu1 %vm226_vm0, %v812_v15 }
 0x8d4   :  { %3300 = vmatmul.msk.f32.gmra.mxu1 %vm226_vm0, %v813_v17 }
 0x949   :  { %v840_v21 = vpop.f32.mrf.mxu1 }
 0x94a   :  { %v841_v22 = vadd.f32 %v3512_v20, %v840_v21 }
 0x94c   :  { %3301 = vmatmul.msk.f32.vlgmr.msrb.gmra.mxu3 %vm290_vm1, %v841_v22 }
 0x951   :  { %v843_v23 = vpop.f32.mrf.mxu1 }
 0x952   :  { %v844_v25 = vadd.f32 %v3512_v20, %v843_v23  ;;  %v3515_v20 = vld [vmem:[%s5551_s22] ss:$0 sm:$0xff] }
 0x954   :  { %3302 = vmatmul.msk.f32.gmra.mxu3 %vm290_vm1, %v844_v25 }
 0x9cf   :  { %v869_v33 = vpop.f32.mrf.mxu3 }
 0x9d0   :  { %v893_v34 = vadd.f32 %v892_v30, %v869_v33 }
 0x9d2   :  { %v901_v35 = vadd.f32 %v3513_v32, %v893_v34 }
 0x9d4   :  { %v903_v36 = vmax.f32 %v901_v35, 0.0 }
 0x9d6   :  { %3305 = vmatmul.msk.f32.vlgmr.msra.gmra.mxu0 %vm226_vm0, %v903_v36 }
 0x9d7   :  { %v872_v38 = vpop.f32.mrf.mxu3 }
 0x9d8   :  { %v896_v39 = vadd.f32 %v895_v37, %v872_v38 }
 0x9da   :  { %v902_v40 = vadd.f32 %v3513_v32, %v896_v39  ;;  %v3516_v32 = vld [vmem:[%s5554_s28] ss:$0 sm:$0xff] }
 0x9dc   :  { %v904_v41 = vmax.f32 %v902_v40, 0.0 }
 0x9de   :  { %3306 = vmatmul.msk.f32.gmra.mxu0 %vm226_vm0, %v904_v41 }
 0x9e6   :  { %3314 = vmatmul.msk.f32.vlgmr.msrb.gmra.mxu0 %vm226_vm0, %v903_v36 }
 0x9ee   :  { %3315 = vmatmul.msk.f32.gmra.mxu0 %vm226_vm0, %v904_v41 }
 0xa53   :  { %v938_v43 = vpop.f32.mrf.mxu0 }
 0xa54   :  { %v947_v44 = vmul.f32 %v3514_v42, %v938_v43 }
 0xa56   :  { %v949_v45 = vsel %vm226_vm0, %v947_v44, 0.0  ;;  %v3517_v44 = vld [vmem:[%s5555_s1] ss:$0 sm:$0xff] }
 0xa57   :  { %950 = vadd.xlane.f32.xlu0 %v949_v45 }
 0xa5b   :  { %v941_v46 = vpop.f32.mrf.mxu0 }
 0xa5c   :  { %3307 = vmatpush.xpose.msk.msrb.mxu1 %vm226_vm0, %v941_v46  ;;  %1044 = vmatpush.msra.mxu3 %v941_v46  ;;  %v948_v47 = vmul.f32 %v3514_v42, %v941_v46 }
 0xa5e   :  { %1045 = vmatpush.msra.mxu3 %v938_v43  ;;  %v952_v48 = vsel %vm226_vm0, %v948_v47, 0.0 }
 0xa5f   :  { %953 = vadd.xlane.f32.xlu1 %v952_v48  ;;  %v1210_v48 = vld [vmem:[%s5556_s2] sm:$0xff] }
 0xa60   :  { %3308 = vmatpush.xpose.msk.msrb.mxu1 %vm226_vm0, %v938_v43  ;;  %1169 = vmatpush.msrb.mxu3 %v1150_v27 }
 0xa62   :  { %1170 = vmatpush.msrb.mxu3 %v1149_v29 }
 0xa63   :  { %3309 = vmatmul.msk.f32.vlgmr.msrb.gmra.mxu1 %vm226_vm0, %v907_v49  ;;  %v1099_v30 = vpop.f32.mrf.mxu0  ;;  %v3518_v49 = vld [vmem:[%s5557_s7] ss:$0 sm:$0xff] }
 0xa64   :  { %1140 = vmatpush.msra.mxu1 %v1115_v26 }
 0xa66   :  { %1141 = vmatpush.msra.mxu1 %v1114_v28 }
 0xa6b   :  { %v1102_v37 = vpop.f32.mrf.mxu0 }
 0xaca   :  { %v951_v52 = vpop.xlane.xlu0 %950 }
 0xad2   :  { %v954_v53 = vpop.xlane.xlu1 %953 }
 0xae0   :  { %v981_v50 = vpop.f32.mrf.mxu1 }
 0xae1   :  { %v984_v51 = vperm.slane %v981_v50, 0 }
 0xae3   :  { %v985_v54 = vadd.f32 %v984_v51, %v951_v52  ;;  %v986_v55 = vadd.f32 %v984_v51, %v954_v53  ;;  %v1178_v53 = vld [vmem:[%s5558_s10] sm:$0xff] }
 0xae5   :  { %vm987_vm10 = vcmp.ge.f32.partialorder %v985_v54, 0.0  ;;  %v989_v56 = vmul.f32 0.2, %v985_v54  ;;  %vm988_vm11 = vcmp.ge.f32.partialorder %v986_v55, 0.0  ;;  %v990_v57 = vmul.f32 0.2, %v986_v55 }
 0xae7   :  { %v991_v58 = vsel %vm987_vm10, %v985_v54, %v989_v56  ;;  %v992_v59 = vsel %vm988_vm11, %v986_v55, %v990_v57  ;;  %v1211_v54 = vld [vmem:[%s5556_s2 + $0x8] sm:$0xff]  ;;  %v1212_v56 = vld [vmem:[%s5556_s2 + $0x10] sm:$0xff] }
 0xae8   :  { %v993_v60 = vsel %vm204_vm2, %v991_v58, -1e+30  ;;  %v994_v61 = vsel %vm205_vm5, %v992_v59, -1e+30  ;;  %v1179_v55 = vld [vmem:[%s5558_s10 + $0x8] sm:$0xff]  ;;  %v1180_v57 = vld [vmem:[%s5558_s10 + $0x10] sm:$0xff] }
 0xae9   :  { %v995_v62 = vsel %vm226_vm0, %v993_v60, -inf  ;;  %v998_v63 = vsel %vm226_vm0, %v994_v61, -inf  ;;  %v1213_v58 = vld [vmem:[%s5556_s2 + $0x18] sm:$0xff] }
 0xaea   :  { %996 = vmax.xlane.f32.xlu2 %v995_v62  ;;  %999 = vmax.xlane.f32.xlu0 %v998_v63  ;;  %v1181_v59 = vld [vmem:[%s5558_s10 + $0x18] sm:$0xff]  ;;  %v1215_v62 = vld [vmem:[%s5556_s2 + $0x28] sm:$0xff] }
 0xaeb   :  { %v1183_v63 = vld [vmem:[%s5558_s10 + $0x28] sm:$0xff] }
 0xb5d   :  { %v997_v0 = vpop.xlane.xlu2 %996  ;;  %v1000_v1 = vpop.xlane.xlu0 %999 }
 0xb5e   :  { %v1001_v2 = vsub.f32 %v993_v60, %v997_v0  ;;  %v1002_v3 = vsub.f32 %v994_v61, %v1000_v1  ;;  %v1214_v60 = vld [vmem:[%s5556_s2 + $0x20] sm:$0xff]  ;;  %v1216_v0 = vld [vmem:[%s5556_s2 + $0x30] sm:$0xff] }
 0xb5f   :  { %v1182_v61 = vld [vmem:[%s5558_s10 + $0x20] sm:$0xff]  ;;  %v1184_v1 = vld [vmem:[%s5558_s10 + $0x30] sm:$0xff] }
 0xb60   :  { %v1003_v4 = vmul.f32 1.442695, %v1001_v2  ;;  %v1005_v5 = vmul.f32 1.442695, %v1002_v3  ;;  %v1761_v2 = vld [vmem:[%s5559_s11 + $0x8] sm:$0xff]  ;;  %v1760_v3 = vld [vmem:[%s5559_s11] sm:$0xff] }
 0xb61   :  { %1876 = vmatpush.msrb.mxu1 %v1761_v2 }
 0xb62   :  { %3547 = vpow2.f32 %v1003_v4  ;;  %v1217_v4 = vld [vmem:[%s5556_s2 + $0x38] sm:$0xff] }
 0xb63   :  { %3549 = vpow2.f32 %v1005_v5  ;;  %1877 = vmatpush.msrb.mxu1 %v1760_v3  ;;  %v1185_v5 = vld [vmem:[%s5558_s10 + $0x38] sm:$0xff] }
 0xb68   :  { %v3548_v6 = vpop.eup %3547 }
 0xb69   :  { %v3550_v8 = vpop.eup %3549  ;;  %v1007_v7 = vsel %vm204_vm2, %v3548_v6, 0.0  ;;  %v1218_v6 = vld [vmem:[%s5556_s2 + $0x40] sm:$0xff] }
 0xb6a   :  { %v1009_v9 = vsel %vm226_vm0, %v1007_v7, 0.0  ;;  %v1008_v10 = vsel %vm205_vm5, %v3550_v8, 0.0  ;;  %v1186_v8 = vld [vmem:[%s5558_s10 + $0x40] sm:$0xff] }
 0xb6b   :  { %1010 = vadd.xlane.f32.xlu1 %v1009_v9  ;;  %v1012_v11 = vsel %vm226_vm0, %v1008_v10, 0.0  ;;  %v1187_v9 = vld [vmem:[%s5558_s10 + $0x48] sm:$0xff] }
 0xb6c   :  { %1013 = vadd.xlane.f32.xlu2 %v1012_v11  ;;  %v4344_v11 = vld [vmem:[%s5560_s0] ss:$0 sm:$0xff] }
 0xbde   :  { %v1011_v12 = vpop.xlane.xlu1 %1010 }
 0xbdf   :  { %v1015_v13 = vmax.f32 %v1011_v12, 1e-20  ;;  %v1014_v14 = vpop.xlane.xlu2 %1013 }
 0xbe0   :  { %v1016_v15 = vmax.f32 %v1014_v14, 1e-20 }
 0xbe1   :  { %3551 = vrcp.f32 %v1015_v13 }
 0xbe2   :  { %3553 = vrcp.f32 %v1016_v15  ;;  %v1188_v15 = vld [vmem:[%s5558_s10 + $0x50] sm:$0xff] }
 0xbe7   :  { %v3552_v16 = vpop.eup %3551 }
 0xbe8   :  { %v1019_v24 = vmul.f32 %v3552_v16, %v1007_v7  ;;  %v3554_v31 = vpop.eup %3553  ;;  %v1219_v7 = vld [vmem:[%s5556_s2 + $0x48] sm:$0xff] }
 0xbe9   :  { %v1020_v17 = vmul.f32 %v3554_v31, %v1008_v10  ;;  %v1220_v10 = vld [vmem:[%s5556_s2 + $0x50] sm:$0xff]  ;;  %v1221_v31 = vld [vmem:[%s5556_s2 + $0x58] sm:$0xff] }
 0xbea   :  { %3310 = vmatmul.msk.f32.vlgmr.msra.gmra.mxu3 %vm226_vm0, %v1019_v24 }
 0xbf2   :  { %3311 = vmatmul.msk.f32.gmra.mxu3 %vm226_vm0, %v1020_v17 }
 0xc6d   :  { %v1047_v21 = vpop.f32.mrf.mxu3 }
 0xc6e   :  { %v1048_v22 = vadd.f32 %v3515_v20, %v1047_v21 }
 0xc70   :  { %3312 = vmatmul.msk.f32.vlgmr.msrb.gmra.mxu2 %vm226_vm0, %v1048_v22 }
 0xc75   :  { %v1050_v23 = vpop.f32.mrf.mxu3 }
 0xc76   :  { %v1051_v25 = vadd.f32 %v3515_v20, %v1050_v23  ;;  %v1189_v20 = vld [vmem:[%s5558_s10 + $0x58] sm:$0xff]  ;;  %v1222_v23 = vld [vmem:[%s5556_s2 + $0x60] sm:$0xff] }
 0xc78   :  { %3313 = vmatmul.msk.f32.gmra.mxu2 %vm226_vm0, %v1051_v25  ;;  %v1190_v25 = vld [vmem:[%s5558_s10 + $0x60] sm:$0xff] }
 0xcf3   :  { %v1076_v33 = vpop.f32.mrf.mxu2 }
 0xcf4   :  { %v1100_v34 = vadd.f32 %v1099_v30, %v1076_v33  ;;  %v1223_v30 = vld [vmem:[%s5556_s2 + $0x68] sm:$0xff] }
 0xcf6   :  { %v1108_v35 = vadd.f32 %v3516_v32, %v1100_v34 }
 0xcf8   :  { %v1110_v36 = vmax.f32 %v1108_v35, 0.0 }
 0xcfa   :  { %1112 = vst.msk [vmem:[#allocation2] sm:$0xff] %vm226_vm0, %v1110_v36  ;;  %3316 = vmatmul.msk.f32.vlgmr.msra.gmra.mxu1 %vm226_vm0, %v1110_v36  ;;  %3318 = vmatmul.msk.f32.vlgmr.msrb.gmra.mxu3 %vm226_vm0, %v1110_v36 }
 0xcfb   :  { %v1079_v38 = vpop.f32.mrf.mxu2 }
 0xcfc   :  { %v1103_v39 = vadd.f32 %v1102_v37, %v1079_v38 }
 0xcfe   :  { %v1109_v40 = vadd.f32 %v3516_v32, %v1103_v39 }
 0xd00   :  { %v1111_v41 = vmax.f32 %v1109_v40, 0.0 }
 0xd02   :  { %1113 = vst.msk [vmem:[#allocation2 + $0x8] sm:$0xff] %vm226_vm0, %v1111_v41  ;;  %3317 = vmatmul.msk.f32.gmra.mxu1 %vm226_vm0, %v1111_v41  ;;  %3319 = vmatmul.msk.f32.gmra.mxu3 %vm226_vm0, %v1111_v41 }
 0xd77   :  { %v1143_v42 = vpop.f32.mrf.mxu1 }
 0xd78   :  { %v1144_v47 = vadd.f32 %v3517_v44, %v1143_v42 }
 0xd7d   :  { %v1172_v43 = vpop.f32.mrf.mxu3 }
 0xd7e   :  { %v1173_v52 = vadd.f32 %v3518_v49, %v1172_v43 }
 0xd7f   :  { %v1146_v45 = vpop.f32.mrf.mxu1 }
 0xd80   :  { %v1147_v46 = vadd.f32 %v3517_v44, %v1146_v45 }
 0xd82   :  { %1352 = vmatpush.msra.mxu2 %v1147_v46 }
 0xd84   :  { %1353 = vmatpush.msra.mxu2 %v1144_v47 }
 0xd85   :  { %v1175_v50 = vpop.f32.mrf.mxu3  ;;  %3320 = vmatmul.msk.f32.vlgmr.msra.gmra.mxu2 %vm226_vm0, %v1210_v48 }
 0xd86   :  { %v1176_v51 = vadd.f32 %v3518_v49, %v1175_v50 }
 0xd88   :  { %1561 = vmatpush.msra.mxu0 %v1176_v51 }
 0xd8a   :  { %1562 = vmatpush.msra.mxu0 %v1173_v52 }
 0xd8b   :  { %3352 = vmatmul.msk.f32.vlgmr.msra.gmra.mxu0 %vm226_vm0, %v1178_v53  ;;  %v2076_v53 = vld [vmem:[%s5561_s5 + $0x8] sm:$0xff] }
 0xd8c   :  { %2191 = vmatpush.msra.mxu3 %v2076_v53 }
 0xd8d   :  { %3321 = vmatmul.msk.f32.gmra.mxu2 %vm226_vm0, %v1211_v54  ;;  %v1191_v54 = vld [vmem:[%s5558_s10 + $0x68] sm:$0xff] }
 0xd93   :  { %3353 = vmatmul.msk.f32.gmra.mxu0 %vm226_vm0, %v1179_v55  ;;  %v2075_v55 = vld [vmem:[%s5561_s5] sm:$0xff] }
 0xd94   :  { %2192 = vmatpush.msra.mxu3 %v2075_v55 }
 0xd95   :  { %3322 = vmatmul.msk.f32.gmra.mxu2 %vm226_vm0, %v1212_v56  ;;  %v1224_v56 = vld [vmem:[%s5556_s2 + $0x70] sm:$0xff] }
 0xd9b   :  { %3354 = vmatmul.msk.f32.gmra.mxu0 %vm226_vm0, %v1180_v57 }
 0xd9d   :  { %3323 = vmatmul.msk.f32.gmra.mxu2 %vm226_vm0, %v1213_v58 }
 0xda3   :  { %3355 = vmatmul.msk.f32.gmra.mxu0 %vm226_vm0, %v1181_v59 }
 0xda5   :  { %3324 = vmatmul.msk.f32.gmra.mxu2 %vm226_vm0, %v1214_v60  ;;  %v1192_v60 = vld [vmem:[%s5558_s10 + $0x70] sm:$0xff] }
 0xdab   :  { %3356 = vmatmul.msk.f32.gmra.mxu0 %vm226_vm0, %v1182_v61 }
 0xdad   :  { %3325 = vmatmul.msk.f32.gmra.mxu2 %vm226_vm0, %v1215_v62 }
 0xdb3   :  { %3357 = vmatmul.msk.f32.gmra.mxu0 %vm226_vm0, %v1183_v63 }
 0xdb5   :  { %3326 = vmatmul.msk.f32.gmra.mxu2 %vm226_vm0, %v1216_v0 }
 0xdbb   :  { %3358 = vmatmul.msk.f32.gmra.mxu0 %vm226_vm0, %v1184_v1 }
 0xdbd   :  { %3327 = vmatmul.msk.f32.gmra.mxu2 %vm226_vm0, %v1217_v4  ;;  %v1225_v4 = vld [vmem:[%s5556_s2 + $0x78] sm:$0xff] }
 0xdc3   :  { %3359 = vmatmul.msk.f32.gmra.mxu0 %vm226_vm0, %v1185_v5  ;;  %v1193_v5 = vld [vmem:[%s5558_s10 + $0x78] sm:$0xff] }
 0xdc5   :  { %3328 = vmatmul.msk.f32.gmra.mxu2 %vm226_vm0, %v1218_v6 }
 0xdcb   :  { %3360 = vmatmul.msk.f32.gmra.mxu0 %vm226_vm0, %v1186_v8 }
 0xdcd   :  { %3329 = vmatmul.msk.f32.gmra.mxu2 %vm226_vm0, %v1219_v7 }
 0xdd3   :  { %3361 = vmatmul.msk.f32.gmra.mxu0 %vm226_vm0, %v1187_v9 }
 0xdd5   :  { %3330 = vmatmul.msk.f32.gmra.mxu2 %vm226_vm0, %v1220_v10  ;;  %v1226_v10 = vld [vmem:[%s5556_s2 + $0x80] sm:$0xff] }
 0xddb   :  { %3362 = vmatmul.msk.f32.gmra.mxu0 %vm226_vm0, %v1188_v15 }
 0xddd   :  { %3331 = vmatmul.msk.f32.gmra.mxu2 %vm226_vm0, %v1221_v31 }
 0xde3   :  { %3363 = vmatmul.msk.f32.gmra.mxu0 %vm226_vm0, %v1189_v20 }
 0xde5   :  { %3332 = vmatmul.msk.f32.gmra.mxu2 %vm226_vm0, %v1222_v23 }
 0xdeb   :  { %3364 = vmatmul.msk.f32.gmra.mxu0 %vm226_vm0, %v1190_v25 }
 0xded   :  { %3333 = vmatmul.msk.f32.gmra.mxu2 %vm226_vm0, %v1223_v30  ;;  %v1195_v30 = vld [vmem:[%s5558_s10 + $0x88] sm:$0xff] }
 0xdf3   :  { %3365 = vmatmul.msk.f32.gmra.mxu0 %vm226_vm0, %v1191_v54 }
 0xdf5   :  { %3334 = vmatmul.msk.f32.gmra.mxu2 %vm226_vm0, %v1224_v56 }
 0xdfb   :  { %3366 = vmatmul.msk.f32.gmra.mxu0 %vm226_vm0, %v1192_v60 }
 0xdfd   :  { %3335 = vmatmul.msk.f32.gmra.mxu2 %vm226_vm0, %v1225_v4 }
 0xe03   :  { %3367 = vmatmul.msk.f32.gmra.mxu0 %vm226_vm0, %v1193_v5 }
 0xe05   :  { %3336 = vmatmul.msk.f32.gmra.mxu2 %vm226_vm0, %v1226_v10 }
 0xe08   :  { %v1355_v12 = vpop.f32.mrf.mxu2  ;;  %v1564_v13 = vpop.f32.mrf.mxu0 }
 0xe09   :  { %v1565_v14 = vadd.f32 %v1564_v13, %v1355_v12  ;;  %v1194_v12 = vld [vmem:[%s5558_s10 + $0x80] sm:$0xff] }
 0xe0b   :  { %vm1661_vm12 = vcmp.ge.f32.partialorder %v1565_v14, 0.0  ;;  %v1696_v16 = vmul.f32 %v4344_v11, %v1565_v14  ;;  %3368 = vmatmul.msk.f32.gmra.mxu0 %vm226_vm0, %v1194_v12  ;;  %v1230_v12 = vld [vmem:[%s5556_s2 + $0xa0] sm:$0xff] }
 0xe0d   :  { %v1728_v24 = vsel %vm1661_vm12, %v1565_v14, %v1696_v16  ;;  %v4393_v14 = vld [vmem:[%s5562_s9] ss:$0 sm:$0xff] }
 0xe0e   :  { %3384 = vmatmul.msk.f32.vlgmr.msrb.gmra.mxu1 %vm226_vm0, %v1728_v24  ;;  %v4397_v16 = vld [vmem:[%s5563_s21] ss:$0 sm:$0xff] }
 0xe10   :  { %v1358_v17 = vpop.f32.mrf.mxu2  ;;  %v1567_v18 = vpop.f32.mrf.mxu0 }
 0xe11   :  { %v1568_v19 = vadd.f32 %v1567_v18, %v1358_v17 }
 0xe13   :  { %vm1662_vm13 = vcmp.ge.f32.partialorder %v1568_v19, 0.0  ;;  %v1697_v21 = vmul.f32 %v4344_v11, %v1568_v19  ;;  %3369 = vmatmul.msk.f32.gmra.mxu0 %vm226_vm0, %v1195_v30 }
 0xe15   :  { %v1729_v22 = vsel %vm1662_vm13, %v1568_v19, %v1697_v21  ;;  %v1227_v21 = vld [vmem:[%s5556_s2 + $0x88] sm:$0xff] }
 0xe16   :  { %3385 = vmatmul.msk.f32.gmra.mxu1 %vm226_vm0, %v1729_v22  ;;  %3337 = vmatmul.msk.f32.gmra.mxu2 %vm226_vm0, %v1227_v21 }
 0xe18   :  { %v1361_v26 = vpop.f32.mrf.mxu2  ;;  %v1570_v27 = vpop.f32.mrf.mxu0 }
 0xe19   :  { %v1571_v28 = vadd.f32 %v1570_v27, %v1361_v26 }
 0xe1b   :  { %vm1663_vm14 = vcmp.ge.f32.partialorder %v1571_v28, 0.0  ;;  %v1698_v29 = vmul.f32 %v4344_v11, %v1571_v28 }
 0xe1d   :  { %v1730_v32 = vsel %vm1663_vm14, %v1571_v28, %v1698_v29 }
 0xe1e   :  { %3386 = vmatmul.msk.f32.gmra.mxu1 %vm226_vm0, %v1730_v32 }
 0xe20   :  { %v1364_v33 = vpop.f32.mrf.mxu2  ;;  %v1573_v34 = vpop.f32.mrf.mxu0 }
 0xe21   :  { %v1574_v35 = vadd.f32 %v1573_v34, %v1364_v33 }
 0xe23   :  { %vm1664_vm15 = vcmp.ge.f32.partialorder %v1574_v35, 0.0  ;;  %v1699_v36 = vmul.f32 %v4344_v11, %v1574_v35 }
 0xe25   :  { %v1731_v37 = vsel %vm1664_vm15, %v1574_v35, %v1699_v36 }
 0xe26   :  { %3387 = vmatmul.msk.f32.gmra.mxu1 %vm226_vm0, %v1731_v37  ;;  %v1228_v37 = vld [vmem:[%s5556_s2 + $0x90] sm:$0xff] }
 0xe27   :  { %3338 = vmatmul.msk.f32.gmra.mxu2 %vm226_vm0, %v1228_v37 }
 0xe28   :  { %v1367_v38 = vpop.f32.mrf.mxu2  ;;  %v1576_v39 = vpop.f32.mrf.mxu0 }
 0xe29   :  { %v1577_v40 = vadd.f32 %v1576_v39, %v1367_v38  ;;  %v1196_v39 = vld [vmem:[%s5558_s10 + $0x90] sm:$0xff] }
 0xe2a   :  { %3370 = vmatmul.msk.f32.gmra.mxu0 %vm226_vm0, %v1196_v39 }
 0xe2b   :  { %vm1665_vm1 = vcmp.ge.f32.partialorder %v1577_v40, 0.0  ;;  %v1700_v41 = vmul.f32 %v4344_v11, %v1577_v40 }
 0xe2d   :  { %v1732_v42 = vsel %vm1665_vm1, %v1577_v40, %v1700_v41 }
 0xe2e   :  { %3388 = vmatmul.msk.f32.gmra.mxu1 %vm226_vm0, %v1732_v42 }
 0xe30   :  { %v1370_v43 = vpop.f32.mrf.mxu2  ;;  %v1579_v44 = vpop.f32.mrf.mxu0 }
 0xe31   :  { %v1580_v45 = vadd.f32 %v1579_v44, %v1370_v43 }
 0xe33   :  { %vm1666_vm2 = vcmp.ge.f32.partialorder %v1580_v45, 0.0  ;;  %v1701_v46 = vmul.f32 %v4344_v11, %v1580_v45 }
 0xe35   :  { %v1733_v47 = vsel %vm1666_vm2, %v1580_v45, %v1701_v46  ;;  %v1229_v46 = vld [vmem:[%s5556_s2 + $0x98] sm:$0xff] }
 0xe36   :  { %3389 = vmatmul.msk.f32.gmra.mxu1 %vm226_vm0, %v1733_v47  ;;  %3339 = vmatmul.msk.f32.gmra.mxu2 %vm226_vm0, %v1229_v46 }
 0xe38   :  { %v1373_v48 = vpop.f32.mrf.mxu2  ;;  %v1582_v49 = vpop.f32.mrf.mxu0 }
 0xe39   :  { %v1583_v50 = vadd.f32 %v1582_v49, %v1373_v48 }
 0xe3b   :  { %vm1667_vm3 = vcmp.ge.f32.partialorder %v1583_v50, 0.0  ;;  %v1702_v51 = vmul.f32 %v4344_v11, %v1583_v50 }
 0xe3d   :  { %v1734_v52 = vsel %vm1667_vm3, %v1583_v50, %v1702_v51 }
 0xe3e   :  { %3390 = vmatmul.msk.f32.gmra.mxu1 %vm226_vm0, %v1734_v52  ;;  %3340 = vmatmul.msk.f32.gmra.mxu2 %vm226_vm0, %v1230_v12 }
 0xe40   :  { %v1585_v57 = vpop.f32.mrf.mxu0  ;;  %v1376_v58 = vpop.f32.mrf.mxu2 }
 0xe41   :  { %v1586_v59 = vadd.f32 %v1585_v57, %v1376_v58 }
 0xe43   :  { %vm1668_vm4 = vcmp.ge.f32.partialorder %v1586_v59, 0.0  ;;  %v1703_v61 = vmul.f32 %v4344_v11, %v1586_v59 }
 0xe45   :  { %v1735_v62 = vsel %vm1668_vm4, %v1586_v59, %v1703_v61 }
 0xe46   :  { %3391 = vmatmul.msk.f32.gmra.mxu1 %vm226_vm0, %v1735_v62 }
 0xe48   :  { %v1588_v63 = vpop.f32.mrf.mxu0  ;;  %v1379_v0 = vpop.f32.mrf.mxu2 }
 0xe49   :  { %v1589_v1 = vadd.f32 %v1588_v63, %v1379_v0  ;;  %v1197_v63 = vld [vmem:[%s5558_s10 + $0x98] sm:$0xff] }
 0xe4a   :  { %3371 = vmatmul.msk.f32.gmra.mxu0 %vm226_vm0, %v1197_v63 }
 0xe4b   :  { %vm1669_vm5 = vcmp.ge.f32.partialorder %v1589_v1, 0.0  ;;  %v1704_v2 = vmul.f32 %v4344_v11, %v1589_v1 }
 0xe4d   :  { %v1736_v3 = vsel %vm1669_vm5, %v1589_v1, %v1704_v2 }
 0xe4e   :  { %3392 = vmatmul.msk.f32.gmra.mxu1 %vm226_vm0, %v1736_v3 }
 0xe50   :  { %v1591_v6 = vpop.f32.mrf.mxu0  ;;  %v1382_v8 = vpop.f32.mrf.mxu2 }
 0xe51   :  { %v1592_v7 = vadd.f32 %v1591_v6, %v1382_v8 }
 0xe53   :  { %vm1670_vm6 = vcmp.ge.f32.partialorder %v1592_v7, 0.0  ;;  %v1705_v9 = vmul.f32 %v4344_v11, %v1592_v7 }
 0xe55   :  { %v1737_v13 = vsel %vm1670_vm6, %v1592_v7, %v1705_v9 }
 0xe56   :  { %3393 = vmatmul.msk.f32.gmra.mxu1 %vm226_vm0, %v1737_v13 }
 0xe58   :  { %v1594_v15 = vpop.f32.mrf.mxu0  ;;  %v1385_v24 = vpop.f32.mrf.mxu2 }
 0xe59   :  { %v1595_v17 = vadd.f32 %v1594_v15, %v1385_v24 }
 0xe5b   :  { %v1706_v19 = vmul.f32 %v4344_v11, %v1595_v17  ;;  %vm1671_vm7 = vcmp.ge.f32.partialorder %v1595_v17, 0.0 }
 0xe5d   :  { %v1738_v22 = vsel %vm1671_vm7, %v1595_v17, %v1706_v19  ;;  %v1231_v19 = vld [vmem:[%s5556_s2 + $0xa8] sm:$0xff]  ;;  %vm2290_vm7 = vcmask 15360  }
 0xe5e   :  { %3394 = vmatmul.msk.f32.gmra.mxu1 %vm226_vm0, %v1738_v22  ;;  %3341 = vmatmul.msk.f32.gmra.mxu2 %vm226_vm0, %v1231_v19 }
 0xe60   :  { %v1597_v25 = vpop.f32.mrf.mxu0  ;;  %v1388_v26 = vpop.f32.mrf.mxu2 }
 0xe61   :  { %v1598_v28 = vadd.f32 %v1597_v25, %v1388_v26 }
 0xe63   :  { %v1707_v32 = vmul.f32 %v4344_v11, %v1598_v28  ;;  %vm1672_vm9 = vcmp.ge.f32.partialorder %v1598_v28, 0.0 }
 0xe65   :  { %v1739_v34 = vsel %vm1672_vm9, %v1598_v28, %v1707_v32 }
 0xe66   :  { %3395 = vmatmul.msk.f32.gmra.mxu1 %vm226_vm0, %v1739_v34 }
 0xe68   :  { %v1600_v36 = vpop.f32.mrf.mxu0  ;;  %v1391_v38 = vpop.f32.mrf.mxu2 }
 0xe69   :  { %v1601_v41 = vadd.f32 %v1600_v36, %v1391_v38 }
 0xe6b   :  { %vm1673_vm11 = vcmp.ge.f32.partialorder %v1601_v41, 0.0  ;;  %v1708_v43 = vmul.f32 %v4344_v11, %v1601_v41 }
 0xe6d   :  { %v1740_v45 = vsel %vm1673_vm11, %v1601_v41, %v1708_v43 }
 0xe6e   :  { %3396 = vmatmul.msk.f32.gmra.mxu1 %vm226_vm0, %v1740_v45 }
 0xe70   :  { %v1394_v1 = vpop.f32.mrf.mxu2  ;;  %v1603_v2 = vpop.f32.mrf.mxu0 }
 0xe71   :  { %v1604_v3 = vadd.f32 %v1603_v2, %v1394_v1 }
 0xe73   :  { %vm1674_vm2 = vcmp.ge.f32.partialorder %v1604_v3, 0.0  ;;  %v1709_v4 = vmul.f32 %v4344_v11, %v1604_v3 }
 0xe75   :  { %v1741_v5 = vsel %vm1674_vm2, %v1604_v3, %v1709_v4 }
 0xe76   :  { %3397 = vmatmul.msk.f32.gmra.mxu1 %vm226_vm0, %v1741_v5 }
 0xe78   :  { %v1397_v6 = vpop.f32.mrf.mxu2  ;;  %v1606_v8 = vpop.f32.mrf.mxu0 }
 0xe79   :  { %v1607_v7 = vadd.f32 %v1606_v8, %v1397_v6  ;;  %v1201_v8 = vld [vmem:[%s5558_s10 + $0xb8] sm:$0xff] }
 0xe7b   :  { %vm1675_vm3 = vcmp.ge.f32.partialorder %v1607_v7, 0.0  ;;  %v1710_v13 = vmul.f32 %v4344_v11, %v1607_v7 }
 0xe7d   :  { %v1742_v24 = vsel %vm1675_vm3, %v1607_v7, %v1710_v13  ;;  %v1234_v7 = vld [vmem:[%s5556_s2 + $0xc0] sm:$0xff] }
 0xe7e   :  { %3398 = vmatmul.msk.f32.gmra.mxu1 %vm226_vm0, %v1742_v24 }
 0xe80   :  { %v1400_v25 = vpop.f32.mrf.mxu2  ;;  %v1609_v26 = vpop.f32.mrf.mxu0 }
 0xe88   :  { %v1612_v37 = vpop.f32.mrf.mxu0  ;;  %v1403_v38 = vpop.f32.mrf.mxu2 }
 0xe8b   :  { %v1879_v31 = vpop.f32.mrf.mxu1 }
 0xe8c   :  { %v1880_v18 = vadd.f32 %v4393_v14, %v1879_v31 }
 0xe8e   :  { %vm1976_vm8 = vcmp.ge.f32.partialorder %v1880_v18, 0.0  ;;  %v2011_v20 = vmul.f32 %v4397_v16, %v1880_v18 }
 0xe90   :  { %v2043_v23 = vsel %vm1976_vm8, %v1880_v18, %v2011_v20  ;;  %v1198_v18 = vld [vmem:[%s5558_s10 + $0xa0] sm:$0xff] }
 0xe91   :  { %3416 = vmatmul.msk.f32.vlgmr.msra.gmra.mxu3 %vm226_vm0, %v2043_v23  ;;  %3372 = vmatmul.msk.f32.gmra.mxu0 %vm226_vm0, %v1198_v18  ;;  %v1199_v23 = vld [vmem:[%s5558_s10 + $0xa8] sm:$0xff] }
 0xe93   :  { %v1882_v27 = vpop.f32.mrf.mxu1 }
 0xe94   :  { %v1883_v29 = vadd.f32 %v4393_v14, %v1882_v27  ;;  %v1610_v27 = vadd.f32 %v1609_v26, %v1400_v25 }
 0xe96   :  { %vm1977_vm10 = vcmp.ge.f32.partialorder %v1883_v29, 0.0  ;;  %v2012_v33 = vmul.f32 %v4397_v16, %v1883_v29  ;;  %vm1676_vm6 = vcmp.ge.f32.partialorder %v1610_v27, 0.0  ;;  %v1711_v28 = vmul.f32 %v4344_v11, %v1610_v27 }
 0xe98   :  { %v2044_v35 = vsel %vm1977_vm10, %v1883_v29, %v2012_v33  ;;  %v4460_v29 = vld [vmem:[%s5564_s3] ss:$0 sm:$0xff]  ;;  %v1743_v30 = vsel %vm1676_vm6, %v1610_v27, %v1711_v28 }
 0xe99   :  { %3417 = vmatmul.msk.f32.gmra.mxu3 %vm226_vm0, %v2044_v35  ;;  %3373 = vmatmul.msk.f32.gmra.mxu0 %vm226_vm0, %v1199_v23 }
 0xe9a   :  { %3399 = vmatmul.msk.f32.gmra.mxu1 %vm226_vm0, %v1743_v30 }
 0xe9b   :  { %v1885_v40 = vpop.f32.mrf.mxu1 }
 0xe9c   :  { %v1886_v42 = vadd.f32 %v4393_v14, %v1885_v40  ;;  %v1613_v40 = vadd.f32 %v1612_v37, %v1403_v38 }
 0xe9e   :  { %vm1978_vm12 = vcmp.ge.f32.partialorder %v1886_v42, 0.0  ;;  %v2013_v44 = vmul.f32 %v4397_v16, %v1886_v42  ;;  %vm1677_vm8 = vcmp.ge.f32.partialorder %v1613_v40, 0.0  ;;  %v1712_v43 = vmul.f32 %v4344_v11, %v1613_v40 }
 0xea0   :  { %v2045_v47 = vsel %vm1978_vm12, %v1886_v42, %v2013_v44  ;;  %v1744_v46 = vsel %vm1677_vm8, %v1613_v40, %v1712_v43 }
 0xea1   :  { %3418 = vmatmul.msk.f32.gmra.mxu3 %vm226_vm0, %v2045_v47 }
 0xea2   :  { %3400 = vmatmul.msk.f32.gmra.mxu1 %vm226_vm0, %v1744_v46 }
 0xea3   :  { %v1888_v48 = vpop.f32.mrf.mxu1 }
 0xea4   :  { %v1889_v49 = vadd.f32 %v4393_v14, %v1888_v48 }
 0xea6   :  { %vm1979_vm13 = vcmp.ge.f32.partialorder %v1889_v49, 0.0  ;;  %v2014_v50 = vmul.f32 %v4397_v16, %v1889_v49 }
 0xea8   :  { %v2046_v51 = vsel %vm1979_vm13, %v1889_v49, %v2014_v50  ;;  %v1232_v49 = vld [vmem:[%s5556_s2 + $0xb0] sm:$0xff] }
 0xea9   :  { %3419 = vmatmul.msk.f32.gmra.mxu3 %vm226_vm0, %v2046_v51  ;;  %3342 = vmatmul.msk.f32.gmra.mxu2 %vm226_vm0, %v1232_v49 }
 0xeab   :  { %v1891_v52 = vpop.f32.mrf.mxu1 }
 0xeac   :  { %v1892_v53 = vadd.f32 %v4393_v14, %v1891_v52  ;;  %v1200_v52 = vld [vmem:[%s5558_s10 + $0xb0] sm:$0xff] }
 0xead   :  { %3374 = vmatmul.msk.f32.gmra.mxu0 %vm226_vm0, %v1200_v52  ;;  %v1203_v52 = vld [vmem:[%s5558_s10 + $0xc8] sm:$0xff] }
 0xeae   :  { %vm1980_vm14 = vcmp.ge.f32.partialorder %v1892_v53, 0.0  ;;  %v2015_v54 = vmul.f32 %v4397_v16, %v1892_v53 }
 0xeb0   :  { %v2047_v55 = vsel %vm1980_vm14, %v1892_v53, %v2015_v54 }
 0xeb1   :  { %3420 = vmatmul.msk.f32.gmra.mxu3 %vm226_vm0, %v2047_v55  ;;  %v1406_v55 = vpop.f32.mrf.mxu2 }
 0xeb3   :  { %v1894_v56 = vpop.f32.mrf.mxu1 }
 0xeb4   :  { %v1895_v57 = vadd.f32 %v4393_v14, %v1894_v56  ;;  %v1615_v56 = vpop.f32.mrf.mxu0 }
 0xeb5   :  { %3375 = vmatmul.msk.f32.gmra.mxu0 %vm226_vm0, %v1201_v8  ;;  %v1205_v8 = vld [vmem:[%s5558_s10 + $0xd8] sm:$0xff] }
 0xeb6   :  { %vm1981_vm15 = vcmp.ge.f32.partialorder %v1895_v57, 0.0  ;;  %v2016_v58 = vmul.f32 %v4397_v16, %v1895_v57 }
 0xeb8   :  { %v2048_v59 = vsel %vm1981_vm15, %v1895_v57, %v2016_v58  ;;  %v1233_v57 = vld [vmem:[%s5556_s2 + $0xb8] sm:$0xff]  ;;  %v1616_v58 = vadd.f32 %v1615_v56, %v1406_v55 }
 0xeb9   :  { %3421 = vmatmul.msk.f32.gmra.mxu3 %vm226_vm0, %v2048_v59  ;;  %3343 = vmatmul.msk.f32.gmra.mxu2 %vm226_vm0, %v1233_v57 }
 0xeba   :  { %vm1678_vm11 = vcmp.ge.f32.partialorder %v1616_v58, 0.0 }
 0xebb   :  { %v1897_v60 = vpop.f32.mrf.mxu1 }
 0xebc   :  { %v1898_v61 = vadd.f32 %v4393_v14, %v1897_v60  ;;  %v1618_v24 = vpop.f32.mrf.mxu0 }
 0xebe   :  { %vm1982_vm1 = vcmp.ge.f32.partialorder %v1898_v61, 0.0  ;;  %v2017_v62 = vmul.f32 %v4397_v16, %v1898_v61 }
 0xec0   :  { %v2049_v0 = vsel %vm1982_vm1, %v1898_v61, %v2017_v62  ;;  %v1713_v62 = vmul.f32 %v4344_v11, %v1616_v58 }
 0xec1   :  { %3422 = vmatmul.msk.f32.gmra.mxu3 %vm226_vm0, %v2049_v0  ;;  %3344 = vmatmul.msk.f32.gmra.mxu2 %vm226_vm0, %v1234_v7 }
 0xec2   :  { %v1745_v1 = vsel %vm1678_vm11, %v1616_v58, %v1713_v62 }
 0xec3   :  { %v1900_v9 = vpop.f32.mrf.mxu1  ;;  %3401 = vmatmul.msk.f32.gmra.mxu1 %vm226_vm0, %v1745_v1  ;;  %v1204_v1 = vld [vmem:[%s5558_s10 + $0xd0] sm:$0xff] }
 0xec4   :  { %v1901_v10 = vadd.f32 %v4393_v14, %v1900_v9 }
 0xec6   :  { %vm1983_vm4 = vcmp.ge.f32.partialorder %v1901_v10, 0.0  ;;  %v2018_v15 = vmul.f32 %v4397_v16, %v1901_v10 }
 0xec7   :  { %v1621_v23 = vpop.f32.mrf.mxu0 }
 0xec8   :  { %v2050_v31 = vsel %vm1983_vm4, %v1901_v10, %v2018_v15  ;;  %v1202_v10 = vld [vmem:[%s5558_s10 + $0xc0] sm:$0xff] }
 0xec9   :  { %3423 = vmatmul.msk.f32.gmra.mxu3 %vm226_vm0, %v2050_v31  ;;  %3376 = vmatmul.msk.f32.gmra.mxu0 %vm226_vm0, %v1202_v10  ;;  %v1409_v31 = vpop.f32.mrf.mxu2 }
 0xecb   :  { %v1903_v17 = vpop.f32.mrf.mxu1 }
 0xecc   :  { %v1904_v20 = vadd.f32 %v4393_v14, %v1903_v17  ;;  %v1619_v17 = vadd.f32 %v1618_v24, %v1409_v31 }
 0xece   :  { %v2019_v21 = vmul.f32 %v4397_v16, %v1904_v20  ;;  %vm1984_vm5 = vcmp.ge.f32.partialorder %v1904_v20, 0.0  ;;  %vm1679_vm14 = vcmp.ge.f32.partialorder %v1619_v17, 0.0  ;;  %v1714_v19 = vmul.f32 %v4344_v11, %v1619_v17 }
 0xed0   :  { %v2051_v22 = vsel %vm1984_vm5, %v1904_v20, %v2019_v21  ;;  %v1746_v21 = vsel %vm1679_vm14, %v1619_v17, %v1714_v19 }
 0xed1   :  { %3424 = vmatmul.msk.f32.gmra.mxu3 %vm226_vm0, %v2051_v22  ;;  %3402 = vmatmul.msk.f32.gmra.mxu1 %vm226_vm0, %v1746_v21  ;;  %v1412_v22 = vpop.f32.mrf.mxu2 }
 0xed2   :  { %v1622_v25 = vadd.f32 %v1621_v23, %v1412_v22  ;;  %3377 = vmatmul.msk.f32.gmra.mxu0 %vm226_vm0, %v1203_v52 }
 0xed3   :  { %v1906_v39 = vpop.f32.mrf.mxu1 }
 0xed4   :  { %v1907_v41 = vadd.f32 %v4393_v14, %v1906_v39  ;;  %vm1680_vm15 = vcmp.ge.f32.partialorder %v1622_v25, 0.0  ;;  %v1715_v26 = vmul.f32 %v4344_v11, %v1622_v25 }
 0xed6   :  { %v2020_v44 = vmul.f32 %v4397_v16, %v1907_v41  ;;  %vm1985_vm9 = vcmp.ge.f32.partialorder %v1907_v41, 0.0 }
 0xed8   :  { %v2052_v47 = vsel %vm1985_vm9, %v1907_v41, %v2020_v44  ;;  %v1235_v44 = vld [vmem:[%s5556_s2 + $0xc8] sm:$0xff] }
 0xed9   :  { %3425 = vmatmul.msk.f32.gmra.mxu3 %vm226_vm0, %v2052_v47  ;;  %v1415_v43 = vpop.f32.mrf.mxu2  ;;  %3345 = vmatmul.msk.f32.gmra.mxu2 %vm226_vm0, %v1235_v44 }
 0xeda   :  { %3378 = vmatmul.msk.f32.gmra.mxu0 %vm226_vm0, %v1204_v1 }
 0xedb   :  { %v1909_v51 = vpop.f32.mrf.mxu1 }
 0xedc   :  { %v1910_v53 = vadd.f32 %v4393_v14, %v1909_v51 }
 0xede   :  { %v2021_v54 = vmul.f32 %v4397_v16, %v1910_v53  ;;  %vm1986_vm10 = vcmp.ge.f32.partialorder %v1910_v53, 0.0 }
 0xee0   :  { %v2053_v59 = vsel %vm1986_vm10, %v1910_v53, %v2021_v54 }
 0xee1   :  { %3426 = vmatmul.msk.f32.gmra.mxu3 %vm226_vm0, %v2053_v59  ;;  %v1418_v55 = vpop.f32.mrf.mxu2  ;;  %v1236_v59 = vld [vmem:[%s5556_s2 + $0xd0] sm:$0xff] }
 0xee2   :  { %3346 = vmatmul.msk.f32.gmra.mxu2 %vm226_vm0, %v1236_v59  ;;  %3379 = vmatmul.msk.f32.gmra.mxu0 %vm226_vm0, %v1205_v8  ;;  %v1240_v59 = vld [vmem:[%s5556_s2 + $0xf0] sm:$0xff] }
 0xee3   :  { %v1912_v63 = vpop.f32.mrf.mxu1 }
 0xee4   :  { %v1913_v0 = vadd.f32 %v4393_v14, %v1912_v63 }
 0xee6   :  { %v2022_v3 = vmul.f32 %v4397_v16, %v1913_v0  ;;  %vm1987_vm12 = vcmp.ge.f32.partialorder %v1913_v0, 0.0 }
 0xee8   :  { %v2054_v4 = vsel %vm1987_vm12, %v1913_v0, %v2022_v3 }
 0xee9   :  { %3427 = vmatmul.msk.f32.gmra.mxu3 %vm226_vm0, %v2054_v4 }
 0xeeb   :  { %v1915_v13 = vpop.f32.mrf.mxu1 }
 0xeec   :  { %v1916_v15 = vadd.f32 %v4393_v14, %v1915_v13 }
 0xeee   :  { %vm1988_vm13 = vcmp.ge.f32.partialorder %v1916_v15, 0.0  ;;  %v2023_v18 = vmul.f32 %v4397_v16, %v1916_v15 }
 0xef0   :  { %v2055_v20 = vsel %vm1988_vm13, %v1916_v15, %v2023_v18 }
 0xef1   :  { %3428 = vmatmul.msk.f32.gmra.mxu3 %vm226_vm0, %v2055_v20 }
 0xef3   :  { %v1918_v27 = vpop.f32.mrf.mxu1 }
 0xef4   :  { %v1919_v30 = vadd.f32 %v4393_v14, %v1918_v27 }
 0xef6   :  { %vm1989_vm1 = vcmp.ge.f32.partialorder %v1919_v30, 0.0 }
 0xefb   :  { %v1921_v38 = vpop.f32.mrf.mxu1 }
 0xefc   :  { %v1922_v39 = vadd.f32 %v4393_v14, %v1921_v38 }
 0xefe   :  { %vm1990_vm2 = vcmp.ge.f32.partialorder %v1922_v39, 0.0  ;;  %v2025_v40 = vmul.f32 %v4397_v16, %v1922_v39 }
 0xf0e   :  { %v1624_v41 = vpop.f32.mrf.mxu0 }
 0xf0f   :  { %v1625_v46 = vadd.f32 %v1624_v41, %v1415_v43 }
 0xf11   :  { %vm1681_vm3 = vcmp.ge.f32.partialorder %v1625_v46, 0.0 }
 0xf14   :  { %v2194_v32 = vpop.f32.mrf.mxu3 }
 0xf15   :  { %v4464_v33 = vadd.f32 %v4460_v29, %v2194_v32 }
 0xf16   :  { %v1627_v54 = vpop.f32.mrf.mxu0 }
 0xf17   :  { %5565 = vst [vmem:[#allocation38_spill] sm:$0xff] %v4464_v33  ;;  %2739 = vrot.lane.b32.xlu1 %v4464_v33, %s3833_s8  ;;  %v2323_v34 = vsel %vm2290_vm7, %v4464_v33, -inf  ;;  %v1628_v56 = vadd.f32 %v1627_v54, %v1418_v55  ;;  %v1924_v3 = vpop.f32.mrf.mxu1 }
 0xf18   :  { %2291 = vst.msk [vmem:[%s4086_s29] sm:$0xff] %vm2290_vm7, %v4464_v33  ;;  %2324 = vmax.xlane.f32.xlu0 %v2323_v34  ;;  %v1747_v34 = vsel %vm1680_vm15, %v1622_v25, %v1715_v26  ;;  %v1925_v4 = vadd.f32 %v4393_v14, %v1924_v3 }
 0xf19   :  { %3403 = vmatmul.msk.f32.gmra.mxu1 %vm226_vm0, %v1747_v34  ;;  %vm1682_vm4 = vcmp.ge.f32.partialorder %v1628_v56, 0.0 }
 0xf1a   :  { %vm1991_vm5 = vcmp.ge.f32.partialorder %v1925_v4, 0.0 }
 0xf1c   :  { %v2197_v35 = vpop.f32.mrf.mxu3 }
 0xf1d   :  { %v4474_v36 = vadd.f32 %v4460_v29, %v2197_v35  ;;  %v2024_v35 = vmul.f32 %v4397_v16, %v1919_v30 }
 0xf1f   :  { %2292 = vst.msk [vmem:[%s4086_s29 + $0x8] sm:$0xff] %vm2290_vm7, %v4474_v36  ;;  %v2326_v2 = vsel %vm2290_vm7, %v4474_v36, -inf  ;;  %v2056_v37 = vsel %vm1989_vm1, %v1919_v30, %v2024_v35  ;;  %v1238_v30 = vld [vmem:[%s5556_s2 + $0xe0] sm:$0xff] }
 0xf20   :  { %3429 = vmatmul.msk.f32.gmra.mxu3 %vm226_vm0, %v2056_v37 }
 0xf24   :  { %v2200_v42 = vpop.f32.mrf.mxu3 }
 0xf25   :  { %v4483_v45 = vadd.f32 %v4460_v29, %v2200_v42  ;;  %v2057_v42 = vsel %vm1990_vm2, %v1922_v39, %v2025_v40  ;;  %v1206_v40 = vld [vmem:[%s5558_s10 + $0xe0] sm:$0xff] }
 0xf26   :  { %3380 = vmatmul.msk.f32.gmra.mxu0 %vm226_vm0, %v1206_v40 }
 0xf27   :  { %2293 = vst.msk [vmem:[%s4086_s29 + $0x10] sm:$0xff] %vm2290_vm7, %v4483_v45  ;;  %2743 = vrot.lane.b32.xlu2 %v4483_v45, %s3833_s8  ;;  %v2329_v9 = vsel %vm2290_vm7, %v4483_v45, -inf }
 0xf28   :  { %3430 = vmatmul.msk.f32.gmra.mxu3 %vm226_vm0, %v2057_v42 }
 0xf2a   :  { %v1630_v17 = vpop.f32.mrf.mxu0 }
 0xf2c   :  { %2741 = vrot.lane.b32.xlu0 %v4474_v36, %s3833_s8  ;;  %v2203_v48 = vpop.f32.mrf.mxu3  ;;  %v1421_v31 = vpop.f32.mrf.mxu2 }
 0xf2d   :  { %v4496_v50 = vadd.f32 %v4460_v29, %v2203_v48  ;;  %v1716_v48 = vmul.f32 %v4344_v11, %v1625_v46  ;;  %v1631_v18 = vadd.f32 %v1630_v17, %v1421_v31 }
 0xf2f   :  { %2294 = vst.msk [vmem:[%s4086_s29 + $0x18] sm:$0xff] %vm2290_vm7, %v4496_v50  ;;  %v2332_v12 = vsel %vm2290_vm7, %v4496_v50, -inf  ;;  %v1748_v53 = vsel %vm1681_vm3, %v1625_v46, %v1716_v48  ;;  %v1718_v19 = vmul.f32 %v4344_v11, %v1631_v18  ;;  %vm1683_vm8 = vcmp.ge.f32.partialorder %v1631_v18, 0.0 }
 0xf30   :  { %3404 = vmatmul.msk.f32.gmra.mxu1 %vm226_vm0, %v1748_v53  ;;  %v1239_v53 = vld [vmem:[%s5556_s2 + $0xe8] sm:$0xff] }
 0xf31   :  { %v1750_v20 = vsel %vm1683_vm8, %v1631_v18, %v1718_v19 }
 0xf32   :  { %v1633_v37 = vpop.f32.mrf.mxu0 }
 0xf34   :  { %v2206_v60 = vpop.f32.mrf.mxu3 }
 0xf35   :  { %v4510_v61 = vadd.f32 %v4460_v29, %v2206_v60  ;;  %v1717_v60 = vmul.f32 %v4344_v11, %v1628_v56 }
 0xf37   :  { %2295 = vst.msk [vmem:[%s4086_s29 + $0x20] sm:$0xff] %vm2290_vm7, %v4510_v61  ;;  %v2335_v49 = vsel %vm2290_vm7, %v4510_v61, -inf  ;;  %v1749_v62 = vsel %vm1682_vm4, %v1628_v56, %v1717_v60  ;;  %v1207_v56 = vld [vmem:[%s5558_s10 + $0xe8] sm:$0xff] }
 0xf38   :  { %3405 = vmatmul.msk.f32.gmra.mxu1 %vm226_vm0, %v1749_v62  ;;  %3381 = vmatmul.msk.f32.gmra.mxu0 %vm226_vm0, %v1207_v56 }
 0xf3c   :  { %v2209_v5 = vpop.f32.mrf.mxu3  ;;  %v1424_v34 = vpop.f32.mrf.mxu2 }
 0xf3d   :  { %v4523_v6 = vadd.f32 %v4460_v29, %v2209_v5  ;;  %v2026_v5 = vmul.f32 %v4397_v16, %v1925_v4  ;;  %v1634_v39 = vadd.f32 %v1633_v37, %v1424_v34 }
 0xf3f   :  { %2296 = vst.msk [vmem:[%s4086_s29 + $0x28] sm:$0xff] %vm2290_vm7, %v4523_v6  ;;  %v2338_v63 = vsel %vm2290_vm7, %v4523_v6, -inf  ;;  %v2058_v7 = vsel %vm1991_vm5, %v1925_v4, %v2026_v5  ;;  %vm1684_vm10 = vcmp.ge.f32.partialorder %v1634_v39, 0.0  ;;  %v1719_v41 = vmul.f32 %v4344_v11, %v1634_v39 }
 0xf40   :  { %3431 = vmatmul.msk.f32.gmra.mxu3 %vm226_vm0, %v2058_v7  ;;  %3406 = vmatmul.msk.f32.gmra.mxu1 %vm226_vm0, %v1750_v20 }
 0xf41   :  { %2327 = vmax.xlane.f32.xlu1 %v2326_v2  ;;  %v1237_v2 = vld [vmem:[%s5556_s2 + $0xd8] sm:$0xff]  ;;  %v1751_v42 = vsel %vm1684_vm10, %v1634_v39, %v1719_v41 }
 0xf42   :  { %3347 = vmatmul.msk.f32.gmra.mxu2 %vm226_vm0, %v1237_v2  ;;  %v1208_v2 = vld [vmem:[%s5558_s10 + $0xf0] sm:$0xff] }
 0xf43   :  { %3382 = vmatmul.msk.f32.gmra.mxu0 %vm226_vm0, %v1208_v2 }
 0xf44   :  { %v2212_v28 = vpop.f32.mrf.mxu3  ;;  %v1427_v43 = vpop.f32.mrf.mxu2 }
 0xf45   :  { %v4552_v32 = vadd.f32 %v4460_v29, %v2212_v28 }
 0xf46   :  { %v1636_v46 = vpop.f32.mrf.mxu0 }
 0xf47   :  { %2297 = vst.msk [vmem:[%s4086_s29 + $0x30] sm:$0xff] %vm2290_vm7, %v4552_v32  ;;  %v2341_v0 = vsel %vm2290_vm7, %v4552_v32, -inf  ;;  %v1637_v48 = vadd.f32 %v1636_v46, %v1427_v43 }
 0xf48   :  { %3407 = vmatmul.msk.f32.gmra.mxu1 %vm226_vm0, %v1751_v42 }
 0xf49   :  { %vm1685_vm11 = vcmp.ge.f32.partialorder %v1637_v48, 0.0 }
 0xf4a   :  { %3348 = vmatmul.msk.f32.gmra.mxu2 %vm226_vm0, %v1238_v30 }
 0xf4c   :  { %v2215_v47 = vpop.f32.mrf.mxu3 }
 0xf4d   :  { %v4569_v51 = vadd.f32 %v4460_v29, %v2215_v47 }
 0xf4f   :  { %2298 = vst.msk [vmem:[%s4086_s29 + $0x38] sm:$0xff] %vm2290_vm7, %v4569_v51  ;;  %v2344_v28 = vsel %vm2290_vm7, %v4569_v51, -inf  ;;  %v1639_v7 = vpop.f32.mrf.mxu0 }
 0xf50   :  { %2330 = vmax.xlane.f32.xlu2 %v2329_v9  ;;  %v1927_v9 = vpop.f32.mrf.mxu1 }
 0xf51   :  { %v1928_v10 = vadd.f32 %v4393_v14, %v1927_v9 }
 0xf52   :  { %3349 = vmatmul.msk.f32.gmra.mxu2 %vm226_vm0, %v1239_v53 }
 0xf53   :  { %vm1992_vm6 = vcmp.ge.f32.partialorder %v1928_v10, 0.0 }
 0xf54   :  { %v2218_v57 = vpop.f32.mrf.mxu3 }
 0xf55   :  { %v4578_v58 = vadd.f32 %v4460_v29, %v2218_v57 }
 0xf56   :  { %2333 = vmax.xlane.f32.xlu0 %v2332_v12  ;;  %v2027_v12 = vmul.f32 %v4397_v16, %v1928_v10 }
 0xf57   :  { %2299 = vst.msk [vmem:[%s4086_s29 + $0x40] sm:$0xff] %vm2290_vm7, %v4578_v58  ;;  %v2347_v47 = vsel %vm2290_vm7, %v4578_v58, -inf  ;;  %v1642_v39 = vpop.f32.mrf.mxu0 }
 0xf58   :  { %v2059_v13 = vsel %vm1992_vm6, %v1928_v10, %v2027_v12  ;;  %v1930_v21 = vpop.f32.mrf.mxu1 }
 0xf59   :  { %3432 = vmatmul.msk.f32.gmra.mxu3 %vm226_vm0, %v2059_v13  ;;  %v1931_v22 = vadd.f32 %v4393_v14, %v1930_v21 }
 0xf5a   :  { %2745 = vrot.lane.b32.xlu1 %v4496_v50, %s3833_s8  ;;  %3350 = vmatmul.msk.f32.gmra.mxu2 %vm226_vm0, %v1240_v59 }
 0xf5b   :  { %vm1993_vm9 = vcmp.ge.f32.partialorder %v1931_v22, 0.0  ;;  %v2028_v26 = vmul.f32 %v4397_v16, %v1931_v22 }
 0xf5c   :  { %v2221_v15 = vpop.f32.mrf.mxu3 }
 0xf5d   :  { %v4610_v24 = vadd.f32 %v4460_v29, %v2221_v15  ;;  %v2060_v27 = vsel %vm1993_vm9, %v1931_v22, %v2028_v26  ;;  %v1430_v15 = vpop.f32.mrf.mxu2  ;;  %v1241_v26 = vld [vmem:[%s5556_s2 + $0xf8] sm:$0xff] }
 0xf5e   :  { %v1640_v31 = vadd.f32 %v1639_v7, %v1430_v15 }
 0xf5f   :  { %2300 = vst.msk [vmem:[%s4086_s29 + $0x48] sm:$0xff] %vm2290_vm7, %v4610_v24  ;;  %v2350_v44 = vsel %vm2290_vm7, %v4610_v24, -inf }
 0xf60   :  { %v1933_v54 = vpop.f32.mrf.mxu1  ;;  %vm1686_vm15 = vcmp.ge.f32.partialorder %v1640_v31, 0.0  ;;  %v1721_v18 = vmul.f32 %v4344_v11, %v1640_v31 }
 0xf61   :  { %3433 = vmatmul.msk.f32.gmra.mxu3 %vm226_vm0, %v2060_v27  ;;  %v1934_v55 = vadd.f32 %v4393_v14, %v1933_v54  ;;  %v1209_v27 = vld [vmem:[%s5558_s10 + $0xf8] sm:$0xff] }
 0xf62   :  { %v1753_v20 = vsel %vm1686_vm15, %v1640_v31, %v1721_v18  ;;  %3351 = vmatmul.msk.f32.gmra.mxu2 %vm226_vm0, %v1241_v26  ;;  %3383 = vmatmul.msk.f32.gmra.mxu0 %vm226_vm0, %v1209_v27 }
 0xf63   :  { %v2029_v57 = vmul.f32 %v4397_v16, %v1934_v55  ;;  %vm1994_vm12 = vcmp.ge.f32.partialorder %v1934_v55, 0.0 }
 0xf64   :  { %v2224_v23 = vpop.f32.mrf.mxu3 }
 0xf65   :  { %v4619_v25 = vadd.f32 %v4460_v29, %v2224_v23  ;;  %v2061_v62 = vsel %vm1994_vm12, %v1934_v55, %v2029_v57  ;;  %v1433_v37 = vpop.f32.mrf.mxu2 }
 0xf66   :  { %v1643_v40 = vadd.f32 %v1642_v39, %v1433_v37 }
 0xf67   :  { %2301 = vst.msk [vmem:[%s4086_s29 + $0x50] sm:$0xff] %vm2290_vm7, %v4619_v25  ;;  %v2353_v21 = vsel %vm2290_vm7, %v4619_v25, -inf }
 0xf68   :  { %2749 = vrot.lane.b32.xlu2 %v4523_v6, %s3833_s8  ;;  %vm1687_vm2 = vcmp.ge.f32.partialorder %v1643_v40, 0.0  ;;  %v1722_v41 = vmul.f32 %v4344_v11, %v1643_v40 }
 0xf69   :  { %3434 = vmatmul.msk.f32.gmra.mxu3 %vm226_vm0, %v2061_v62 }
 0xf6a   :  { %2747 = vrot.lane.b32.xlu0 %v4510_v61, %s3833_s8  ;;  %v1754_v42 = vsel %vm1687_vm2, %v1643_v40, %v1722_v41 }
 0xf6c   :  { %v2227_v35 = vpop.f32.mrf.mxu3 }
 0xf6d   :  { %v4631_v38 = vadd.f32 %v4460_v29, %v2227_v35 }
 0xf6f   :  { %2302 = vst.msk [vmem:[%s4086_s29 + $0x58] sm:$0xff] %vm2290_vm7, %v4631_v38  ;;  %v2356_v35 = vsel %vm2290_vm7, %v4631_v38, -inf }
 0xf74   :  { %v2230_v60 = vpop.f32.mrf.mxu3 }
 0xf84   :  { %2336 = vmax.xlane.f32.xlu1 %v2335_v49  ;;  %v1720_v49 = vmul.f32 %v4344_v11, %v1637_v48 }
 0xf86   :  { %v1752_v52 = vsel %vm1685_vm11, %v1637_v48, %v1720_v49 }
 0xf87   :  { %3408 = vmatmul.msk.f32.gmra.mxu1 %vm226_vm0, %v1752_v52 }
 0xf8f   :  { %3409 = vmatmul.msk.f32.gmra.mxu1 %vm226_vm0, %v1753_v20 }
 0xf91   :  { %2339 = vmax.xlane.f32.xlu2 %v2338_v63  ;;  %v4661_v63 = vadd.f32 %v4460_v29, %v2230_v60 }
 0xf93   :  { %2303 = vst.msk [vmem:[%s4086_s29 + $0x60] sm:$0xff] %vm2290_vm7, %v4661_v63 }
 0xf94   :  { %2342 = vmax.xlane.f32.xlu0 %v2341_v0 }
 0xf96   :  { %v1936_v0 = vpop.f32.mrf.mxu1 }
 0xf97   :  { %v1937_v1 = vadd.f32 %v4393_v14, %v1936_v0  ;;  %3410 = vmatmul.msk.f32.gmra.mxu1 %vm226_vm0, %v1754_v42 }
 0xf99   :  { %v2030_v3 = vmul.f32 %v4397_v16, %v1937_v1  ;;  %vm1995_vm13 = vcmp.ge.f32.partialorder %v1937_v1, 0.0 }
 0xf9b   :  { %v2062_v4 = vsel %vm1995_vm13, %v1937_v1, %v2030_v3 }
 0xf9c   :  { %3435 = vmatmul.msk.f32.gmra.mxu3 %vm226_vm0, %v2062_v4 }
 0xf9d   :  { %2751 = vrot.lane.b32.xlu1 %v4552_v32, %s3833_s8 }
 0xfa3   :  { %v2233_v5 = vpop.f32.mrf.mxu3 }
 0xfa4   :  { %v4673_v8 = vadd.f32 %v4460_v29, %v2233_v5  ;;  %v4738_v5 = vld [vmem:[%s5560_s0] ss:$0 sm:$0xff] }
 0xfa6   :  { %2304 = vst.msk [vmem:[%s4086_s29 + $0x68] sm:$0xff] %vm2290_vm7, %v4673_v8  ;;  %v2362_v2 = vsel %vm2290_vm7, %v4673_v8, -inf }
 0xfa8   :  { %2753 = vrot.lane.b32.xlu0 %v4569_v51, %s3833_s8 }
 0xfa9   :  { %2755 = vrot.lane.b32.xlu2 %v4578_v58, %s3833_s8 }
 0xfab   :  { %v2236_v10 = vpop.f32.mrf.mxu3 }
 0xfac   :  { %v4680_v13 = vadd.f32 %v4460_v29, %v2236_v10 }
 0xfad   :  { %v1939_v9 = vpop.f32.mrf.mxu1 }
 0xfae   :  { %v1940_v12 = vadd.f32 %v4393_v14, %v1939_v9  ;;  %2305 = vst.msk [vmem:[%s4086_s29 + $0x70] sm:$0xff] %vm2290_vm7, %v4680_v13  ;;  %v2365_v31 = vsel %vm2290_vm7, %v4680_v13, -inf }
 0xfb0   :  { %vm1996_vm14 = vcmp.ge.f32.partialorder %v1940_v12, 0.0  ;;  %v2031_v17 = vmul.f32 %v4397_v16, %v1940_v12 }
 0xfb2   :  { %v2063_v19 = vsel %vm1996_vm14, %v1940_v12, %v2031_v17 }
 0xfb3   :  { %3436 = vmatmul.msk.f32.gmra.mxu3 %vm226_vm0, %v2063_v19 }
 0xfb5   :  { %v1942_v22 = vpop.f32.mrf.mxu1 }
 0xfb6   :  { %v1943_v23 = vadd.f32 %v4393_v14, %v1942_v22 }
 0xfb8   :  { %vm1997_vm1 = vcmp.ge.f32.partialorder %v1943_v23, 0.0  ;;  %v2032_v30 = vmul.f32 %v4397_v16, %v1943_v23 }
 0xfba   :  { %v2064_v34 = vsel %vm1997_vm1, %v1943_v23, %v2032_v30  ;;  %v4760_v30 = vpop.permute.xlu1 %2739 }
 0xfbb   :  { %3437 = vmatmul.msk.f32.gmra.mxu3 %vm226_vm0, %v2064_v34  ;;  %5568 = vst [vmem:[#allocation41_spill] sm:$0xff] %v4760_v30 }
 0xfbd   :  { %v1945_v54 = vpop.f32.mrf.mxu1 }
 0xfbe   :  { %v1946_v55 = vadd.f32 %v4393_v14, %v1945_v54 }
 0xfc0   :  { %vm1998_vm4 = vcmp.ge.f32.partialorder %v1946_v55, 0.0  ;;  %v2033_v56 = vmul.f32 %v4397_v16, %v1946_v55 }
 0xfc2   :  { %v2065_v57 = vsel %vm1998_vm4, %v1946_v55, %v2033_v56 }
 0xfc3   :  { %v2239_v49 = vpop.f32.mrf.mxu3  ;;  %3438 = vmatmul.msk.f32.gmra.mxu3 %vm226_vm0, %v2065_v57 }
 0xfc4   :  { %v4711_v52 = vadd.f32 %v4460_v29, %v2239_v49 }
 0xfc5   :  { %v1436_v43 = vpop.f32.mrf.mxu2  ;;  %v1948_v3 = vpop.f32.mrf.mxu1 }
 0xfc6   :  { %2306 = vst.msk [vmem:[%s4086_s29 + $0x78] sm:$0xff] %vm2290_vm7, %v4711_v52  ;;  %v2368_v4 = vsel %vm2290_vm7, %v4711_v52, -inf  ;;  %v1949_v9 = vadd.f32 %v4393_v14, %v1948_v3 }
 0xfc7   :  { %2345 = vmax.xlane.f32.xlu1 %v2344_v28  ;;  %v2359_v28 = vsel %vm2290_vm7, %v4661_v63, -inf }
 0xfc8   :  { %vm1999_vm6 = vcmp.ge.f32.partialorder %v1949_v9, 0.0  ;;  %v2034_v10 = vmul.f32 %v4397_v16, %v1949_v9 }
 0xfca   :  { %v2066_v15 = vsel %vm1999_vm6, %v1949_v9, %v2034_v10 }
 0xfcb   :  { %3439 = vmatmul.msk.f32.gmra.mxu3 %vm226_vm0, %v2066_v15 }
 0xfcd   :  { %v1439_v0 = vpop.f32.mrf.mxu2 }
 0xfd2   :  { %2348 = vmax.xlane.f32.xlu2 %v2347_v47  ;;  %2351 = vmax.xlane.f32.xlu0 %v2350_v44  ;;  %v1645_v44 = vpop.f32.mrf.mxu0 }
 0xfd3   :  { %v1646_v46 = vadd.f32 %v1645_v44, %v1436_v43  ;;  %v2328_v43 = vpop.xlane.xlu1 %2327 }
 0xfd5   :  { %vm1688_vm3 = vcmp.ge.f32.partialorder %v1646_v46, 0.0  ;;  %v1723_v47 = vmul.f32 %v4344_v11, %v1646_v46  ;;  %v1442_v22 = vpop.f32.mrf.mxu2 }
 0xfd7   :  { %v1755_v48 = vsel %vm1688_vm3, %v1646_v46, %v1723_v47  ;;  %v2420_v46 = vsub.f32 %v4474_v36, %v2328_v43 }
 0xfd8   :  { %3411 = vmatmul.msk.f32.gmra.mxu1 %vm226_vm0, %v1755_v48  ;;  %v4774_v48 = vpop.permute.xlu2 %2743 }
 0xfd9   :  { %v2453_v49 = vmul.f32 1.442695, %v2420_v46 }
 0xfda   :  { %v1648_v60 = vpop.f32.mrf.mxu0 }
 0xfdb   :  { %v1649_v1 = vadd.f32 %v1648_v60, %v1439_v0  ;;  %3555 = vpow2.f32 %v2453_v49  ;;  %v4832_v49 = vpop.permute.xlu1 %2745 }
 0xfdc   :  { %v2242_v11 = vpop.f32.mrf.mxu3 }
 0xfdd   :  { %v4719_v53 = vadd.f32 %v4460_v29, %v2242_v11  ;;  %vm1689_vm5 = vcmp.ge.f32.partialorder %v1649_v1, 0.0  ;;  %v1724_v7 = vmul.f32 %v4738_v5, %v1649_v1  ;;  %v1445_v34 = vpop.f32.mrf.mxu2  ;;  %v2325_v11 = vpop.xlane.xlu0 %2324 }
 0xfde   :  { %v2419_v54 = vsub.f32 %v4464_v33, %v2325_v11  ;;  %v4947_v33 = vld [vmem:[%s5564_s3] ss:$0 sm:$0xff] }
 0xfdf   :  { %5566 = vst [vmem:[#allocation39_spill] sm:$0xff] %v4719_v53  ;;  %v1756_v12 = vsel %vm1689_vm5, %v1649_v1, %v1724_v7  ;;  %v2371_v17 = vsel %vm2290_vm7, %v4719_v53, -inf }
 0xfe0   :  { %2757 = vrot.lane.b32.xlu1 %v4610_v24, %s3833_s8  ;;  %2307 = vst.msk [vmem:[%s4086_s29 + $0x80] sm:$0xff] %vm2290_vm7, %v4719_v53  ;;  %3412 = vmatmul.msk.f32.gmra.mxu1 %vm226_vm0, %v1756_v12  ;;  %v2331_v55 = vpop.xlane.xlu2 %2330 }
 0xfe1   :  { %v2421_v56 = vsub.f32 %v4483_v45, %v2331_v55  ;;  %v4782_v0 = vpop.eup %3555 }
 0xfe2   :  { %v1651_v23 = vpop.f32.mrf.mxu0  ;;  %v2518_v3 = vsel %vm2290_vm7, %v4782_v0, 0.0 }
 0xfe3   :  { %v1652_v26 = vadd.f32 %v1651_v23, %v1442_v22  ;;  %v4813_v23 = vld [vmem:[%s5562_s9] ss:$0 sm:$0xff] }
 0xfe4   :  { %v2245_v59 = vpop.f32.mrf.mxu3 }
 0xfe5   :  { %v4728_v62 = vadd.f32 %v4460_v29, %v2245_v59  ;;  %vm1690_vm9 = vcmp.ge.f32.partialorder %v1652_v26, 0.0  ;;  %v1725_v27 = vmul.f32 %v4738_v5, %v1652_v26  ;;  %v2451_v59 = vmul.f32 1.442695, %v2419_v54 }
 0xfe6   :  { %2759 = vrot.lane.b32.xlu0 %v4619_v25, %s3833_s8 }
 0xfe7   :  { %5567 = vst [vmem:[#allocation40_spill] sm:$0xff] %v4728_v62  ;;  %3557 = vpow2.f32 %v2451_v59 }
 0xfe8   :  { %2308 = vst.msk [vmem:[%s4086_s29 + $0x88] sm:$0xff] %vm2290_vm7, %v4728_v62  ;;  %v4838_v54 = vpop.permute.xlu2 %2749 }
 0xfea   :  { %2761 = vrot.lane.b32.xlu2 %v4631_v38, %s3833_s8 }
 0xfec   :  { %v2248_v39 = vpop.f32.mrf.mxu3 }
 0xfed   :  { %v4763_v40 = vadd.f32 %v4460_v29, %v2248_v39  ;;  %v4794_v12 = vpop.eup %3557 }
 0xfef   :  { %5569 = vst [vmem:[#allocation42_spill] sm:$0xff] %v4763_v40  ;;  %v2377_v15 = vsel %vm2290_vm7, %v4763_v40, -inf }
 0xff0   :  { %2309 = vst.msk [vmem:[%s4086_s29 + $0x90] sm:$0xff] %vm2290_vm7, %v4763_v40 }
 0xff7   :  { %v2337_v55 = vpop.xlane.xlu1 %2336 }
0x1004   :  { %v1951_v18 = vpop.f32.mrf.mxu1  ;;  %v2340_v59 = vpop.xlane.xlu2 %2339 }
0x1005   :  { %v1952_v19 = vadd.f32 %v4393_v14, %v1951_v18 }
0x1007   :  { %vm2000_vm8 = vcmp.ge.f32.partialorder %v1952_v19, 0.0  ;;  %v2035_v20 = vmul.f32 %v4397_v16, %v1952_v19 }
0x100a   :  { %2354 = vmax.xlane.f32.xlu1 %v2353_v21  ;;  %v2067_v21 = vsel %vm2000_vm8, %v1952_v19, %v2035_v20  ;;  %v2515_v19 = vsel %vm2290_vm7, %v4794_v12, 0.0 }
0x100b   :  { %3440 = vmatmul.msk.f32.gmra.mxu3 %vm226_vm0, %v2067_v21 }
0x100c   :  { %v1954_v57 = vpop.f32.mrf.mxu1 }
0x100d   :  { %v1955_v60 = vadd.f32 %v4393_v14, %v1954_v57  ;;  %v1448_v14 = vpop.f32.mrf.mxu2  ;;  %v2423_v57 = vsub.f32 %v4510_v61, %v2337_v55 }
0x100f   :  { %vm2001_vm11 = vcmp.ge.f32.partialorder %v1955_v60, 0.0  ;;  %v2036_v1 = vmul.f32 %v4397_v16, %v1955_v60 }
0x1010   :  { %2360 = vmax.xlane.f32.xlu0 %v2359_v28  ;;  %v1757_v28 = vsel %vm1690_vm9, %v1652_v26, %v1725_v27  ;;  %v4817_v27 = vld [vmem:[%s5563_s21] ss:$0 sm:$0xff] }
0x1011   :  { %3413 = vmatmul.msk.f32.gmra.mxu1 %vm226_vm0, %v1757_v28  ;;  %v2068_v7 = vsel %vm2001_vm11, %v1955_v60, %v2036_v1  ;;  %v2459_v60 = vmul.f32 1.442695, %v2423_v57 }
0x1013   :  { %2357 = vmax.xlane.f32.xlu2 %v2356_v35  ;;  %v1654_v35 = vpop.f32.mrf.mxu0  ;;  %3441 = vmatmul.msk.f32.gmra.mxu3 %vm226_vm0, %v2068_v7  ;;  %v4855_v7 = vpop.permute.xlu2 %2755 }
0x1014   :  { %v1655_v37 = vadd.f32 %v1654_v35, %v1445_v34  ;;  %v1957_v22 = vpop.f32.mrf.mxu1  ;;  %v2374_v34 = vsel %vm2290_vm7, %v4728_v62, -inf }
0x1015   :  { %v1958_v26 = vadd.f32 %v4813_v23, %v1957_v22 }
0x1016   :  { %vm1691_vm10 = vcmp.ge.f32.partialorder %v1655_v37, 0.0  ;;  %v1726_v41 = vmul.f32 %v4738_v5, %v1655_v37 }
0x1017   :  { %vm2002_vm13 = vcmp.ge.f32.partialorder %v1958_v26, 0.0  ;;  %v2037_v28 = vmul.f32 %v4817_v27, %v1958_v26 }
0x1018   :  { %v1758_v42 = vsel %vm1691_vm10, %v1655_v37, %v1726_v41 }
0x1019   :  { %3414 = vmatmul.msk.f32.gmra.mxu1 %vm226_vm0, %v1758_v42  ;;  %v2069_v35 = vsel %vm2002_vm13, %v1958_v26, %v2037_v28 }
0x101b   :  { %v1657_v10 = vpop.f32.mrf.mxu0  ;;  %3442 = vmatmul.msk.f32.gmra.mxu3 %vm226_vm0, %v2069_v35 }
0x101c   :  { %v1658_v16 = vadd.f32 %v1657_v10, %v1448_v14 }
0x101e   :  { %vm1692_vm12 = vcmp.ge.f32.partialorder %v1658_v16, 0.0 }
0x101f   :  { %v2251_v44 = vpop.f32.mrf.mxu3 }
0x1020   :  { %v4772_v47 = vadd.f32 %v4460_v29, %v2251_v44  ;;  %v4828_v44 = vpop.permute.xlu0 %2741 }
0x1022   :  { %5570 = vst [vmem:[#allocation43_spill] sm:$0xff] %v4772_v47  ;;  %v2380_v37 = vsel %vm2290_vm7, %v4772_v47, -inf }
0x1023   :  { %2765 = vrot.lane.b32.xlu1 %v4673_v8, %s3833_s8  ;;  %2310 = vst.msk [vmem:[%s4086_s29 + $0x98] sm:$0xff] %vm2290_vm7, %v4772_v47 }
0x1024   :  { %2767 = vrot.lane.b32.xlu0 %v4680_v13, %s3833_s8 }
0x1028   :  { %v2334_v46 = vpop.xlane.xlu0 %2333 }
0x1029   :  { %v2422_v10 = vsub.f32 %v4496_v50, %v2334_v46 }
0x102b   :  { %2763 = vrot.lane.b32.xlu2 %v4661_v63, %s3833_s8 }
0x1030   :  { %v4836_v11 = vpop.permute.xlu0 %2747 }
0x1045   :  { %v4869_v26 = vpop.xlane.xlu2 %2348 }
0x104d   :  { %2363 = vmax.xlane.f32.xlu1 %v2362_v2  ;;  %v2455_v2 = vmul.f32 1.442695, %v2421_v56  ;;  %v4842_v56 = vpop.xlane.xlu0 %2342  ;;  %v4886_v46 = vpop.permute.xlu2 %2761 }
0x104e   :  { %2369 = vmax.xlane.f32.xlu0 %v2368_v4  ;;  %v2254_v4 = vpop.f32.mrf.mxu3 }
0x104f   :  { %v4788_v9 = vadd.f32 %v4460_v29, %v2254_v4  ;;  %3559 = vpow2.f32 %v2455_v2  ;;  %v4853_v4 = vpop.permute.xlu1 %2751 }
0x1050   :  { %3561 = vpow2.f32 %v2459_v60 }
0x1051   :  { %2311 = vst.msk [vmem:[%s4086_s29 + $0xa0] sm:$0xff] %vm2290_vm7, %v4788_v9 }
0x1054   :  { %2366 = vmax.xlane.f32.xlu2 %v2365_v31  ;;  %v1727_v31 = vmul.f32 %v4738_v5, %v1658_v16 }
0x1055   :  { %2372 = vmax.xlane.f32.xlu1 %v2371_v17  ;;  %v4799_v18 = vpop.eup %3559  ;;  %v1960_v39 = vpop.f32.mrf.mxu1 }
0x1056   :  { %v2257_v17 = vpop.f32.mrf.mxu3  ;;  %v1759_v21 = vsel %vm1692_vm12, %v1658_v16, %v1727_v31  ;;  %v2521_v5 = vsel %vm2290_vm7, %v4799_v18, 0.0  ;;  %v1961_v41 = vadd.f32 %v4813_v23, %v1960_v39  ;;  %v4858_v14 = vpop.eup %3561 }
0x1057   :  { %v4804_v20 = vadd.f32 %v4460_v29, %v2257_v17  ;;  %3415 = vmatmul.msk.f32.gmra.mxu1 %vm226_vm0, %v1759_v21  ;;  %v2457_v17 = vmul.f32 1.442695, %v2422_v10  ;;  %v4864_v21 = vpop.xlane.xlu1 %2345 }
0x1058   :  { %vm2003_vm14 = vcmp.ge.f32.partialorder %v1961_v41, 0.0  ;;  %v2038_v42 = vmul.f32 %v4817_v27, %v1961_v41 }
0x1059   :  { %2312 = vst.msk [vmem:[%s4086_s29 + $0xa8] sm:$0xff] %vm2290_vm7, %v4804_v20  ;;  %3563 = vpow2.f32 %v2457_v17 }
0x105a   :  { %v2070_v43 = vsel %vm2003_vm14, %v1961_v41, %v2038_v42  ;;  %v2386_v42 = vsel %vm2290_vm7, %v4804_v20, -inf }
0x105b   :  { %3443 = vmatmul.msk.f32.gmra.mxu3 %vm226_vm0, %v2070_v43 }
0x105d   :  { %v1963_v16 = vpop.f32.mrf.mxu1 }
0x105e   :  { %v2260_v1 = vpop.f32.mrf.mxu3  ;;  %v1964_v31 = vadd.f32 %v4813_v23, %v1963_v16 }
0x105f   :  { %v4846_v2 = vadd.f32 %v4460_v29, %v2260_v1  ;;  %v4880_v41 = vpop.permute.xlu1 %2757  ;;  %v4884_v43 = vpop.eup %3563 }
0x1060   :  { %vm2004_vm15 = vcmp.ge.f32.partialorder %v1964_v31, 0.0  ;;  %v2039_v22 = vmul.f32 %v4817_v27, %v1964_v31  ;;  %v2524_v55 = vsel %vm2290_vm7, %v4884_v43, 0.0 }
0x1061   :  { %2313 = vst.msk [vmem:[%s4086_s29 + $0xb0] sm:$0xff] %vm2290_vm7, %v4846_v2 }
0x1062   :  { %2771 = vrot.lane.b32.xlu0 %v4719_v53, %s3833_s8  ;;  %v2071_v28 = vsel %vm2004_vm15, %v1964_v31, %v2039_v22 }
0x1063   :  { %3444 = vmatmul.msk.f32.gmra.mxu3 %vm226_vm0, %v2071_v28 }
0x1066   :  { %v2263_v35 = vpop.f32.mrf.mxu3 }
0x106c   :  { %2769 = vrot.lane.b32.xlu2 %v4711_v52, %s3833_s8 }
0x106e   :  { %2773 = vrot.lane.b32.xlu1 %v4728_v62, %s3833_s8 }
0x107d   :  { %v4897_v10 = vpop.xlane.xlu1 %2354 }
0x1086   :  { %v4904_v31 = vpop.xlane.xlu2 %2357 }
0x108c   :  { %2519 = vadd.xlane.f32.xlu0 %v2518_v3  ;;  %v4848_v3 = vpop.permute.xlu0 %2753 }
0x108e   :  { %v2266_v57 = vpop.f32.mrf.mxu3  ;;  %v4913_v28 = vpop.permute.xlu2 %2763 }
0x108f   :  { %v4895_v1 = vadd.f32 %v4460_v29, %v2266_v57 }
0x1091   :  { %2315 = vst.msk [vmem:[%s4086_s29 + $0xc0] sm:$0xff] %vm2290_vm7, %v4895_v1 }
0x1094   :  { %2378 = vmax.xlane.f32.xlu0 %v2377_v15  ;;  %v4860_v15 = vpop.xlane.xlu0 %2351 }
0x1095   :  { %2516 = vadd.xlane.f32.xlu2 %v2515_v19  ;;  %v2424_v19 = vsub.f32 %v4523_v6, %v2340_v59 }
0x1098   :  { %2522 = vadd.xlane.f32.xlu1 %v2521_v5  ;;  %v2527_v5 = vsel %vm2290_vm7, %v4858_v14, 0.0 }
0x109c   :  { %v4875_v39 = vpop.permute.xlu0 %2759 }
0x109d   :  { %2375 = vmax.xlane.f32.xlu2 %v2374_v34  ;;  %v2461_v34 = vmul.f32 1.442695, %v2424_v19  ;;  %v4908_v19 = vpop.permute.xlu1 %2765 }
0x109f   :  { %3565 = vpow2.f32 %v2461_v34 }
0x10a0   :  { %2381 = vmax.xlane.f32.xlu1 %v2380_v37  ;;  %v4873_v37 = vadd.f32 %v4460_v29, %v2263_v35  ;;  %v1966_v29 = vpop.f32.mrf.mxu1 }
0x10a1   :  { %v1967_v22 = vadd.f32 %v4813_v23, %v1966_v29 }
0x10a2   :  { %2314 = vst.msk [vmem:[%s4086_s29 + $0xb8] sm:$0xff] %vm2290_vm7, %v4873_v37 }
0x10a3   :  { %v2040_v34 = vmul.f32 %v4817_v27, %v1967_v22  ;;  %vm2005_vm1 = vcmp.ge.f32.partialorder %v1967_v22, 0.0 }
0x10a4   :  { %v4892_v60 = vpop.xlane.xlu0 %2360 }
0x10a5   :  { %v4890_v59 = vpop.eup %3565 }
0x10a6   :  { %v2530_v16 = vsel %vm2290_vm7, %v4890_v59, 0.0 }
0x10a8   :  { %2777 = vrot.lane.b32.xlu0 %v4772_v47, %s3833_s8  ;;  %v1969_v57 = vpop.f32.mrf.mxu1 }
0x10ac   :  { %v4906_v17 = vpop.permute.xlu0 %2767 }
0x10b5   :  { %2775 = vrot.lane.b32.xlu2 %v4763_v40, %s3833_s8 }
0x10b9   :  { %2781 = vrot.lane.b32.xlu1 %v4804_v20, %s3833_s8 }
0x10c1   :  { %v4918_v35 = vpop.xlane.xlu0 %2369 }
0x10c2   :  { %5571 = vst [vmem:[#allocation44_spill] sm:$0xff] %v4918_v35 }
0x10d2   :  { %2528 = vadd.xlane.f32.xlu0 %v2527_v5  ;;  %v2389_v5 = vsel %vm2290_vm7, %v4846_v2, -inf }
0x10d4   :  { %v4929_v53 = vpop.permute.xlu0 %2771 }
0x10d5   :  { %5572 = vst [vmem:[#allocation45_spill] sm:$0xff] %v4929_v53  ;;  %v2426_v53 = vsub.f32 %v4569_v51, %v4864_v21 }
0x10da   :  { %2387 = vmax.xlane.f32.xlu0 %v2386_v42  ;;  %v2072_v42 = vsel %vm2005_vm1, %v1967_v22, %v2040_v34 }
0x10db   :  { %3445 = vmatmul.msk.f32.gmra.mxu3 %vm226_vm0, %v2072_v42 }
0x10de   :  { %2525 = vadd.xlane.f32.xlu2 %v2524_v55  ;;  %v4920_v55 = vpop.xlane.xlu1 %2363 }
0x10e3   :  { %2531 = vadd.xlane.f32.xlu1 %v2530_v16  ;;  %v1970_v16 = vadd.f32 %v4813_v23, %v1969_v57 }
0x10e5   :  { %vm2006_vm2 = vcmp.ge.f32.partialorder %v1970_v16, 0.0  ;;  %v2041_v29 = vmul.f32 %v4817_v27, %v1970_v16 }
0x10e6   :  { %v4932_v22 = vpop.xlane.xlu1 %2372 }
0x10e7   :  { %v2073_v35 = vsel %vm2006_vm2, %v1970_v16, %v2041_v29  ;;  %5573 = vst [vmem:[#allocation46_spill] sm:$0xff] %v4932_v22  ;;  %v2465_v29 = vmul.f32 1.442695, %v2426_v53 }
0x10e8   :  { %3446 = vmatmul.msk.f32.gmra.mxu3 %vm226_vm0, %v2073_v35 }
0x10eb   :  { %2390 = vmax.xlane.f32.xlu1 %v2389_v5  ;;  %v4924_v5 = vpop.xlane.xlu2 %2366 }
0x10ee   :  { %2783 = vrot.lane.b32.xlu0 %v4846_v2, %s3833_s8  ;;  %v4936_v57 = vpop.permute.xlu1 %2773 }
0x10ef   :  { %5574 = vst [vmem:[#allocation47_spill] sm:$0xff] %v4936_v57  ;;  %v2269_v57 = vpop.f32.mrf.mxu3 }
0x10f0   :  { %v4950_v21 = vadd.f32 %v4947_v33, %v2269_v57 }
0x10f2   :  { %2316 = vst.msk [vmem:[%s4086_s29 + $0xc8] sm:$0xff] %vm2290_vm7, %v4950_v21 }
0x10f3   :  { %v4934_v42 = vpop.permute.xlu2 %2769 }
0x10f6   :  { %2779 = vrot.lane.b32.xlu2 %v4788_v9, %s3833_s8 }
0x10ff   :  { %v2520_v34 = vpop.xlane.xlu0 %2519 }
0x1100   :  { %3567 = vrcp.f32 %v2520_v34 }
0x1104   :  { %2787 = vrot.lane.b32.xlu1 %v4895_v1, %s3833_s8 }
0x1106   :  { %v3568_v62 = vpop.eup %3567 }
0x1107   :  { %v2644_v35 = vmul.f32 %v3568_v62, %v4782_v0 }
0x1108   :  { %v2517_v16 = vpop.xlane.xlu2 %2516 }
0x1109   :  { %2676 = vst.msk [vmem:[%s4091_s25 + $0x8] sm:$0xff] %vm2290_vm7, %v2644_v35  ;;  %3569 = vrcp.f32 %v2517_v16  ;;  %v1972_v35 = vpop.f32.mrf.mxu1  ;;  %v2425_v16 = vsub.f32 %v4552_v32, %v4842_v56  ;;  %v2395_v56 = vsel %vm2290_vm7, %v4895_v1, -inf }
0x110b   :  { %v2523_v34 = vpop.xlane.xlu1 %2522  ;;  %v2463_v57 = vmul.f32 1.442695, %v2425_v16 }
0x110c   :  { %3571 = vrcp.f32 %v2523_v34 }
0x110d   :  { %3573 = vpow2.f32 %v2465_v29 }
0x110e   :  { %3575 = vpow2.f32 %v2463_v57  ;;  %v2398_v57 = vsel %vm2290_vm7, %v4950_v21, -inf }
0x110f   :  { %v3570_v22 = vpop.eup %3569 }
0x1110   :  { %v2643_v47 = vmul.f32 %v3570_v22, %v4794_v12  ;;  %v1973_v12 = vadd.f32 %v4813_v23, %v1972_v35  ;;  %v2383_v23 = vsel %vm2290_vm7, %v4788_v9, -inf }
0x1112   :  { %2675 = vst.msk [vmem:[%s4091_s25] sm:$0xff] %vm2290_vm7, %v2643_v47  ;;  %v3572_v62 = vpop.eup %3571  ;;  %vm2007_vm3 = vcmp.ge.f32.partialorder %v1973_v12, 0.0  ;;  %v2042_v47 = vmul.f32 %v4817_v27, %v1973_v12  ;;  %v2272_v27 = vpop.f32.mrf.mxu3 }
0x1113   :  { %v4957_v53 = vpop.eup %3573  ;;  %v2645_v0 = vmul.f32 %v3572_v62, %v4799_v18  ;;  %v2427_v18 = vsub.f32 %v4578_v58, %v4869_v26  ;;  %v4976_v62 = vadd.f32 %v4947_v33, %v2272_v27 }
0x1114   :  { %v2536_v22 = vsel %vm2290_vm7, %v4957_v53, 0.0  ;;  %v2074_v29 = vsel %vm2007_vm3, %v1973_v12, %v2042_v47  ;;  %v4997_v47 = vpop.xlane.xlu0 %2378 }
0x1115   :  { %2677 = vst.msk [vmem:[%s4091_s25 + $0x10] sm:$0xff] %vm2290_vm7, %v2645_v0  ;;  %3447 = vmatmul.msk.f32.gmra.mxu3 %vm226_vm0, %v2074_v29  ;;  %v2467_v34 = vmul.f32 1.442695, %v2427_v18  ;;  %v4978_v0 = vpop.eup %3575  ;;  %v5003_v18 = vpop.xlane.xlu2 %2375 }
0x1116   :  { %2317 = vst.msk [vmem:[%s4086_s29 + $0xd0] sm:$0xff] %vm2290_vm7, %v4976_v62  ;;  %v2533_v26 = vsel %vm2290_vm7, %v4978_v0, 0.0 }
0x1117   :  { %3577 = vpow2.f32 %v2467_v34  ;;  %5575 = vst [vmem:[#allocation48_spill] sm:$0xff] %v4997_v47 }
0x1118   :  { %2537 = vadd.xlane.f32.xlu0 %v2536_v22  ;;  %5577 = vst [vmem:[#allocation50_spill] sm:$0xff] %v5003_v18 }
0x111a   :  { %v2275_v35 = vpop.f32.mrf.mxu3 }
0x111b   :  { %v4988_v12 = vadd.f32 %v4947_v33, %v2275_v35 }
0x111c   :  { %v5001_v29 = vpop.permute.xlu0 %2777 }
0x111d   :  { %v4985_v16 = vpop.eup %3577  ;;  %2318 = vst.msk [vmem:[%s4086_s29 + $0xd8] sm:$0xff] %vm2290_vm7, %v4988_v12  ;;  %v5009_v34 = vpop.permute.xlu2 %2775 }
0x111e   :  { %v2539_v22 = vsel %vm2290_vm7, %v4985_v16, 0.0  ;;  %5576 = vst [vmem:[#allocation49_spill] sm:$0xff] %v5001_v29  ;;  %v2432_v29 = vsub.f32 %v4673_v8, %v4920_v55 }
0x111f   :  { %2384 = vmax.xlane.f32.xlu2 %v2383_v23  ;;  %5579 = vst [vmem:[#allocation52_spill] sm:$0xff] %v5009_v34 }
0x1120   :  { %2396 = vmax.xlane.f32.xlu0 %v2395_v56  ;;  %v5007_v56 = vpop.xlane.xlu1 %2381  ;;  %v2477_v40 = vmul.f32 1.442695, %v2432_v29 }
0x1121   :  { %5578 = vst [vmem:[#allocation51_spill] sm:$0xff] %v5007_v56 }
0x1122   :  { %v2278_v18 = vpop.f32.mrf.mxu3 }
0x1123   :  { %v5021_v56 = vadd.f32 %v4947_v33, %v2278_v18 }
0x1125   :  { %2319 = vst.msk [vmem:[%s4086_s29 + $0xe0] sm:$0xff] %vm2290_vm7, %v5021_v56 }
0x1127   :  { %2534 = vadd.xlane.f32.xlu2 %v2533_v26  ;;  %v2429_v26 = vsub.f32 %v4619_v25, %v4897_v10 }
0x112e   :  { %2540 = vadd.xlane.f32.xlu1 %v2539_v22  ;;  %v5014_v22 = vpop.permute.xlu1 %2781 }
0x1134   :  { %2789 = vrot.lane.b32.xlu0 %v4950_v21, %s3833_s8 }
0x1136   :  { %2399 = vmax.xlane.f32.xlu1 %v2398_v57  ;;  %v2471_v57 = vmul.f32 1.442695, %v2429_v26 }
0x113f   :  { %2785 = vrot.lane.b32.xlu2 %v4873_v37, %s3833_s8 }
0x1145   :  { %v2529_v23 = vpop.xlane.xlu0 %2528 }
0x1146   :  { %3579 = vrcp.f32 %v2529_v23 }
0x114c   :  { %v3580_v27 = vpop.eup %3579 }
0x114d   :  { %v2647_v35 = vmul.f32 %v3580_v27, %v4858_v14 }
0x114f   :  { %2679 = vst.msk [vmem:[%s4091_s25 + $0x20] sm:$0xff] %vm2290_vm7, %v2647_v35  ;;  %2793 = vrot.lane.b32.xlu1 %v4988_v12, %s3833_s8  ;;  %v2428_v35 = vsub.f32 %v4610_v24, %v4860_v15 }
0x1151   :  { %v2526_v47 = vpop.xlane.xlu2 %2525  ;;  %v2469_v18 = vmul.f32 1.442695, %v2428_v35 }
0x1152   :  { %3581 = vrcp.f32 %v2526_v47 }
0x1153   :  { %3583 = vpow2.f32 %v2471_v57 }
0x1156   :  { %v2532_v23 = vpop.xlane.xlu1 %2531 }
0x1157   :  { %3585 = vrcp.f32 %v2532_v23  ;;  %v2430_v23 = vsub.f32 %v4631_v38, %v4904_v31 }
0x1158   :  { %v3582_v10 = vpop.eup %3581  ;;  %3587 = vpow2.f32 %v2469_v18 }
0x1159   :  { %v5023_v14 = vpop.eup %3583  ;;  %v2646_v27 = vmul.f32 %v3582_v10, %v4884_v43  ;;  %v2404_v43 = vsel %vm2290_vm7, %v4988_v12, -inf  ;;  %v2392_v10 = vsel %vm2290_vm7, %v4873_v37, -inf  ;;  %v2473_v15 = vmul.f32 1.442695, %v2430_v23 }
0x115a   :  { %v2545_v47 = vsel %vm2290_vm7, %v5023_v14, 0.0  ;;  %v2407_v23 = vsel %vm2290_vm7, %v5021_v56, -inf }
0x115b   :  { %2678 = vst.msk [vmem:[%s4091_s25 + $0x18] sm:$0xff] %vm2290_vm7, %v2646_v27  ;;  %3589 = vpow2.f32 %v2473_v15  ;;  %v5074_v15 = vpop.permute.xlu2 %2779 }
0x115d   :  { %v3586_v26 = vpop.eup %3585 }
0x115e   :  { %v2648_v57 = vmul.f32 %v3586_v26, %v4890_v59  ;;  %2546 = vadd.xlane.f32.xlu0 %v2545_v47  ;;  %v5044_v59 = vpop.eup %3587  ;;  %v2281_v26 = vpop.f32.mrf.mxu3 }
0x115f   :  { %v2542_v27 = vsel %vm2290_vm7, %v5044_v59, 0.0  ;;  %v5051_v35 = vadd.f32 %v4947_v33, %v2281_v26 }
0x1160   :  { %2680 = vst.msk [vmem:[%s4091_s25 + $0x28] sm:$0xff] %vm2290_vm7, %v2648_v57  ;;  %v5060_v57 = vpop.xlane.xlu0 %2387 }
0x1161   :  { %v5048_v47 = vpop.eup %3589  ;;  %2320 = vst.msk [vmem:[%s4086_s29 + $0xe8] sm:$0xff] %vm2290_vm7, %v5051_v35 }
0x1162   :  { %v2548_v31 = vsel %vm2290_vm7, %v5048_v47, 0.0  ;;  %5580 = vst [vmem:[#allocation53_spill] sm:$0xff] %v5060_v57 }
0x1166   :  { %2405 = vmax.xlane.f32.xlu0 %v2404_v43 }
0x1168   :  { %2393 = vmax.xlane.f32.xlu2 %v2392_v10  ;;  %v5070_v10 = vpop.permute.xlu0 %2783 }
0x116b   :  { %v2284_v18 = vpop.f32.mrf.mxu3 }
0x116c   :  { %v5063_v43 = vadd.f32 %v4947_v33, %v2284_v18  ;;  %v5078_v18 = vpop.xlane.xlu1 %2390 }
0x116e   :  { %2321 = vst.msk [vmem:[%s4086_s29 + $0xf0] sm:$0xff] %vm2290_vm7, %v5063_v43 }
0x1170   :  { %2543 = vadd.xlane.f32.xlu2 %v2542_v27  ;;  %v2849_v27 = vsub.f32 %v4680_v13, %v4906_v17 }
0x1176   :  { %v5087_v17 = vpop.permute.xlu1 %2787 }
0x1179   :  { %2549 = vadd.xlane.f32.xlu1 %v2548_v31  ;;  %v2913_v31 = vmul.f32 0.5, %v2849_v27 }
0x117a   :  { %2795 = vrot.lane.b32.xlu0 %v5021_v56, %s3833_s8 }
0x1181   :  { %2408 = vmax.xlane.f32.xlu1 %v2407_v23 }
0x1188   :  { %2791 = vrot.lane.b32.xlu2 %v4976_v62, %s3833_s8 }
0x118b   :  { %v2538_v26 = vpop.xlane.xlu0 %2537 }
0x118c   :  { %3591 = vrcp.f32 %v2538_v26 }
0x118d   :  { %3593 = vtanh.f32 %v2913_v31 }
0x118e   :  { %3595 = vpow2.f32 %v2477_v40 }
0x1192   :  { %v3592_v57 = vpop.eup %3591  ;;  %v5082_v23 = vpop.xlane.xlu2 %2384 }
0x1193   :  { %v2650_v30 = vmul.f32 %v3592_v57, %v4957_v53  ;;  %v3594_v34 = vpop.eup %3593 }
0x1194   :  { %v5093_v31 = vpop.eup %3595 }
0x1195   :  { %2682 = vst.msk [vmem:[%s4091_s25 + $0x38] sm:$0xff] %vm2290_vm7, %v2650_v30  ;;  %v2554_v40 = vsel %vm2290_vm7, %v5093_v31, 0.0 }
0x1198   :  { %v2287_v55 = vpop.f32.mrf.mxu3 }
0x1199   :  { %v5091_v26 = vadd.f32 %v4947_v33, %v2287_v55  ;;  %v2431_v33 = vsub.f32 %v4661_v63, %v4892_v60  ;;  %v2401_v55 = vsel %vm2290_vm7, %v4976_v62, -inf }
0x119a   :  { %v2535_v27 = vpop.xlane.xlu2 %2534  ;;  %3023 = vrot.lane.b32.xlu1 %v3594_v34, %s3834_s14 }
0x119b   :  { %3597 = vrcp.f32 %v2535_v27  ;;  %2322 = vst.msk [vmem:[%s4086_s29 + $0xf8] sm:$0xff] %vm2290_vm7, %v5091_v26  ;;  %v2475_v27 = vmul.f32 1.442695, %v2431_v33  ;;  %v2846_v33 = vsub.f32 %v4631_v38, %v4886_v46  ;;  %s5591_s29 = sld [smem:[#allocation5_spill]] }
0x11a1   :  { %v3598_v30 = vpop.eup %3597  ;;  %v2541_v53 = vpop.xlane.xlu1 %2540 }
0x11a2   :  { %v2649_v29 = vmul.f32 %v3598_v30, %v4978_v0  ;;  %3599 = vrcp.f32 %v2541_v53  ;;  %2799 = vrot.lane.b32.xlu1 %v5063_v43, %s3833_s8  ;;  %v2413_v0 = vsel %vm2290_vm7, %v5063_v43, -inf  ;;  %v2433_v53 = vsub.f32 %v4680_v13, %v4924_v5 }
0x11a3   :  { %3601 = vpow2.f32 %v2475_v27  ;;  %v2840_v5 = vsub.f32 %v4523_v6, %v4838_v54 }
0x11a4   :  { %2681 = vst.msk [vmem:[%s4091_s25 + $0x30] sm:$0xff] %vm2290_vm7, %v2649_v29  ;;  %2555 = vadd.xlane.f32.xlu0 %v2554_v40  ;;  %v2479_v40 = vmul.f32 1.442695, %v2433_v53 }
0x11a8   :  { %v3600_v34 = vpop.eup %3599 }
0x11a9   :  { %v2651_v57 = vmul.f32 %v3600_v34, %v4985_v16  ;;  %v5114_v30 = vpop.eup %3601  ;;  %v2848_v16 = vsub.f32 %v4673_v8, %v4908_v19  ;;  %v5126_v34 = vpop.xlane.xlu0 %2396  ;;  %v2843_v8 = vsub.f32 %v4578_v58, %v4855_v7  ;;  %v2904_v7 = vmul.f32 0.5, %v2840_v5 }
0x11aa   :  { %v2551_v60 = vsel %vm2290_vm7, %v5114_v30, 0.0  ;;  %v2786_v58 = vpop.permute.xlu2 %2785 }
0x11ab   :  { %2683 = vst.msk [vmem:[%s4091_s25 + $0x40] sm:$0xff] %vm2290_vm7, %v2651_v57  ;;  %v2912_v29 = vmul.f32 0.5, %v2848_v16  ;;  %v2910_v57 = vmul.f32 0.5, %v2846_v33  ;;  %v2907_v38 = vmul.f32 0.5, %v2843_v8  ;;  %v5151_v33 = vpop.xlane.xlu1 %2399 }
0x11ac   :  { %2414 = vmax.xlane.f32.xlu0 %v2413_v0 }
0x11ad   :  { %3603 = vtanh.f32 %v2912_v29  ;;  %v2858_v29 = vsub.f32 %v4873_v37, %v2786_v58 }
0x11ae   :  { %3605 = vpow2.f32 %v2479_v40 }
0x11af   :  { %3607 = vtanh.f32 %v2910_v57  ;;  %v2922_v57 = vmul.f32 0.5, %v2858_v29  ;;  %v2410_v29 = vsel %vm2290_vm7, %v5051_v35, -inf }
0x11b0   :  { %3609 = vtanh.f32 %v2907_v38  ;;  %v2839_v38 = vsub.f32 %v4510_v61, %v4836_v11 }
0x11b1   :  { %2402 = vmax.xlane.f32.xlu2 %v2401_v55  ;;  %v5133_v13 = vpop.permute.xlu0 %2789 }
0x11b3   :  { %v3604_v27 = vpop.eup %3603 }
0x11b4   :  { %v5128_v0 = vpop.eup %3605 }
0x11b5   :  { %v2557_v19 = vsel %vm2290_vm7, %v5128_v0, 0.0  ;;  %v3608_v46 = vpop.eup %3607 }
0x11b6   :  { %v3610_v16 = vpop.eup %3609 }
0x11b9   :  { %2552 = vadd.xlane.f32.xlu2 %v2551_v60  ;;  %v2845_v60 = vsub.f32 %v4619_v25, %v4875_v39  ;;  %v2842_v25 = vsub.f32 %v4569_v51, %v4848_v3  ;;  %v2903_v3 = vmul.f32 0.5, %v2839_v38 }
0x11bb   :  { %v2909_v54 = vmul.f32 0.5, %v2845_v60 }
0x11c0   :  { %2801 = vrot.lane.b32.xlu0 %v5091_v26, %s3833_s8 }
0x11c8   :  { %3021 = vrot.lane.b32.xlu0 %v3604_v27, %s3834_s14  ;;  %v2906_v27 = vmul.f32 0.5, %v2842_v25 }
0x11cc   :  { %2558 = vadd.xlane.f32.xlu1 %v2557_v19  ;;  %v5156_v19 = vpop.permute.xlu1 %2793 }
0x11d0   :  { %3017 = vrot.lane.b32.xlu0 %v3608_v46, %s3834_s14 }
0x11d1   :  { %v2547_v55 = vpop.xlane.xlu0 %2546  ;;  %2797 = vrot.lane.b32.xlu2 %v5051_v35, %s3833_s8 }
0x11d2   :  { %3611 = vrcp.f32 %v2547_v55 }
0x11d3   :  { %3613 = vtanh.f32 %v2904_v7 }
0x11d4   :  { %3615 = vtanh.f32 %v2909_v54 }
0x11d5   :  { %3617 = vtanh.f32 %v2922_v57 }
0x11d8   :  { %v3612_v53 = vpop.eup %3611  ;;  %3011 = vrot.lane.b32.xlu0 %v3610_v16, %s3834_s14 }
0x11d9   :  { %v2653_v6 = vmul.f32 %v3612_v53, %v5023_v14  ;;  %v3614_v39 = vpop.eup %3613  ;;  %v5176_v57 = vpop.xlane.xlu0 %2405 }
0x11da   :  { %v3616_v14 = vpop.eup %3615 }
0x11db   :  { %2685 = vst.msk [vmem:[%s4091_s25 + $0x50] sm:$0xff] %vm2290_vm7, %v2653_v6  ;;  %v5149_v40 = vpop.xlane.xlu2 %2393  ;;  %v3618_v46 = vpop.eup %3617  ;;  %v2850_v6 = vsub.f32 %v4711_v52, %v4934_v42 }
0x11dd   :  { %v2914_v54 = vmul.f32 0.5, %v2850_v6 }
0x11e0   :  { %3005 = vrot.lane.b32.xlu0 %v3614_v39, %s3834_s14 }
0x11e3   :  { %v2544_v8 = vpop.xlane.xlu2 %2543 }
0x11e4   :  { %3619 = vrcp.f32 %v2544_v8  ;;  %v2844_v8 = vsub.f32 %v4610_v24, %v4880_v41 }
0x11e5   :  { %3015 = vrot.lane.b32.xlu1 %v3616_v14, %s3834_s14  ;;  %3621 = vtanh.f32 %v2906_v27 }
0x11e6   :  { %v2908_v14 = vmul.f32 0.5, %v2844_v8 }
0x11e8   :  { %3041 = vrot.lane.b32.xlu0 %v3618_v46, %s3834_s14 }
0x11ea   :  { %v3620_v51 = vpop.eup %3619 }
0x11eb   :  { %v2652_v5 = vmul.f32 %v3620_v51, %v5044_v59  ;;  %v2792_v55 = vpop.permute.xlu2 %2791  ;;  %v3622_v58 = vpop.eup %3621  ;;  %v2416_v51 = vsel %vm2290_vm7, %v5091_v26, -inf }
0x11ec   :  { %v2861_v7 = vsub.f32 %v4976_v62, %v2792_v55  ;;  %v2550_v60 = vpop.xlane.xlu1 %2549  ;;  %v2796_v39 = vpop.permute.xlu0 %2795 }
0x11ed   :  { %2684 = vst.msk [vmem:[%s4091_s25 + $0x48] sm:$0xff] %vm2290_vm7, %v2652_v5  ;;  %3623 = vrcp.f32 %v2550_v60  ;;  %3009 = vrot.lane.b32.xlu1 %v3622_v58, %s3834_s14 }
0x11ee   :  { %3625 = vtanh.f32 %v2903_v3  ;;  %v2925_v61 = vmul.f32 0.5, %v2861_v7  ;;  %v2860_v7 = vsub.f32 %v4950_v21, %v5133_v13 }
0x11f0   :  { %3627 = vtanh.f32 %v2925_v61  ;;  %v2924_v61 = vmul.f32 0.5, %v2860_v7 }
0x11f1   :  { %3629 = vtanh.f32 %v2914_v54 }
0x11f3   :  { %v3624_v11 = vpop.eup %3623 }
0x11f4   :  { %v3626_v16 = vpop.eup %3625  ;;  %v2654_v53 = vmul.f32 %v3624_v11, %v5048_v47  ;;  %v2847_v47 = vsub.f32 %v4661_v63, %v4913_v28  ;;  %v2841_v63 = vsub.f32 %v4552_v32, %v4853_v4  ;;  %v5186_v46 = vpop.xlane.xlu1 %2408  ;;  %v2859_v32 = vsub.f32 %v4895_v1, %v5087_v17 }
0x11f5   :  { %3003 = vrot.lane.b32.xlu1 %v3626_v16, %s3834_s14  ;;  %v2863_v16 = vsub.f32 %v5021_v56, %v2796_v39  ;;  %v2837_v39 = vsub.f32 %v4483_v45, %v4774_v48 }
0x11f6   :  { %v3628_v59 = vpop.eup %3627  ;;  %2686 = vst.msk [vmem:[%s4091_s25 + $0x58] sm:$0xff] %vm2290_vm7, %v2654_v53  ;;  %v2911_v25 = vmul.f32 0.5, %v2847_v47  ;;  %v2905_v3 = vmul.f32 0.5, %v2841_v63  ;;  %v2923_v55 = vmul.f32 0.5, %v2859_v32  ;;  %v2838_v63 = vsub.f32 %v4496_v50, %v4832_v49 }
0x11f7   :  { %3047 = vrot.lane.b32.xlu0 %v3628_v59, %s3834_s14  ;;  %v3630_v27 = vpop.eup %3629  ;;  %v2927_v6 = vmul.f32 0.5, %v2863_v16  ;;  %v2857_v32 = vsub.f32 %v4846_v2, %v5070_v10  ;;  %v2856_v50 = vsub.f32 %v4804_v20, %v5014_v22  ;;  %v5582_v16 = vld [vmem:[#allocation42_spill] sm:$0xff] }
0x11f8   :  { %3631 = vtanh.f32 %v2911_v25  ;;  %v2902_v45 = vmul.f32 0.5, %v2838_v63 }
0x11fa   :  { %2411 = vmax.xlane.f32.xlu2 %v2410_v29 }
0x11fe   :  { %v3632_v42 = vpop.eup %3631 }
0x120c   :  { %v5198_v5 = vpop.permute.xlu1 %3023 }
0x1212   :  { %3025 = vrot.lane.b32.xlu2 %v3630_v27, %s3834_s14 }
0x1214   :  { %v2800_v53 = vpop.permute.xlu1 %2799 }
0x1215   :  { %v2865_v29 = vsub.f32 %v5063_v43, %v2800_v53  ;;  %v5583_v53 = vld [vmem:[#allocation41_spill] sm:$0xff] }
0x1217   :  { %v2556_v38 = vpop.xlane.xlu0 %2555  ;;  %v2929_v8 = vmul.f32 0.5, %v2865_v29 }
0x1218   :  { %3633 = vrcp.f32 %v2556_v38 }
0x1219   :  { %3635 = vtanh.f32 %v2908_v14 }
0x121a   :  { %3019 = vrot.lane.b32.xlu2 %v3632_v42, %s3834_s14  ;;  %3637 = vtanh.f32 %v2905_v3 }
0x121b   :  { %3639 = vtanh.f32 %v2923_v55 }
0x121e   :  { %v3634_v28 = vpop.eup %3633 }
0x121f   :  { %v2656_v24 = vmul.f32 %v3634_v28, %v5093_v31  ;;  %2417 = vmax.xlane.f32.xlu1 %v2416_v51  ;;  %v3636_v41 = vpop.eup %3635  ;;  %v2862_v31 = vsub.f32 %v4988_v12, %v5156_v19  ;;  %v5205_v17 = vpop.xlane.xlu0 %2414 }
0x1220   :  { %v3638_v58 = vpop.eup %3637 }
0x1221   :  { %2688 = vst.msk [vmem:[%s4091_s25 + $0x68] sm:$0xff] %vm2290_vm7, %v2656_v24  ;;  %v2926_v11 = vmul.f32 0.5, %v2862_v31  ;;  %v3640_v59 = vpop.eup %3639  ;;  %v2855_v24 = vsub.f32 %v4788_v9, %v5074_v15  ;;  %v2921_v15 = vmul.f32 0.5, %v2857_v32  ;;  %v2920_v31 = vmul.f32 0.5, %v2856_v50 }
0x1222   :  { %3013 = vrot.lane.b32.xlu2 %v3636_v41, %s3834_s14 }
0x1223   :  { %v2919_v49 = vmul.f32 0.5, %v2855_v24 }
0x1224   :  { %v5196_v4 = vpop.xlane.xlu2 %2402 }
0x122a   :  { %3007 = vrot.lane.b32.xlu2 %v3638_v58, %s3834_s14 }
0x122c   :  { %v2553_v60 = vpop.xlane.xlu2 %2552 }
0x122d   :  { %3641 = vrcp.f32 %v2553_v60 }
0x122e   :  { %3643 = vtanh.f32 %v2924_v61  ;;  %v2836_v61 = vsub.f32 %v4474_v36, %v4828_v44 }
0x122f   :  { %3645 = vtanh.f32 %v2926_v11  ;;  %v5581_v11 = vld [vmem:[#allocation52_spill] sm:$0xff] }
0x1230   :  { %3647 = vtanh.f32 %v2927_v6  ;;  %v2853_v22 = vsub.f32 %v5582_v16, %v5581_v11  ;;  %v5593_v11 = vld [vmem:[#allocation46_spill] sm:$0xff] }
0x1232   :  { %3043 = vrot.lane.b32.xlu2 %v3640_v59, %s3834_s14  ;;  %v2802_v25 = vpop.permute.xlu0 %2801  ;;  %v5584_v59 = vld [vmem:[#allocation38_spill] sm:$0xff]  ;;  %v2917_v36 = vmul.f32 0.5, %v2853_v22 }
0x1233   :  { %v3642_v13 = vpop.eup %3641  ;;  %v2866_v42 = vsub.f32 %v5091_v26, %v2802_v25 }
0x1234   :  { %v2655_v19 = vmul.f32 %v3642_v13, %v5114_v30  ;;  %v2798_v54 = vpop.permute.xlu2 %2797  ;;  %v3644_v27 = vpop.eup %3643  ;;  %v2901_v30 = vmul.f32 0.5, %v2837_v39  ;;  %v2900_v13 = vmul.f32 0.5, %v2836_v61  ;;  %v5588_v39 = vld [vmem:[#allocation40_spill] sm:$0xff]  ;;  %v2880_v61 = vld [vmem:[%s5591_s29 + $0x68] sm:$0xff] }
0x1235   :  { %v2864_v47 = vsub.f32 %v5051_v35, %v2798_v54  ;;  %v3646_v38 = vpop.eup %3645  ;;  %v2930_v28 = vmul.f32 0.5, %v2866_v42  ;;  %v5585_v54 = vld [vmem:[#allocation49_spill] sm:$0xff] }
0x1236   :  { %2687 = vst.msk [vmem:[%s4091_s25 + $0x60] sm:$0xff] %vm2290_vm7, %v2655_v19  ;;  %v3648_v51 = vpop.eup %3647 }
0x1237   :  { %v2928_v14 = vmul.f32 0.5, %v2864_v47  ;;  %v5586_v47 = vld [vmem:[#allocation43_spill] sm:$0xff] }
0x1238   :  { %3045 = vrot.lane.b32.xlu1 %v3644_v27, %s3834_s14  ;;  %v2854_v25 = vsub.f32 %v5586_v47, %v5585_v54  ;;  %v5587_v27 = vld [vmem:[#allocation47_spill] sm:$0xff] }
0x1239   :  { %3649 = vtanh.f32 %v2928_v14 }
0x123a   :  { %3049 = vrot.lane.b32.xlu2 %v3646_v38, %s3834_s14  ;;  %3651 = vtanh.f32 %v2929_v8  ;;  %v2852_v8 = vsub.f32 %v5588_v39, %v5587_v27  ;;  %v2918_v14 = vmul.f32 0.5, %v2854_v25  ;;  %v3022_v50 = vpop.permute.xlu0 %3021  ;;  %v5595_v27 = vld [vmem:[#allocation50_spill] sm:$0xff] }
0x123b   :  { %3653 = vtanh.f32 %v2901_v30 }
0x123c   :  { %v2916_v30 = vmul.f32 0.5, %v2852_v8  ;;  %v2436_v8 = vsub.f32 %v5588_v39, %v5595_v27  ;;  %v5596_v39 = vld [vmem:[#allocation48_spill] sm:$0xff] }
0x123f   :  { %v3650_v3 = vpop.eup %3649  ;;  %v2559_v48 = vpop.xlane.xlu1 %2558 }
0x1240   :  { %3655 = vrcp.f32 %v2559_v48  ;;  %3053 = vrot.lane.b32.xlu0 %v3650_v3, %s3834_s14  ;;  %3051 = vrot.lane.b32.xlu1 %v3648_v51, %s3834_s14  ;;  %v3652_v41 = vpop.eup %3651  ;;  %v5590_v51 = vld [vmem:[#allocation39_spill] sm:$0xff] }
0x1241   :  { %3657 = vtanh.f32 %v2930_v28  ;;  %v3654_v55 = vpop.eup %3653  ;;  %v5589_v28 = vld [vmem:[#allocation45_spill] sm:$0xff]  ;;  %v2435_v22 = vsub.f32 %v5590_v51, %v5593_v11 }
0x1242   :  { %3055 = vrot.lane.b32.xlu2 %v3652_v41, %s3834_s14  ;;  %3659 = vtanh.f32 %v2902_v45  ;;  %v2851_v3 = vsub.f32 %v5590_v51, %v5589_v28  ;;  %v2485_v28 = vmul.f32 1.442695, %v2436_v8 }
0x1243   :  { %3661 = vtanh.f32 %v2919_v49  ;;  %v5592_v49 = vld [vmem:[#allocation44_spill] sm:$0xff] }
0x1244   :  { %3663 = vtanh.f32 %v2921_v15  ;;  %v2915_v45 = vmul.f32 0.5, %v2851_v3  ;;  %v2882_v15 = vld [vmem:[%s5591_s29 + $0x78] sm:$0xff] }
0x1245   :  { %3665 = vtanh.f32 %v2920_v31 }
0x1246   :  { %v3656_v58 = vpop.eup %3655  ;;  %3667 = vtanh.f32 %v2900_v13  ;;  %v2483_v13 = vmul.f32 1.442695, %v2435_v22 }
0x1247   :  { %v3658_v7 = vpop.eup %3657  ;;  %v2657_v60 = vmul.f32 %v3656_v58, %v5128_v0  ;;  %v2835_v0 = vsub.f32 %v5584_v59, %v5583_v53  ;;  %3669 = vtanh.f32 %v2917_v36  ;;  %v3018_v53 = vpop.permute.xlu0 %3017  ;;  %v3104_v59 = vmul.f32 %v3022_v50, %v2880_v61  ;;  %v2878_v36 = vld [vmem:[%s5591_s29 + $0x58] sm:$0xff]  ;;  %v3755_v50 = vld [vmem:[%s3856_s13 + $0x8] sm:$0xff] }
0x1248   :  { %2999 = vrot.lane.b32.xlu0 %v3654_v55, %s3834_s14  ;;  %3057 = vrot.lane.b32.xlu1 %v3658_v7, %s3834_s14  ;;  %v3660_v10 = vpop.eup %3659  ;;  %v2434_v55 = vsub.f32 %v4711_v52, %v5592_v49  ;;  %v2881_v7 = vld [vmem:[%s5591_s29 + $0x70] sm:$0xff]  ;;  %v2879_v52 = vld [vmem:[%s5591_s29 + $0x60] sm:$0xff]  ;;  %v3102_v25 = vmul.f32 %v3018_v53, %v2878_v36  ;;  %v3176_v49 = vsel %vm226_vm0, %v3755_v50, 0.0  ;;  %v5597_v53 = vld [vmem:[#allocation53_spill] sm:$0xff] }
0x1249   :  { %2689 = vst.msk [vmem:[%s4091_s25 + $0x70] sm:$0xff] %vm2290_vm7, %v2657_v60  ;;  %v3662_v44 = vpop.eup %3661  ;;  %v2899_v6 = vmul.f32 0.5, %v2835_v0 }
0x124a   :  { %3001 = vrot.lane.b32.xlu2 %v3660_v10, %s3834_s14  ;;  %v3664_v29 = vpop.eup %3663  ;;  %v2481_v58 = vmul.f32 1.442695, %v2434_v55  ;;  %v3105_v10 = vmul.f32 %v5198_v5, %v2881_v7  ;;  %v5594_v5 = vld [vmem:[#allocation51_spill] sm:$0xff]  ;;  %v2441_v55 = vsub.f32 %v4846_v2, %v5078_v18  ;;  %v2872_v18 = vld [vmem:[%s5591_s29 + $0x28] sm:$0xff] }
0x124b   :  { %v3666_v19 = vpop.eup %3665  ;;  %3671 = vtanh.f32 %v2899_v6  ;;  %v2438_v54 = vsub.f32 %v5586_v47, %v5594_v5  ;;  %v2875_v47 = vld [vmem:[%s5591_s29 + $0x40] sm:$0xff] }
0x124c   :  { %v3668_v38 = vpop.eup %3667  ;;  %3673 = vtanh.f32 %v2918_v14  ;;  %v2495_v61 = vmul.f32 1.442695, %v2441_v55 }
0x124d   :  { %v3670_v42 = vpop.eup %3669  ;;  %3675 = vtanh.f32 %v2916_v30  ;;  %v2876_v30 = vld [vmem:[%s5591_s29 + $0x48] sm:$0xff] }
0x124e   :  { %3677 = vtanh.f32 %v2915_v45 }
0x124f   :  { %3679 = vpow2.f32 %v2481_v58  ;;  %v2439_v58 = vsub.f32 %v4788_v9, %v5082_v23 }
0x1250   :  { %3035 = vrot.lane.b32.xlu0 %v3662_v44, %s3834_s14  ;;  %3039 = vrot.lane.b32.xlu1 %v3664_v29, %s3834_s14  ;;  %3681 = vpow2.f32 %v2483_v13  ;;  %v2444_v13 = vsub.f32 %v4950_v21, %v5151_v33 }
0x1251   :  { %v3672_v63 = vpop.eup %3671  ;;  %v2491_v2 = vmul.f32 1.442695, %v2439_v58  ;;  %v2449_v58 = vsub.f32 %v5063_v43, %v5205_v17 }
0x1252   :  { %3037 = vrot.lane.b32.xlu2 %v3666_v19, %s3834_s14  ;;  %v3674_v48 = vpop.eup %3673  ;;  %v2877_v19 = vld [vmem:[%s5591_s29 + $0x50] sm:$0xff]  ;;  %v2501_v21 = vmul.f32 1.442695, %v2444_v13 }
0x1253   :  { %v3676_v24 = vpop.eup %3675 }
0x1254   :  { %v3678_v41 = vpop.eup %3677 }
0x1255   :  { %v5269_v29 = vpop.eup %3679 }
0x1256   :  { %v2560_v14 = vsel %vm2290_vm7, %v5269_v29, 0.0 }
0x1257   :  { %v3016_v0 = vpop.permute.xlu1 %3015 }
0x1258   :  { %3031 = vrot.lane.b32.xlu0 %v3670_v42, %s3834_s14  ;;  %2997 = vrot.lane.b32.xlu1 %v3668_v38, %s3834_s14  ;;  %v3101_v38 = vmul.f32 %v3016_v0, %v2877_v19  ;;  %v3012_v42 = vpop.permute.xlu0 %3011  ;;  %v2871_v0 = vld [vmem:[%s5591_s29 + $0x20] sm:$0xff]  ;;  %v2442_v19 = vsub.f32 %v4873_v37, %v5149_v40 }
0x125a   :  { %2995 = vrot.lane.b32.xlu2 %v3672_v63, %s3834_s14  ;;  %v2489_v63 = vmul.f32 1.442695, %v2438_v54  ;;  %v2497_v27 = vmul.f32 1.442695, %v2442_v19  ;;  %v2897_v19 = vld [vmem:[%s5591_s29 + $0xf0] sm:$0xff] }
0x125c   :  { %3683 = vpow2.f32 %v2489_v63 }
0x125d   :  { %3685 = vpow2.f32 %v2485_v28 }
0x125f   :  { %v3010_v51 = vpop.permute.xlu1 %3009 }
0x1260   :  { %3033 = vrot.lane.b32.xlu1 %v3674_v48, %s3834_s14  ;;  %v5280_v48 = vpop.eup %3681 }
0x1262   :  { %3029 = vrot.lane.b32.xlu2 %v3676_v24, %s3834_s14  ;;  %v2437_v24 = vsub.f32 %v5582_v16, %v5596_v39  ;;  %v2563_v16 = vsel %vm2290_vm7, %v5280_v48, 0.0  ;;  %v5295_v22 = vpop.eup %3683 }
0x1263   :  { %v5297_v23 = vpop.eup %3685  ;;  %v2572_v5 = vsel %vm2290_vm7, %v5295_v22, 0.0 }
0x1268   :  { %3027 = vrot.lane.b32.xlu1 %v3678_v41, %s3834_s14  ;;  %v2874_v41 = vld [vmem:[%s5591_s29 + $0x38] sm:$0xff] }
0x1269   :  { %v3098_v7 = vmul.f32 %v3010_v51, %v2874_v41 }
0x126d   :  { %v5257_v32 = vpop.xlane.xlu2 %2411 }
0x126e   :  { %v2448_v39 = vsub.f32 %v5051_v35, %v5257_v32 }
0x1270   :  { %v2509_v55 = vmul.f32 1.442695, %v2448_v39 }
0x1275   :  { %v3026_v31 = vpop.permute.xlu2 %3025 }
0x1276   :  { %v3106_v60 = vmul.f32 %v3026_v31, %v2882_v15  ;;  %v3099_v15 = vmul.f32 %v3012_v42, %v2875_v47  ;;  %v2487_v31 = vmul.f32 1.442695, %v2437_v24  ;;  %v2445_v42 = vsub.f32 %v4976_v62, %v5196_v4 }
0x1278   :  { %3127 = vmatpush.msrb.mxu2 %v3106_v60  ;;  %v2873_v60 = vld [vmem:[%s5591_s29 + $0x30] sm:$0xff]  ;;  %3687 = vpow2.f32 %v2487_v31 }
0x1279   :  { %3689 = vpow2.f32 %v2495_v61 }
0x127a   :  { %3128 = vmatpush.msrb.mxu2 %v3105_v10  ;;  %v3006_v10 = vpop.permute.xlu0 %3005  ;;  %3691 = vpow2.f32 %v2491_v2  ;;  %v2870_v2 = vld [vmem:[%s5591_s29 + $0x18] sm:$0xff] }
0x127b   :  { %v3096_v36 = vmul.f32 %v3006_v10, %v2872_v18  ;;  %v2511_v10 = vmul.f32 1.442695, %v2449_v58 }
0x127c   :  { %3129 = vmatpush.msrb.mxu2 %v3104_v59  ;;  %v2440_v59 = vsub.f32 %v4804_v20, %v5597_v53  ;;  %v2566_v20 = vsel %vm2290_vm7, %v5297_v23, 0.0 }
0x127d   :  { %v3020_v44 = vpop.permute.xlu2 %3019 }
0x127e   :  { %v3103_v6 = vmul.f32 %v3020_v44, %v2879_v52  ;;  %v3004_v52 = vpop.permute.xlu1 %3003  ;;  %v3756_v44 = vld [vmem:[%s3856_s13] sm:$0xff]  ;;  %v5312_v33 = vpop.eup %3687  ;;  %s5598_s13 = sld [smem:[#allocation8_spill]] }
0x127f   :  { %v3095_v54 = vmul.f32 %v3004_v52, %v2871_v0  ;;  %v5316_v37 = vpop.eup %3689  ;;  %v2569_v63 = vsel %vm2290_vm7, %v5312_v33, 0.0 }
0x1280   :  { %3130 = vmatpush.msrb.mxu2 %v3103_v6  ;;  %v3173_v6 = vsel %vm226_vm0, %v3756_v44, 0.0  ;;  %v5318_v40 = vpop.eup %3691  ;;  %v2869_v44 = vld [vmem:[%s5591_s29 + $0x10] sm:$0xff] }
0x1281   :  { %v2575_v28 = vsel %vm2290_vm7, %v5318_v40, 0.0 }
0x1282   :  { %2561 = vadd.xlane.f32.xlu0 %v2560_v14  ;;  %3131 = vmatpush.msrb.mxu2 %v3102_v25  ;;  %v2493_v25 = vmul.f32 1.442695, %v2440_v59  ;;  %v2443_v14 = vsub.f32 %v4895_v1, %v5126_v34  ;;  %v5347_v41 = vpop.permute.xlu0 %3041 }
0x1284   :  { %3132 = vmatpush.msrb.mxu2 %v3101_v38  ;;  %3693 = vpow2.f32 %v2493_v25  ;;  %v2447_v38 = vsub.f32 %v5021_v56, %v5186_v46  ;;  %v2499_v47 = vmul.f32 1.442695, %v2443_v14  ;;  %v2503_v56 = vmul.f32 1.442695, %v2445_v42 }
0x1285   :  { %v3014_v3 = vpop.permute.xlu2 %3013  ;;  %3695 = vpow2.f32 %v2501_v21 }
0x1286   :  { %v3100_v45 = vmul.f32 %v3014_v3, %v2876_v30  ;;  %3697 = vpow2.f32 %v2497_v27  ;;  %v2581_v30 = vsel %vm2290_vm7, %v5316_v37, 0.0  ;;  %v2507_v1 = vmul.f32 1.442695, %v2447_v38  ;;  %v2896_v27 = vld [vmem:[%s5591_s29 + $0xe8] sm:$0xff]  ;;  %v2895_v38 = vld [vmem:[%s5591_s29 + $0xe0] sm:$0xff] }
0x1287   :  { %3699 = vpow2.f32 %v2499_v47  ;;  %v2446_v3 = vsub.f32 %v4988_v12, %v5176_v57  ;;  %v2893_v47 = vld [vmem:[%s5591_s29 + $0xd0] sm:$0xff] }
0x1288   :  { %3133 = vmatpush.msrb.mxu2 %v3100_v45  ;;  %3701 = vpow2.f32 %v2507_v1 }
0x1289   :  { %3703 = vpow2.f32 %v2503_v56  ;;  %v2505_v12 = vmul.f32 1.442695, %v2446_v3 }
0x128a   :  { %3177 = vadd.xlane.f32.xlu0 %v3176_v49  ;;  %3134 = vmatpush.msrb.mxu2 %v3099_v15  ;;  %v5332_v34 = vpop.eup %3693 }
0x128b   :  { %2564 = vadd.xlane.f32.xlu2 %v2563_v16  ;;  %v5336_v62 = vpop.eup %3695  ;;  %v2578_v50 = vsel %vm2290_vm7, %v5332_v34, 0.0  ;;  %3705 = vpow2.f32 %v2505_v12  ;;  %v3048_v16 = vpop.permute.xlu0 %3047 }
0x128c   :  { %3135 = vmatpush.msrb.mxu2 %v3098_v7  ;;  %v5338_v4 = vpop.eup %3697  ;;  %v2590_v24 = vsel %vm2290_vm7, %v5336_v62, 0.0  ;;  %v3117_v3 = vmul.f32 %v3048_v16, %v2893_v47  ;;  %v2888_v16 = vld [vmem:[%s5591_s29 + $0xa8] sm:$0xff] }
0x128d   :  { %v3008_v11 = vpop.permute.xlu2 %3007  ;;  %v2584_v49 = vsel %vm2290_vm7, %v5338_v4, 0.0  ;;  %v5353_v57 = vpop.eup %3699 }
0x128e   :  { %v3097_v9 = vmul.f32 %v3008_v11, %v2873_v60  ;;  %v5355_v32 = vpop.eup %3701  ;;  %v2587_v31 = vsel %vm2290_vm7, %v5353_v57, 0.0 }
0x128f   :  { %v5357_v15 = vpop.eup %3703  ;;  %v2599_v7 = vsel %vm2290_vm7, %v5355_v32, 0.0 }
0x1290   :  { %3136 = vmatpush.msrb.mxu2 %v3097_v9  ;;  %v2593_v61 = vsel %vm2290_vm7, %v5357_v15, 0.0 }
0x1291   :  { %v5368_v18 = vpop.eup %3705 }
0x1292   :  { %2573 = vadd.xlane.f32.xlu0 %v2572_v5  ;;  %3137 = vmatpush.msrb.mxu2 %v3096_v36  ;;  %v2418_v46 = vpop.xlane.xlu1 %2417  ;;  %v2596_v0 = vsel %vm2290_vm7, %v5368_v18, 0.0 }
0x1293   :  { %3174 = vadd.xlane.f32.xlu1 %v3173_v6  ;;  %2567 = vadd.xlane.f32.xlu2 %v2566_v20  ;;  %v2450_v45 = vsub.f32 %v5091_v26, %v2418_v46  ;;  %v2898_v6 = vld [vmem:[%s5591_s29 + $0xf8] sm:$0xff]  ;;  %v2892_v46 = vld [vmem:[%s5591_s29 + $0xc8] sm:$0xff] }
0x1294   :  { %3138 = vmatpush.msrb.mxu2 %v3095_v54 }
0x1295   :  { %v5314_v8 = vpop.permute.xlu2 %3043  ;;  %v2513_v26 = vmul.f32 1.442695, %v2450_v45  ;;  %v2891_v45 = vld [vmem:[%s5591_s29 + $0xc0] sm:$0xff] }
0x1296   :  { %v3115_v12 = vmul.f32 %v5314_v8, %v2891_v45 }
0x1297   :  { %3707 = vpow2.f32 %v2513_v26  ;;  %v2867_v26 = vld [vmem:[%s5591_s29] sm:$0xff] }
0x1298   :  { %3709 = vpow2.f32 %v2509_v55 }
0x1299   :  { %3711 = vpow2.f32 %v2511_v10  ;;  %v2886_v10 = vld [vmem:[%s5591_s29 + $0x98] sm:$0xff] }
0x129a   :  { %2582 = vadd.xlane.f32.xlu0 %v2581_v30  ;;  %v2894_v30 = vld [vmem:[%s5591_s29 + $0xd8] sm:$0xff] }
0x129b   :  { %2570 = vadd.xlane.f32.xlu1 %v2569_v63  ;;  %2576 = vadd.xlane.f32.xlu2 %v2575_v28 }
0x129d   :  { %v5334_v51 = vpop.permute.xlu2 %3049  ;;  %v5370_v17 = vpop.eup %3707 }
0x129e   :  { %v5372_v9 = vpop.eup %3709  ;;  %v2608_v53 = vsel %vm2290_vm7, %v5370_v17, 0.0  ;;  %v3118_v56 = vmul.f32 %v5334_v51, %v2894_v30  ;;  %v2889_v51 = vld [vmem:[%s5591_s29 + $0xb0] sm:$0xff] }
0x129f   :  { %v2602_v13 = vsel %vm2290_vm7, %v5372_v9, 0.0  ;;  %v5380_v36 = vpop.eup %3711 }
0x12a0   :  { %v2605_v54 = vsel %vm2290_vm7, %v5380_v36, 0.0 }
0x12a2   :  { %2591 = vadd.xlane.f32.xlu0 %v2590_v24  ;;  %v2890_v24 = vld [vmem:[%s5591_s29 + $0xb8] sm:$0xff] }
0x12a3   :  { %2579 = vadd.xlane.f32.xlu1 %v2578_v50  ;;  %2585 = vadd.xlane.f32.xlu2 %v2584_v49  ;;  %v2868_v49 = vld [vmem:[%s5591_s29 + $0x8] sm:$0xff]  ;;  %v3114_v58 = vmul.f32 %v5347_v41, %v2890_v24  ;;  %v2885_v41 = vld [vmem:[%s5591_s29 + $0x90] sm:$0xff] }
0x12a5   :  { %v3056_v35 = vpop.permute.xlu2 %3055 }
0x12a6   :  { %v3121_v14 = vmul.f32 %v3056_v35, %v2897_v19  ;;  %v2883_v19 = vld [vmem:[%s5591_s29 + $0x80] sm:$0xff] }
0x12aa   :  { %2600 = vadd.xlane.f32.xlu0 %v2599_v7  ;;  %v3046_v60 = vpop.permute.xlu1 %3045 }
0x12ab   :  { %2588 = vadd.xlane.f32.xlu1 %v2587_v31  ;;  %2594 = vadd.xlane.f32.xlu2 %v2593_v61  ;;  %v3116_v39 = vmul.f32 %v3046_v60, %v2892_v46  ;;  %v3123_v61 = vld [vmem:[%s5598_s13] sm:$0xff] }
0x12ad   :  { %v3002_v43 = vpop.permute.xlu2 %3001 }
0x12ae   :  { %v3094_v11 = vmul.f32 %v3002_v43, %v2870_v2  ;;  %v2887_v2 = vld [vmem:[%s5591_s29 + $0xa0] sm:$0xff] }
0x12b0   :  { %3139 = vmatpush.msrb.mxu2 %v3094_v11 }
0x12b2   :  { %v3054_v59 = vpop.permute.xlu0 %3053  ;;  %2609 = vadd.xlane.f32.xlu0 %v2608_v53  ;;  %v3052_v52 = vpop.permute.xlu1 %3051 }
0x12b3   :  { %2597 = vadd.xlane.f32.xlu1 %v2596_v0  ;;  %2603 = vadd.xlane.f32.xlu2 %v2602_v13  ;;  %v3120_v42 = vmul.f32 %v3054_v59, %v2896_v27  ;;  %v3119_v28 = vmul.f32 %v3052_v52, %v2895_v38  ;;  %v2884_v0 = vld [vmem:[%s5591_s29 + $0x88] sm:$0xff] }
0x12b5   :  { %v3038_v63 = vpop.permute.xlu2 %3037 }
0x12b6   :  { %v3112_v8 = vmul.f32 %v3038_v63, %v2888_v16 }
0x12ba   :  { %v3000_v5 = vpop.permute.xlu0 %2999  ;;  %v3058_v20 = vpop.permute.xlu1 %3057 }
0x12bb   :  { %v3093_v25 = vmul.f32 %v3000_v5, %v2869_v44  ;;  %2606 = vadd.xlane.f32.xlu1 %v2605_v54  ;;  %v3122_v21 = vmul.f32 %v3058_v20, %v2898_v6  ;;  %v3125_v44 = vld [vmem:[%s5598_s13 + $0x10] sm:$0xff]  ;;  %v3124_v20 = vld [vmem:[%s5598_s13 + $0x8] sm:$0xff] }
0x12bd   :  { %3140 = vmatpush.msrb.mxu2 %v3093_v25  ;;  %3150 = vmatpush.msrb.mxu0 %v3122_v21  ;;  %v2996_v55 = vpop.permute.xlu2 %2995  ;;  %v3126_v25 = vld [vmem:[%s5598_s13 + $0x18] sm:$0xff] }
0x12be   :  { %v3091_v31 = vmul.f32 %v2996_v55, %v2867_v26 }
0x12bf   :  { %3151 = vmatpush.msrb.mxu0 %v3121_v14 }
0x12c1   :  { %3152 = vmatpush.msrb.mxu0 %v3120_v42 }
0x12c2   :  { %v3040_v1 = vpop.permute.xlu1 %3039  ;;  %v3036_v50 = vpop.permute.xlu0 %3035 }
0x12c3   :  { %3153 = vmatpush.msrb.mxu0 %v3119_v28  ;;  %v3113_v60 = vmul.f32 %v3040_v1, %v2889_v51  ;;  %v3111_v43 = vmul.f32 %v3036_v50, %v2887_v2 }
0x12c5   :  { %3154 = vmatpush.msrb.mxu0 %v3118_v56  ;;  %v3030_v52 = vpop.permute.xlu2 %3029 }
0x12c6   :  { %v3108_v6 = vmul.f32 %v3030_v52, %v2884_v0 }
0x12c7   :  { %3155 = vmatpush.msrb.mxu0 %v3117_v3 }
0x12c9   :  { %3156 = vmatpush.msrb.mxu0 %v3116_v39 }
0x12ca   :  { %v2998_v35 = vpop.permute.xlu1 %2997  ;;  %v3032_v11 = vpop.permute.xlu0 %3031 }
0x12cb   :  { %v3092_v7 = vmul.f32 %v2998_v35, %v2868_v49  ;;  %3157 = vmatpush.msrb.mxu0 %v3115_v12  ;;  %v3109_v13 = vmul.f32 %v3032_v11, %v2885_v41 }
0x12cd   :  { %3141 = vmatpush.msrb.mxu2 %v3092_v7  ;;  %3158 = vmatpush.msrb.mxu0 %v3114_v58 }
0x12cf   :  { %3142 = vmatpush.msrb.mxu2 %v3091_v31  ;;  %3159 = vmatpush.msrb.mxu0 %v3113_v60 }
0x12d0   :  { %3143 = vmatmul.f32.vlgmr.msrb.gmra.mxu2 %v3123_v61 }
0x12d1   :  { %3160 = vmatpush.msrb.mxu0 %v3112_v8 }
0x12d2   :  { %v3034_v53 = vpop.permute.xlu1 %3033 }
0x12d3   :  { %v3110_v59 = vmul.f32 %v3034_v53, %v2886_v10  ;;  %3161 = vmatpush.msrb.mxu0 %v3111_v43 }
0x12d5   :  { %3162 = vmatpush.msrb.mxu0 %v3110_v59 }
0x12d7   :  { %3163 = vmatpush.msrb.mxu0 %v3109_v13 }
0x12d8   :  { %3146 = vmatmul.f32.gmra.mxu2 %v3125_v44 }
0x12d9   :  { %3164 = vmatpush.msrb.mxu0 %v3108_v6 }
0x12da   :  { %v3028_v5 = vpop.permute.xlu1 %3027 }
0x12db   :  { %v3107_v54 = vmul.f32 %v3028_v5, %v2883_v19 }
0x12dd   :  { %3165 = vmatpush.msrb.mxu0 %v3107_v54 }
0x12de   :  { %3166 = vmatmul.f32.vlgmr.msrb.gmra.mxu0 %v3124_v20 }
0x12e6   :  { %3169 = vmatmul.f32.gmra.mxu0 %v3126_v25 }
0x12e7   :  { %3780 = shalt.err (!%p3777_p4)
}
0x12e8   :  { %s3836_s27 = smov 128   ;;  %s3837_s15 = smov 8   ;;  %vm3185_vm0 = vcmask 7168  }
0x12e9   :  { %3200 = dma.vmem_to_hbm [thread:$0]  %s3193_s24, 256, %s3195_s30, [#allocation3], %s3836_s27, %s3836_s27, %s3837_s15  }
0x12f5   :  { %v2562_v21 = vpop.xlane.xlu0 %2561 }
0x12f6   :  { %3713 = vrcp.f32 %v2562_v21 }
0x12fc   :  { %v3714_v27 = vpop.eup %3713 }
0x12fd   :  { %v2658_v14 = vmul.f32 %v3714_v27, %v5269_v29  ;;  %v5414_v38 = vpop.xlane.xlu0 %3177 }
0x12fe   :  { %v2565_v42 = vpop.xlane.xlu2 %2564  ;;  %v3180_v44 = vmax.f32 %v5414_v38, 1.0 }
0x12ff   :  { %2690 = vst.msk [vmem:[%s4091_s25 + $0x78] sm:$0xff] %vm2290_vm7, %v2658_v14  ;;  %3715 = vrcp.f32 %v2565_v42 }
0x1305   :  { %v3716_v30 = vpop.eup %3715  ;;  %v2574_v63 = vpop.xlane.xlu0 %2573 }
0x1306   :  { %v2659_v28 = vmul.f32 %v3716_v30, %v5280_v48  ;;  %3717 = vrcp.f32 %v2574_v63  ;;  %v5419_v47 = vpop.xlane.xlu1 %3174  ;;  %v2568_v1 = vpop.xlane.xlu2 %2567 }
0x1307   :  { %3719 = vrcp.f32 %v2568_v1 }
0x1308   :  { %2691 = vst.msk [vmem:[%s4091_s25 + $0x80] sm:$0xff] %vm2290_vm7, %v2659_v28 }
0x130c   :  { %v3718_v29 = vpop.eup %3717 }
0x130d   :  { %v3720_v56 = vpop.eup %3719  ;;  %v2662_v46 = vmul.f32 %v3718_v29, %v5295_v22  ;;  %v2583_v3 = vpop.xlane.xlu0 %2582 }
0x130e   :  { %v2660_v45 = vmul.f32 %v3720_v56, %v5297_v23  ;;  %3721 = vrcp.f32 %v2583_v3  ;;  %v2571_v39 = vpop.xlane.xlu1 %2570  ;;  %v2577_v24 = vpop.xlane.xlu2 %2576 }
0x130f   :  { %2694 = vst.msk [vmem:[%s4091_s25 + $0x98] sm:$0xff] %vm2290_vm7, %v2662_v46  ;;  %3723 = vrcp.f32 %v2571_v39 }
0x1310   :  { %2692 = vst.msk [vmem:[%s4091_s25 + $0x88] sm:$0xff] %vm2290_vm7, %v2660_v45  ;;  %3725 = vrcp.f32 %v2577_v24 }
0x1314   :  { %v3722_v48 = vpop.eup %3721 }
0x1315   :  { %v3724_v50 = vpop.eup %3723  ;;  %v2665_v49 = vmul.f32 %v3722_v48, %v5316_v37  ;;  %v2592_v22 = vpop.xlane.xlu0 %2591 }
0x1316   :  { %v3726_v12 = vpop.eup %3725  ;;  %v2661_v23 = vmul.f32 %v3724_v50, %v5312_v33  ;;  %3727 = vrcp.f32 %v2592_v22  ;;  %v2580_v26 = vpop.xlane.xlu1 %2579 }
0x1317   :  { %v2586_v55 = vpop.xlane.xlu2 %2585  ;;  %2697 = vst.msk [vmem:[%s4091_s25 + $0xb0] sm:$0xff] %vm2290_vm7, %v2665_v49  ;;  %v2663_v51 = vmul.f32 %v3726_v12, %v5318_v40  ;;  %3729 = vrcp.f32 %v2580_v26 }
0x1318   :  { %2693 = vst.msk [vmem:[%s4091_s25 + $0x90] sm:$0xff] %vm2290_vm7, %v2661_v23  ;;  %3731 = vrcp.f32 %v2586_v55 }
0x1319   :  { %2695 = vst.msk [vmem:[%s4091_s25 + $0xa0] sm:$0xff] %vm2290_vm7, %v2663_v51 }
0x131c   :  { %v3728_v37 = vpop.eup %3727 }
0x131d   :  { %v3730_v35 = vpop.eup %3729  ;;  %v2668_v33 = vmul.f32 %v3728_v37, %v5336_v62  ;;  %v2601_v58 = vpop.xlane.xlu0 %2600 }
0x131e   :  { %v3732_v7 = vpop.eup %3731  ;;  %v2664_v16 = vmul.f32 %v3730_v35, %v5332_v34  ;;  %3733 = vrcp.f32 %v2601_v58  ;;  %v2589_v31 = vpop.xlane.xlu1 %2588 }
0x131f   :  { %v2595_v60 = vpop.xlane.xlu2 %2594  ;;  %2700 = vst.msk [vmem:[%s4091_s25 + $0xc8] sm:$0xff] %vm2290_vm7, %v2668_v33  ;;  %v2666_v40 = vmul.f32 %v3732_v7, %v5338_v4  ;;  %3735 = vrcp.f32 %v2589_v31 }
0x1320   :  { %2696 = vst.msk [vmem:[%s4091_s25 + $0xa8] sm:$0xff] %vm2290_vm7, %v2664_v16  ;;  %3737 = vrcp.f32 %v2595_v60 }
0x1321   :  { %2698 = vst.msk [vmem:[%s4091_s25 + $0xb8] sm:$0xff] %vm2290_vm7, %v2666_v40 }
0x1324   :  { %v3734_v62 = vpop.eup %3733 }
0x1325   :  { %v3736_v61 = vpop.eup %3735  ;;  %v2671_v34 = vmul.f32 %v3734_v62, %v5355_v32  ;;  %v2610_v2 = vpop.xlane.xlu0 %2609 }
0x1326   :  { %v3738_v8 = vpop.eup %3737  ;;  %v2667_v10 = vmul.f32 %v3736_v61, %v5353_v57  ;;  %3739 = vrcp.f32 %v2610_v2  ;;  %v2598_v43 = vpop.xlane.xlu1 %2597 }
0x1327   :  { %v2604_v4 = vpop.xlane.xlu2 %2603  ;;  %2703 = vst.msk [vmem:[%s4091_s25 + $0xe0] sm:$0xff] %vm2290_vm7, %v2671_v34  ;;  %v2669_v41 = vmul.f32 %v3738_v8, %v5357_v15  ;;  %3741 = vrcp.f32 %v2598_v43 }
0x1328   :  { %2699 = vst.msk [vmem:[%s4091_s25 + $0xc0] sm:$0xff] %vm2290_vm7, %v2667_v10  ;;  %3743 = vrcp.f32 %v2604_v4 }
0x1329   :  { %2701 = vst.msk [vmem:[%s4091_s25 + $0xd0] sm:$0xff] %vm2290_vm7, %v2669_v41 }
0x132c   :  { %v3740_v32 = vpop.eup %3739 }
0x132d   :  { %v3742_v11 = vpop.eup %3741  ;;  %v2674_v57 = vmul.f32 %v3740_v32, %v5370_v17  ;;  %v3179_v17 = vmax.f32 %v5419_v47, 1.0 }
0x132e   :  { %v3744_v53 = vpop.eup %3743  ;;  %v2670_v59 = vmul.f32 %v3742_v11, %v5368_v18  ;;  %v2607_v0 = vpop.xlane.xlu1 %2606 }
0x132f   :  { %2706 = vst.msk [vmem:[%s4091_s25 + $0xf8] sm:$0xff] %vm2290_vm7, %v2674_v57  ;;  %v2672_v52 = vmul.f32 %v3744_v53, %v5372_v9  ;;  %3745 = vrcp.f32 %v2607_v0 }
0x1330   :  { %2702 = vst.msk [vmem:[%s4091_s25 + $0xd8] sm:$0xff] %vm2290_vm7, %v2670_v59  ;;  %3747 = vrcp.f32 %v3179_v17 }
0x1331   :  { %2704 = vst.msk [vmem:[%s4091_s25 + $0xe8] sm:$0xff] %vm2290_vm7, %v2672_v52  ;;  %3749 = vrcp.f32 %v3180_v44 }
0x1335   :  { %v3746_v15 = vpop.eup %3745 }
0x1336   :  { %v2673_v13 = vmul.f32 %v3746_v15, %v5380_v36  ;;  %v3748_v19 = vpop.eup %3747 }
0x1337   :  { %v3750_v36 = vpop.eup %3749 }
0x1338   :  { %2705 = vst.msk [vmem:[%s4091_s25 + $0xf0] sm:$0xff] %vm2290_vm7, %v2673_v13 }
0x1353   :  { %v3144_v18 = vpop.f32.mrf.mxu2 }
0x135b   :  { %v3167_v6 = vpop.f32.mrf.mxu0  ;;  %v3147_v54 = vpop.f32.mrf.mxu2 }
0x135c   :  { %v3168_v9 = vadd.f32 %v3167_v6, %v3144_v18 }
0x135e   :  { %v3183_v5 = vmul.f32 %v3748_v19, %v3168_v9 }
0x1360   :  { %3186 = vst.msk [vmem:[%s4096_s4] sm:$0xff] %vm3185_vm0, %v3183_v5 }
0x1363   :  { %v3170_v20 = vpop.f32.mrf.mxu0 }
0x1364   :  { %v3171_v25 = vadd.f32 %v3170_v20, %v3147_v54 }
0x1366   :  { %v3184_v21 = vmul.f32 %v3750_v36, %v3171_v25 }
0x1368   :  { %3187 = vst.msk [vmem:[%s4096_s4 + $0x8] sm:$0xff] %vm3185_vm0, %v3184_v21 }
0x1369   :  { %3781 = dma.done.wait [#allocation3], 256  }
0x136a   :  { %3782 = vsyncadd [#allocation3], 4294967040 }
0x136b   :  { %3217 = vsyncpa [#allocation3], 1 }

</bundles_post_ra>
